<compile_context>
chip_gen: v7x
topology: tpu7x:2x2x1
jax: 0.10.0
libtpu: 0.0.40
codegen_flags: <defaults>
</compile_context>

<pallas_src>
import functools

import jax
import jax.numpy as jnp
from jax.experimental import pallas as pl
from jax.experimental.pallas import tpu as pltpu


# 3x3 tap orderings (dy, dx).  Must match the weight reshapes in make_params.
TAPS_PER_DY = (((0, 0), (0, 1), (0, 2)),
               ((1, 0), (1, 1), (1, 2)),
               ((2, 0), (2, 1), (2, 2)))
TAPS_FOLD_ALL = (((0, 0), (0, 1), (0, 2),
                  (1, 0), (1, 1), (1, 2),
                  (2, 0), (2, 1), (2, 2)),)


# ----------------------------- kernel helpers ------------------------------ #

def _padded_block(top_ref, xm_ref, bot_ref, pad_vec):
    """Assemble the (R+2, W+2, Cin) spatially padded input block in-kernel.

    top_ref/bot_ref : (1, W, Cin)  clamped halo rows (replaced by pad_vec at the
                                   image borders, keyed on grid axis 1).
    xm_ref          : (R, W, Cin)  main row block.
    pad_vec         : (1, Cin)     per-channel border value (zeros except conv1_1).
    """
    r, wd, cin = xm_ref.shape
    y = pl.program_id(1)
    last = pl.num_programs(1) - 1
    pv = pad_vec.reshape(1, 1, cin)
    top = jnp.where(y == 0, jnp.broadcast_to(pv, (1, wd, cin)), top_ref[...])
    bot = jnp.where(y == last, jnp.broadcast_to(pv, (1, wd, cin)), bot_ref[...])
    x = jnp.concatenate([top, xm_ref[...], bot], axis=0)           # (R+2, W, Cin)
    col = jnp.broadcast_to(pv, (r + 2, 1, cin))
    return jnp.concatenate([col, x, col], axis=1)                  # (R+2, W+2, Cin)


def _conv_core(xpad, w_ref, tap_groups):
    """3x3 conv with taps folded into the MXU contraction dim.

    xpad : (R+2, W+2, Cin) bf16 value
    w_ref: (G, len(group)*Cin, Cout) bf16 ref (resident)
    returns (R*W, Cout) f32.
    """
    rp2, wp2, cin = xpad.shape
    r, wd = rp2 - 2, wp2 - 2
    cout = w_ref.shape[-1]
    acc = jnp.zeros((r * wd, cout), jnp.float32)
    for g, taps in enumerate(tap_groups):
        lhs = jnp.concatenate(
            [xpad[dy:dy + r, dx:dx + wd, :] for dy, dx in taps], axis=-1)
        lhs = lhs.reshape(r * wd, len(taps) * cin)
        acc = acc + jnp.dot(lhs, w_ref[g], preferred_element_type=jnp.float32)
    return acc


# ----------------------------- Pallas kernels ------------------------------ #

def _conv_kernel(top_ref, xm_ref, bot_ref, pad_ref, w_ref, b_ref, o_ref,
                 *scratch, relu, pool, tap_groups):
    """3x3 conv [+ReLU] [+fused 2x2 max-pool] on an R-row block."""
    r, wd, cin = xm_ref.shape
    cout = w_ref.shape[-1]

    xpad = _padded_block(top_ref, xm_ref, bot_ref, pad_ref[...])
    acc = _conv_core(xpad, w_ref, tap_groups)                      # (R*W, Cout) f32
    acc = acc + b_ref[...].astype(jnp.float32)
    if relu:
        acc = jnp.maximum(acc, 0.0)
    acc = acc.reshape(r, wd, cout)

    if pool:
        tmp = scratch[0]                                           # (W, Cout) f32 VMEM
        wh = wd // 2
        for i in range(r // 2):
            tmp[...] = jnp.maximum(acc[2 * i], acc[2 * i + 1])     # row-pair max
            o_ref[i] = jnp.maximum(
                tmp[pl.ds(0, wh, stride=2), :],                    # even columns
                tmp[pl.ds(1, wh, stride=2), :]).astype(o_ref.dtype)  # odd columns
    else:
        o_ref[...] = acc.astype(o_ref.dtype)


def _conv_mse_kernel(top_s, xm_s, bot_s, top_h, xm_h, bot_h, w_ref, o_ref, *,
                     tap_groups):
    """conv2_2 on the (sr, hr) pair fused with the squared-diff reduction.

    Accumulates per-lane partial sums of (f_sr - f_hr)^2 into a resident
    (8, Cout) f32 block (one per batch element); the feature maps never hit HBM.
    The conv2_2 bias cancels in the difference and there is no ReLU, so it is
    omitted exactly.
    """
    r, wd, cin = xm_s.shape
    cout = w_ref.shape[-1]

    @pl.when(pl.program_id(1) == 0)
    def _init():
        o_ref[...] = jnp.zeros_like(o_ref)

    zpad = jnp.zeros((1, cin), xm_s.dtype)
    f_s = _conv_core(_padded_block(top_s, xm_s, bot_s, zpad), w_ref, tap_groups)
    f_h = _conv_core(_padded_block(top_h, xm_h, bot_h, zpad), w_ref, tap_groups)
    d = f_s - f_h                                                  # (R*W, Cout) f32
    o_ref[...] += jnp.sum((d * d).reshape(-1, 8, cout), axis=0)


def _l1_kernel(a_ref, b_ref, o_ref):
    """Accumulate per-lane partial sums of |a - b| into a resident (8, K) block."""
    @pl.when(pl.program_id(0) == 0)
    def _init():
        o_ref[...] = jnp.zeros_like(o_ref)

    d = jnp.abs(a_ref[...].astype(jnp.float32) - b_ref[...].astype(jnp.float32))
    o_ref[...] += jnp.sum(d.reshape(-1, 8, d.shape[-1]), axis=0)


# ------------------------------ op wrappers -------------------------------- #

def _row_block(h, cap=8, even=False):
    """Largest divisor of h that is <= cap (and even if requested)."""
    best = 1
    for t in range(1, min(cap, h) + 1):
        if h % t == 0 and (not even or t % 2 == 0):
            best = t
    return best


def conv3x3(x, w, b, pad, *, tap_groups, relu, pool=False,
            out_dtype=jnp.bfloat16, row_cap=8):
    """3x3 conv (stride 1, pad 1) [+ReLU] [+fused 2x2 max-pool].

    x   : (B, H, W, Cin)  bf16
    w   : (G, Kg, Cout)   bf16  (taps folded into the contraction dim)
    b   : (1, Cout)       f32
    pad : (1, Cin)        bf16  per-channel border value
    """
    n, h, wd, cin = x.shape
    g, kg, cout = w.shape
    assert g == len(tap_groups) and kg == len(tap_groups[0]) * cin
    if pool:
        assert h % 2 == 0 and wd % 2 == 0, "H and W must be even for pooling"

    r = _row_block(h, cap=row_cap, even=pool)
    grid = (n, h // r)

    def top_map(bi, y):
        return (bi, jnp.maximum(y * r - 1, 0), 0, 0)

    def main_map(bi, y):
        return (bi, y, 0, 0)

    def bot_map(bi, y):
        return (bi, jnp.minimum((y + 1) * r, h - 1), 0, 0)

    in_specs = [
        pl.BlockSpec((None, 1, wd, cin), top_map),     # top halo row (clamped)
        pl.BlockSpec((None, r, wd, cin), main_map),    # main row block
        pl.BlockSpec((None, 1, wd, cin), bot_map),     # bottom halo row (clamped)
        pl.BlockSpec((1, cin), lambda bi, y: (0, 0)),          # border pad value
        pl.BlockSpec((g, kg, cout), lambda bi, y: (0, 0, 0)),  # weights (resident)
        pl.BlockSpec((1, cout), lambda bi, y: (0, 0)),         # bias (resident)
    ]

    if pool:
        out_shape = jax.ShapeDtypeStruct((n, h // 2, wd // 2, cout), out_dtype)
        out_spec = pl.BlockSpec((None, r // 2, wd // 2, cout), main_map)
        scratch = [pltpu.VMEM((wd, cout), jnp.float32)]
    else:
        out_shape = jax.ShapeDtypeStruct((n, h, wd, cout), out_dtype)
        out_spec = pl.BlockSpec((None, r, wd, cout), main_map)
        scratch = []

    kernel = functools.partial(_conv_kernel, relu=relu, pool=pool,
                               tap_groups=tap_groups)
    return pl.pallas_call(
        kernel,
        out_shape=out_shape,
        grid=grid,
        in_specs=in_specs,
        out_specs=out_spec,
        scratch_shapes=scratch,
        compiler_params=pltpu.CompilerParams(
            dimension_semantics=("parallel", "parallel")),
    )(x, x, x, pad, w, b)


def conv_mse_sum(x, w, *, tap_groups, n_pairs, row_cap=8):
    """Fused conv2_2 + sum((f_sr - f_hr)^2).  x holds [sr; hr] on the batch axis."""
    b2n, h, wd, cin = x.shape
    g, kg, cout = w.shape
    assert b2n == 2 * n_pairs
    assert g == len(tap_groups) and kg == len(tap_groups[0]) * cin

    r = _row_block(h, cap=row_cap)
    assert (r * wd) % 8 == 0, "row block * width must be a multiple of 8"
    grid = (n_pairs, h // r)

    def maps(off):
        top = lambda bi, y: (bi + off, jnp.maximum(y * r - 1, 0), 0, 0)
        mid = lambda bi, y: (bi + off, y, 0, 0)
        bot = lambda bi, y: (bi + off, jnp.minimum((y + 1) * r, h - 1), 0, 0)
        return top, mid, bot

    ts, ms, bs = maps(0)            # sr half of the batch
    th, mh, bh = maps(n_pairs)      # hr half of the batch

    in_specs = [
        pl.BlockSpec((None, 1, wd, cin), ts),
        pl.BlockSpec((None, r, wd, cin), ms),
        pl.BlockSpec((None, 1, wd, cin), bs),
        pl.BlockSpec((None, 1, wd, cin), th),
        pl.BlockSpec((None, r, wd, cin), mh),
        pl.BlockSpec((None, 1, wd, cin), bh),
        pl.BlockSpec((g, kg, cout), lambda bi, y: (0, 0, 0)),
    ]
    out_shape = jax.ShapeDtypeStruct((n_pairs, 8, cout), jnp.float32)
    out_spec = pl.BlockSpec((None, 8, cout), lambda bi, y: (bi, 0, 0))

    partials = pl.pallas_call(
        functools.partial(_conv_mse_kernel, tap_groups=tap_groups),
        out_shape=out_shape,
        grid=grid,
        in_specs=in_specs,
        out_specs=out_spec,
        compiler_params=pltpu.CompilerParams(
            dimension_semantics=("parallel", "arbitrary")),
    )(x, x, x, x, x, x, w)
    return jnp.sum(partials)        # tiny final reduce in JAX


def _pick_rows(m, k, max_elems=1 << 18):
    """Largest multiple-of-8 divisor of m keeping a block under ~max_elems."""
    cap = max(8, min(m, max_elems // max(k, 1)))
    best = 8
    for t in range(8, cap + 1, 8):
        if m % t == 0:
            best = t
    return best


def l1_mean(a, b):
    """mean(|a-b|) via a tiled Pallas reduction with (8, K) partial sums."""
    assert a.shape == b.shape
    total = a.size
    n, h, w, c = a.shape
    m, k = n * h, w * c
    a2 = a.reshape(m, k)
    b2 = b.reshape(m, k)
    if m % 8:                                   # pad rows with zeros (contribute 0)
        extra = 8 - m % 8
        a2 = jnp.concatenate([a2, jnp.zeros((extra, k), a2.dtype)], axis=0)
        b2 = jnp.concatenate([b2, jnp.zeros((extra, k), b2.dtype)], axis=0)
        m += extra

    tm = _pick_rows(m, k)
    partials = pl.pallas_call(
        _l1_kernel,
        out_shape=jax.ShapeDtypeStruct((8, k), jnp.float32),
        grid=(m // tm,),
        in_specs=[pl.BlockSpec((tm, k), lambda i: (i, 0)),
                  pl.BlockSpec((tm, k), lambda i: (i, 0))],
        out_specs=pl.BlockSpec((8, k), lambda i: (0, 0)),
        compiler_params=pltpu.CompilerParams(dimension_semantics=("arbitrary",)),
    )(a2, b2)
    return jnp.sum(partials) / total


# ------------------------------ parameters ---------------------------------- #

def make_params(rgb_range=3.0):
    key = jax.random.PRNGKey(0)
    ks = jax.random.split(key, 4)

    def init_conv(k, cin, cout):
        w = jax.random.normal(k, (3, 3, cin, cout), jnp.float32) / jnp.sqrt(9.0 * cin)
        b = jnp.zeros((cout,), jnp.float32)
        return w, b

    vgg_mean = jnp.array([0.485, 0.456, 0.406], jnp.float32)
    vgg_std = jnp.array([0.229, 0.224, 0.225], jnp.float32) * rgb_range
    scale = 1.0 / vgg_std                       # MeanShift diag weight
    shift = -rgb_range * vgg_mean / vgg_std     # MeanShift bias (sign = -1)

    shapes = [(3, 64), (64, 64), (64, 128), (128, 128)]
    raw = [init_conv(ks[i], cin, cout) for i, (cin, cout) in enumerate(shapes)]

    # Fold MeanShift (y = x*scale + shift, zero-padded) into conv1_1:
    #   w0' = w0 * scale ;  b0' = b0 + sum_{taps,cin} w0 * shift
    # and pad conv1_1's raw input with -shift/scale so border pixels match the
    # original "shift then zero-pad" exactly.
    w0, b0 = raw[0]
    b0f = b0 + jnp.einsum("yxio,i->o", w0, shift)
    w0f = w0 * scale[None, None, :, None]
    raw[0] = (w0f, b0f)
    pad0 = -shift / scale                       # = rgb_range * vgg_mean

    params = {"pad0": pad0.reshape(1, 3).astype(jnp.bfloat16)}

    # conv1_1 (Cin=3): fold all 9 taps into one K=27 contraction.
    w, b = raw[0]
    params["w0"] = w.reshape(1, 27, 64).astype(jnp.bfloat16)
    params["b0"] = b.reshape(1, 64).astype(jnp.float32)

    # Remaining layers: per-dy folding, K = 3*Cin.
    for i in range(1, 4):
        w, b = raw[i]
        cin, cout = w.shape[2], w.shape[3]
        params[f"w{i}"] = w.reshape(3, 3 * cin, cout).astype(jnp.bfloat16)
        params[f"b{i}"] = b.reshape(1, cout).astype(jnp.float32)
        params[f"pad{i}"] = jnp.zeros((1, cin), jnp.bfloat16)
    return params


# ------------------------------ full forward -------------------------------- #

def tdpn_loss_forward(sr_nchw, hr_nchw, params):
    # Inputs are NCHW (PyTorch convention); kernels run on NHWC.
    sr = jnp.transpose(sr_nchw, (0, 2, 3, 1)).astype(jnp.float32)
    hr = jnp.transpose(hr_nchw, (0, 2, 3, 1)).astype(jnp.float32)
    n = sr.shape[0]

    # Batch sr & hr through the VGG path together (weights resident once).
    x = jnp.concatenate([sr, hr], axis=0).astype(jnp.bfloat16)

    # vgg19.features[:8] with MeanShift folded into conv1_1.
    x = conv3x3(x, params["w0"], params["b0"], params["pad0"],
                tap_groups=TAPS_FOLD_ALL, relu=True)               # conv1_1 + ReLU
    x = conv3x3(x, params["w1"], params["b1"], params["pad1"],
                tap_groups=TAPS_PER_DY, relu=True, pool=True)      # conv1_2 + ReLU + MaxPool2
    x = conv3x3(x, params["w2"], params["b2"], params["pad2"],
                tap_groups=TAPS_PER_DY, relu=True)                 # conv2_1 + ReLU
    # conv2_2 fused with the MSE reduction (hr branch is detached in torch;
    # forward-only here, so the fusion is exact).
    sq_sum = conv_mse_sum(x, params["w3"], tap_groups=TAPS_PER_DY, n_pairs=n)
    feat_count = n * x.shape[1] * x.shape[2] * params["w3"].shape[-1]
    mse = sq_sum / feat_count

    l1 = l1_mean(sr, hr)
    return l1 + 0.05 * mse


if __name__ == "__main__":
    rgb_range = 3.0
    N, C, H, W = 2, 3, 16, 16
    key = jax.random.PRNGKey(0)
    k_sr, k_hr = jax.random.split(key)
    sr = jax.random.uniform(k_sr, (N, C, H, W), jnp.float32) * rgb_range
    hr = jax.random.uniform(k_hr, (N, C, H, W), jnp.float32) * rgb_range

    params = make_params(rgb_range)
    loss_fn = jax.jit(lambda a, b: tdpn_loss_forward(a, b, params))
    loss = loss_fn(sr, hr)
    jax.block_until_ready(loss)
    assert loss.shape == () and bool(jnp.isfinite(loss))
    print("KERNEL_OK")
</pallas_src>

<mosaic_0001>
module attributes {stable_mosaic.version = 11 : i64} {
  func.func @_conv_kernel(%arg0: i32, %arg1: i32, %arg2: memref<1x1x16x3xbf16, #tpu.memory_space<vmem>>, %arg3: memref<1x8x16x3xbf16, #tpu.memory_space<vmem>>, %arg4: memref<1x1x16x3xbf16, #tpu.memory_space<vmem>>, %arg5: memref<1x3xbf16, #tpu.memory_space<vmem>>, %arg6: memref<1x27x64xbf16, #tpu.memory_space<vmem>>, %arg7: memref<1x64xf32, #tpu.memory_space<vmem>>, %arg8: memref<1x8x16x64xbf16, #tpu.memory_space<vmem>>) attributes {dimension_semantics = [#tpu.dimension_semantics<parallel>, #tpu.dimension_semantics<parallel>], iteration_bounds = array<i64: 4, 2>, scalar_prefetch = 0 : i64, scratch_operands = 0 : i64, tpu.core_type = #tpu.core_type<tc>, window_params = [{transform_indices = @transform_0, window_bounds = array<i64: 1, 1, 16, 3>}, {transform_indices = @transform_1, window_bounds = array<i64: 1, 8, 16, 3>}, {transform_indices = @transform_2, window_bounds = array<i64: 1, 1, 16, 3>}, {pipeline_mode = #tpu.pipeline_mode<synchronous>, transform_indices = @transform_3, window_bounds = array<i64: 1, 3>}, {pipeline_mode = #tpu.pipeline_mode<synchronous>, transform_indices = @transform_4, window_bounds = array<i64: 1, 27, 64>}, {pipeline_mode = #tpu.pipeline_mode<synchronous>, transform_indices = @transform_5, window_bounds = array<i64: 1, 64>}, {transform_indices = @transform_6, window_bounds = array<i64: 1, 8, 16, 64>}]} {
    %c0 = arith.constant 0 : index
    %c0_0 = arith.constant 0 : index
    %0 = vector.load %arg5[%c0, %c0_0] : memref<1x3xbf16, #tpu.memory_space<vmem>>, vector<1x3xbf16>
    %1 = vector.shape_cast %0 : vector<1x3xbf16> to vector<1x1x3xbf16>
    %c0_i32 = arith.constant 0 : i32
    %2 = arith.cmpi eq, %arg1, %c0_i32 : i32
    %3 = vector.shape_cast %1 : vector<1x1x3xbf16> to vector<1x1x3xbf16>
    %4 = vector.broadcast %3 : vector<1x1x3xbf16> to vector<1x16x3xbf16>
    %c0_1 = arith.constant 0 : index
    %c0_2 = arith.constant 0 : index
    %c0_3 = arith.constant 0 : index
    %c0_4 = arith.constant 0 : index
    %5 = vector.load %arg2[%c0_1, %c0_2, %c0_3, %c0_4] : memref<1x1x16x3xbf16, #tpu.memory_space<vmem>>, vector<1x1x16x3xbf16>
    %6 = vector.shape_cast %5 : vector<1x1x16x3xbf16> to vector<1x16x3xbf16>
    %7 = arith.select %2, %4, %6 : vector<1x16x3xbf16>
    %c1_i32 = arith.constant 1 : i32
    %8 = arith.cmpi eq, %arg1, %c1_i32 : i32
    %9 = vector.shape_cast %1 : vector<1x1x3xbf16> to vector<1x1x3xbf16>
    %10 = vector.broadcast %9 : vector<1x1x3xbf16> to vector<1x16x3xbf16>
    %c0_5 = arith.constant 0 : index
    %c0_6 = arith.constant 0 : index
    %c0_7 = arith.constant 0 : index
    %c0_8 = arith.constant 0 : index
    %11 = vector.load %arg4[%c0_5, %c0_6, %c0_7, %c0_8] : memref<1x1x16x3xbf16, #tpu.memory_space<vmem>>, vector<1x1x16x3xbf16>
    %12 = vector.shape_cast %11 : vector<1x1x16x3xbf16> to vector<1x16x3xbf16>
    %13 = arith.select %8, %10, %12 : vector<1x16x3xbf16>
    %c0_9 = arith.constant 0 : index
    %c0_10 = arith.constant 0 : index
    %c0_11 = arith.constant 0 : index
    %c0_12 = arith.constant 0 : index
    %14 = vector.load %arg3[%c0_9, %c0_10, %c0_11, %c0_12] : memref<1x8x16x3xbf16, #tpu.memory_space<vmem>>, vector<1x8x16x3xbf16>
    %15 = vector.shape_cast %14 : vector<1x8x16x3xbf16> to vector<8x16x3xbf16>
    %16 = tpu.concatenate %7, %15, %13 in 0 : vector<1x16x3xbf16>, vector<8x16x3xbf16>, vector<1x16x3xbf16> -> vector<10x16x3xbf16>
    %17 = vector.shape_cast %1 : vector<1x1x3xbf16> to vector<1x1x3xbf16>
    %18 = vector.broadcast %17 : vector<1x1x3xbf16> to vector<10x1x3xbf16>
    %19 = tpu.concatenate %18, %16, %18 in 1 : vector<10x1x3xbf16>, vector<10x16x3xbf16>, vector<10x1x3xbf16> -> vector<10x18x3xbf16>
    %cst = arith.constant 0.000000e+00 : f32
    %20 = vector.broadcast %cst : f32 to vector<128x64xf32>
    %21 = vector.extract_strided_slice %19 {offsets = [0, 0, 0], sizes = [8, 16, 3], strides = [1, 1, 1]} : vector<10x18x3xbf16> to vector<8x16x3xbf16>
    %22 = vector.extract_strided_slice %19 {offsets = [0, 1, 0], sizes = [8, 16, 3], strides = [1, 1, 1]} : vector<10x18x3xbf16> to vector<8x16x3xbf16>
    %23 = vector.extract_strided_slice %19 {offsets = [0, 2, 0], sizes = [8, 16, 3], strides = [1, 1, 1]} : vector<10x18x3xbf16> to vector<8x16x3xbf16>
    %24 = vector.extract_strided_slice %19 {offsets = [1, 0, 0], sizes = [8, 16, 3], strides = [1, 1, 1]} : vector<10x18x3xbf16> to vector<8x16x3xbf16>
    %25 = vector.extract_strided_slice %19 {offsets = [1, 1, 0], sizes = [8, 16, 3], strides = [1, 1, 1]} : vector<10x18x3xbf16> to vector<8x16x3xbf16>
    %26 = vector.extract_strided_slice %19 {offsets = [1, 2, 0], sizes = [8, 16, 3], strides = [1, 1, 1]} : vector<10x18x3xbf16> to vector<8x16x3xbf16>
    %27 = vector.extract_strided_slice %19 {offsets = [2, 0, 0], sizes = [8, 16, 3], strides = [1, 1, 1]} : vector<10x18x3xbf16> to vector<8x16x3xbf16>
    %28 = vector.extract_strided_slice %19 {offsets = [2, 1, 0], sizes = [8, 16, 3], strides = [1, 1, 1]} : vector<10x18x3xbf16> to vector<8x16x3xbf16>
    %29 = vector.extract_strided_slice %19 {offsets = [2, 2, 0], sizes = [8, 16, 3], strides = [1, 1, 1]} : vector<10x18x3xbf16> to vector<8x16x3xbf16>
    %30 = tpu.concatenate %21, %22, %23, %24, %25, %26, %27, %28, %29 in 2 : vector<8x16x3xbf16>, vector<8x16x3xbf16>, vector<8x16x3xbf16>, vector<8x16x3xbf16>, vector<8x16x3xbf16>, vector<8x16x3xbf16>, vector<8x16x3xbf16>, vector<8x16x3xbf16>, vector<8x16x3xbf16> -> vector<8x16x27xbf16>
    %31 = vector.shape_cast %30 : vector<8x16x27xbf16> to vector<128x27xbf16>
    %c0_13 = arith.constant 0 : index
    %c0_14 = arith.constant 0 : index
    %c0_15 = arith.constant 0 : index
    %32 = vector.load %arg6[%c0_13, %c0_14, %c0_15] : memref<1x27x64xbf16, #tpu.memory_space<vmem>>, vector<1x27x64xbf16>
    %33 = vector.shape_cast %32 : vector<1x27x64xbf16> to vector<27x64xbf16>
    %cst_16 = arith.constant dense<0.000000e+00> : vector<128x64xf32>
    %34 = tpu.matmul %31, %33, %cst_16 {dimension_numbers = #tpu.dot_dimension_numbers<[1], [0], [0], [1], [0, 0, 1, 1], [], []>} : vector<128x27xbf16>, vector<27x64xbf16>, vector<128x64xf32> -> vector<128x64xf32>
    %35 = arith.addf %20, %34 : vector<128x64xf32>
    %c0_17 = arith.constant 0 : index
    %c0_18 = arith.constant 0 : index
    %36 = vector.load %arg7[%c0_17, %c0_18] : memref<1x64xf32, #tpu.memory_space<vmem>>, vector<1x64xf32>
    %37 = vector.broadcast %36 : vector<1x64xf32> to vector<128x64xf32>
    %38 = arith.addf %35, %37 : vector<128x64xf32>
    %cst_19 = arith.constant 0.000000e+00 : f32
    %39 = vector.broadcast %cst_19 : f32 to vector<128x64xf32>
    %40 = arith.maximumf %38, %39 : vector<128x64xf32>
    %41 = vector.shape_cast %40 : vector<128x64xf32> to vector<8x16x64xf32>
    %42 = arith.truncf %41 : vector<8x16x64xf32> to vector<8x16x64xbf16>
    %c0_20 = arith.constant 0 : index
    %c0_21 = arith.constant 0 : index
    %c0_22 = arith.constant 0 : index
    %c0_23 = arith.constant 0 : index
    %43 = vector.load %arg8[%c0_20, %c0_21, %c0_22, %c0_23] : memref<1x8x16x64xbf16, #tpu.memory_space<vmem>>, vector<1x8x16x64xbf16>
    %44 = vector.shape_cast %43 : vector<1x8x16x64xbf16> to vector<8x16x64xbf16>
    %45 = vector.shape_cast %42 : vector<8x16x64xbf16> to vector<1x8x16x64xbf16>
    tpu.vector_store %arg8[%c0_20, %c0_21, %c0_22, %c0_23], %45 {strides = array<i32>} : memref<1x8x16x64xbf16, #tpu.memory_space<vmem>>, vector<1x8x16x64xbf16>,
    return
  }
  func.func @transform_0(%arg0: i32, %arg1: i32) -> (i32, i32, i32, i32) {
    %c8_i32 = arith.constant 8 : i32
    %0 = arith.muli %arg1, %c8_i32 : i32
    %c1_i32 = arith.constant 1 : i32
    %1 = arith.subi %0, %c1_i32 : i32
    %c0_i32 = arith.constant 0 : i32
    %2 = arith.maxsi %1, %c0_i32 : i32
    %c0_i32_0 = arith.constant 0 : i32
    %c0_i32_1 = arith.constant 0 : i32
    %c0_i32_2 = arith.constant 0 : i32
    return %arg0, %2, %c0_i32_0, %c0_i32_1 : i32, i32, i32, i32
  }
  func.func @transform_1(%arg0: i32, %arg1: i32) -> (i32, i32, i32, i32) {
    %c0_i32 = arith.constant 0 : i32
    %c0_i32_0 = arith.constant 0 : i32
    %c0_i32_1 = arith.constant 0 : i32
    return %arg0, %arg1, %c0_i32, %c0_i32_0 : i32, i32, i32, i32
  }
  func.func @transform_2(%arg0: i32, %arg1: i32) -> (i32, i32, i32, i32) {
    %c1_i32 = arith.constant 1 : i32
    %0 = arith.addi %arg1, %c1_i32 : i32
    %c8_i32 = arith.constant 8 : i32
    %1 = arith.muli %0, %c8_i32 : i32
    %c15_i32 = arith.constant 15 : i32
    %2 = arith.minsi %1, %c15_i32 : i32
    %c0_i32 = arith.constant 0 : i32
    %c0_i32_0 = arith.constant 0 : i32
    %c0_i32_1 = arith.constant 0 : i32
    return %arg0, %2, %c0_i32, %c0_i32_0 : i32, i32, i32, i32
  }
  func.func @transform_3(%arg0: i32, %arg1: i32) -> (i32, i32) {
    %c0_i32 = arith.constant 0 : i32
    %c0_i32_0 = arith.constant 0 : i32
    %c0_i32_1 = arith.constant 0 : i32
    return %c0_i32, %c0_i32_0 : i32, i32
  }
  func.func @transform_4(%arg0: i32, %arg1: i32) -> (i32, i32, i32) {
    %c0_i32 = arith.constant 0 : i32
    %c0_i32_0 = arith.constant 0 : i32
    %c0_i32_1 = arith.constant 0 : i32
    %c0_i32_2 = arith.constant 0 : i32
    return %c0_i32, %c0_i32_0, %c0_i32_1 : i32, i32, i32
  }
  func.func @transform_5(%arg0: i32, %arg1: i32) -> (i32, i32) {
    %c0_i32 = arith.constant 0 : i32
    %c0_i32_0 = arith.constant 0 : i32
    %c0_i32_1 = arith.constant 0 : i32
    return %c0_i32, %c0_i32_0 : i32, i32
  }
  func.func @transform_6(%arg0: i32, %arg1: i32) -> (i32, i32, i32, i32) {
    %c0_i32 = arith.constant 0 : i32
    %c0_i32_0 = arith.constant 0 : i32
    %c0_i32_1 = arith.constant 0 : i32
    return %arg0, %arg1, %c0_i32, %c0_i32_0 : i32, i32, i32, i32
  }
}

module attributes {stable_mosaic.version = 11 : i64} {
  func.func @_conv_kernel(%arg0: i32, %arg1: i32, %arg2: memref<1x1x16x64xbf16, #tpu.memory_space<vmem>>, %arg3: memref<1x8x16x64xbf16, #tpu.memory_space<vmem>>, %arg4: memref<1x1x16x64xbf16, #tpu.memory_space<vmem>>, %arg5: memref<1x64xbf16, #tpu.memory_space<vmem>>, %arg6: memref<3x192x64xbf16, #tpu.memory_space<vmem>>, %arg7: memref<1x64xf32, #tpu.memory_space<vmem>>, %arg8: memref<1x4x8x64xbf16, #tpu.memory_space<vmem>>, %arg9: memref<16x64xf32, #tpu.memory_space<vmem>>) attributes {dimension_semantics = [#tpu.dimension_semantics<parallel>, #tpu.dimension_semantics<parallel>], iteration_bounds = array<i64: 4, 2>, scalar_prefetch = 0 : i64, scratch_operands = 1 : i64, tpu.core_type = #tpu.core_type<tc>, window_params = [{transform_indices = @transform_0, window_bounds = array<i64: 1, 1, 16, 64>}, {transform_indices = @transform_1, window_bounds = array<i64: 1, 8, 16, 64>}, {transform_indices = @transform_2, window_bounds = array<i64: 1, 1, 16, 64>}, {pipeline_mode = #tpu.pipeline_mode<synchronous>, transform_indices = @transform_3, window_bounds = array<i64: 1, 64>}, {pipeline_mode = #tpu.pipeline_mode<synchronous>, transform_indices = @transform_4, window_bounds = array<i64: 3, 192, 64>}, {pipeline_mode = #tpu.pipeline_mode<synchronous>, transform_indices = @transform_5, window_bounds = array<i64: 1, 64>}, {transform_indices = @transform_6, window_bounds = array<i64: 1, 4, 8, 64>}]} {
    %c0 = arith.constant 0 : index
    %c0_0 = arith.constant 0 : index
    %0 = vector.load %arg5[%c0, %c0_0] : memref<1x64xbf16, #tpu.memory_space<vmem>>, vector<1x64xbf16>
    %1 = vector.shape_cast %0 : vector<1x64xbf16> to vector<1x1x64xbf16>
    %c0_i32 = arith.constant 0 : i32
    %2 = arith.cmpi eq, %arg1, %c0_i32 : i32
    %3 = vector.shape_cast %1 : vector<1x1x64xbf16> to vector<1x1x64xbf16>
    %4 = vector.broadcast %3 : vector<1x1x64xbf16> to vector<1x16x64xbf16>
    %c0_1 = arith.constant 0 : index
    %c0_2 = arith.constant 0 : index
    %c0_3 = arith.constant 0 : index
    %c0_4 = arith.constant 0 : index
    %5 = vector.load %arg2[%c0_1, %c0_2, %c0_3, %c0_4] : memref<1x1x16x64xbf16, #tpu.memory_space<vmem>>, vector<1x1x16x64xbf16>
    %6 = vector.shape_cast %5 : vector<1x1x16x64xbf16> to vector<1x16x64xbf16>
    %7 = arith.select %2, %4, %6 : vector<1x16x64xbf16>
    %c1_i32 = arith.constant 1 : i32
    %8 = arith.cmpi eq, %arg1, %c1_i32 : i32
    %9 = vector.shape_cast %1 : vector<1x1x64xbf16> to vector<1x1x64xbf16>
    %10 = vector.broadcast %9 : vector<1x1x64xbf16> to vector<1x16x64xbf16>
    %c0_5 = arith.constant 0 : index
    %c0_6 = arith.constant 0 : index
    %c0_7 = arith.constant 0 : index
    %c0_8 = arith.constant 0 : index
    %11 = vector.load %arg4[%c0_5, %c0_6, %c0_7, %c0_8] : memref<1x1x16x64xbf16, #tpu.memory_space<vmem>>, vector<1x1x16x64xbf16>
    %12 = vector.shape_cast %11 : vector<1x1x16x64xbf16> to vector<1x16x64xbf16>
    %13 = arith.select %8, %10, %12 : vector<1x16x64xbf16>
    %c0_9 = arith.constant 0 : index
    %c0_10 = arith.constant 0 : index
    %c0_11 = arith.constant 0 : index
    %c0_12 = arith.constant 0 : index
    %14 = vector.load %arg3[%c0_9, %c0_10, %c0_11, %c0_12] : memref<1x8x16x64xbf16, #tpu.memory_space<vmem>>, vector<1x8x16x64xbf16>
    %15 = vector.shape_cast %14 : vector<1x8x16x64xbf16> to vector<8x16x64xbf16>
    %16 = tpu.concatenate %7, %15, %13 in 0 : vector<1x16x64xbf16>, vector<8x16x64xbf16>, vector<1x16x64xbf16> -> vector<10x16x64xbf16>
    %17 = vector.shape_cast %1 : vector<1x1x64xbf16> to vector<1x1x64xbf16>
    %18 = vector.broadcast %17 : vector<1x1x64xbf16> to vector<10x1x64xbf16>
    %19 = tpu.concatenate %18, %16, %18 in 1 : vector<10x1x64xbf16>, vector<10x16x64xbf16>, vector<10x1x64xbf16> -> vector<10x18x64xbf16>
    %cst = arith.constant 0.000000e+00 : f32
    %20 = vector.broadcast %cst : f32 to vector<128x64xf32>
    %21 = vector.extract_strided_slice %19 {offsets = [0, 0, 0], sizes = [8, 16, 64], strides = [1, 1, 1]} : vector<10x18x64xbf16> to vector<8x16x64xbf16>
    %22 = vector.extract_strided_slice %19 {offsets = [0, 1, 0], sizes = [8, 16, 64], strides = [1, 1, 1]} : vector<10x18x64xbf16> to vector<8x16x64xbf16>
    %23 = vector.extract_strided_slice %19 {offsets = [0, 2, 0], sizes = [8, 16, 64], strides = [1, 1, 1]} : vector<10x18x64xbf16> to vector<8x16x64xbf16>
    %24 = tpu.concatenate %21, %22, %23 in 2 : vector<8x16x64xbf16>, vector<8x16x64xbf16>, vector<8x16x64xbf16> -> vector<8x16x192xbf16>
    %25 = vector.shape_cast %24 : vector<8x16x192xbf16> to vector<128x192xbf16>
    %c0_13 = arith.constant 0 : index
    %c0_14 = arith.constant 0 : index
    %c0_15 = arith.constant 0 : index
    %26 = vector.load %arg6[%c0_13, %c0_14, %c0_15] : memref<3x192x64xbf16, #tpu.memory_space<vmem>>, vector<1x192x64xbf16>
    %27 = vector.shape_cast %26 : vector<1x192x64xbf16> to vector<192x64xbf16>
    %cst_16 = arith.constant dense<0.000000e+00> : vector<128x64xf32>
    %28 = tpu.matmul %25, %27, %cst_16 {dimension_numbers = #tpu.dot_dimension_numbers<[1], [0], [0], [1], [0, 0, 1, 1], [], []>} : vector<128x192xbf16>, vector<192x64xbf16>, vector<128x64xf32> -> vector<128x64xf32>
    %29 = arith.addf %20, %28 : vector<128x64xf32>
    %30 = vector.extract_strided_slice %19 {offsets = [1, 0, 0], sizes = [8, 16, 64], strides = [1, 1, 1]} : vector<10x18x64xbf16> to vector<8x16x64xbf16>
    %31 = vector.extract_strided_slice %19 {offsets = [1, 1, 0], sizes = [8, 16, 64], strides = [1, 1, 1]} : vector<10x18x64xbf16> to vector<8x16x64xbf16>
    %32 = vector.extract_strided_slice %19 {offsets = [1, 2, 0], sizes = [8, 16, 64], strides = [1, 1, 1]} : vector<10x18x64xbf16> to vector<8x16x64xbf16>
    %33 = tpu.concatenate %30, %31, %32 in 2 : vector<8x16x64xbf16>, vector<8x16x64xbf16>, vector<8x16x64xbf16> -> vector<8x16x192xbf16>
    %34 = vector.shape_cast %33 : vector<8x16x192xbf16> to vector<128x192xbf16>
    %c1 = arith.constant 1 : index
    %c0_17 = arith.constant 0 : index
    %c0_18 = arith.constant 0 : index
    %35 = vector.load %arg6[%c1, %c0_17, %c0_18] : memref<3x192x64xbf16, #tpu.memory_space<vmem>>, vector<1x192x64xbf16>
    %36 = vector.shape_cast %35 : vector<1x192x64xbf16> to vector<192x64xbf16>
    %cst_19 = arith.constant dense<0.000000e+00> : vector<128x64xf32>
    %37 = tpu.matmul %34, %36, %cst_19 {dimension_numbers = #tpu.dot_dimension_numbers<[1], [0], [0], [1], [0, 0, 1, 1], [], []>} : vector<128x192xbf16>, vector<192x64xbf16>, vector<128x64xf32> -> vector<128x64xf32>
    %38 = arith.addf %29, %37 : vector<128x64xf32>
    %39 = vector.extract_strided_slice %19 {offsets = [2, 0, 0], sizes = [8, 16, 64], strides = [1, 1, 1]} : vector<10x18x64xbf16> to vector<8x16x64xbf16>
    %40 = vector.extract_strided_slice %19 {offsets = [2, 1, 0], sizes = [8, 16, 64], strides = [1, 1, 1]} : vector<10x18x64xbf16> to vector<8x16x64xbf16>
    %41 = vector.extract_strided_slice %19 {offsets = [2, 2, 0], sizes = [8, 16, 64], strides = [1, 1, 1]} : vector<10x18x64xbf16> to vector<8x16x64xbf16>
    %42 = tpu.concatenate %39, %40, %41 in 2 : vector<8x16x64xbf16>, vector<8x16x64xbf16>, vector<8x16x64xbf16> -> vector<8x16x192xbf16>
    %43 = vector.shape_cast %42 : vector<8x16x192xbf16> to vector<128x192xbf16>
    %c2 = arith.constant 2 : index
    %c0_20 = arith.constant 0 : index
    %c0_21 = arith.constant 0 : index
    %44 = vector.load %arg6[%c2, %c0_20, %c0_21] : memref<3x192x64xbf16, #tpu.memory_space<vmem>>, vector<1x192x64xbf16>
    %45 = vector.shape_cast %44 : vector<1x192x64xbf16> to vector<192x64xbf16>
    %cst_22 = arith.constant dense<0.000000e+00> : vector<128x64xf32>
    %46 = tpu.matmul %43, %45, %cst_22 {dimension_numbers = #tpu.dot_dimension_numbers<[1], [0], [0], [1], [0, 0, 1, 1], [], []>} : vector<128x192xbf16>, vector<192x64xbf16>, vector<128x64xf32> -> vector<128x64xf32>
    %47 = arith.addf %38, %46 : vector<128x64xf32>
    %c0_23 = arith.constant 0 : index
    %c0_24 = arith.constant 0 : index
    %48 = vector.load %arg7[%c0_23, %c0_24] : memref<1x64xf32, #tpu.memory_space<vmem>>, vector<1x64xf32>
    %49 = vector.broadcast %48 : vector<1x64xf32> to vector<128x64xf32>
    %50 = arith.addf %47, %49 : vector<128x64xf32>
    %cst_25 = arith.constant 0.000000e+00 : f32
    %51 = vector.broadcast %cst_25 : f32 to vector<128x64xf32>
    %52 = arith.maximumf %50, %51 : vector<128x64xf32>
    %53 = vector.shape_cast %52 : vector<128x64xf32> to vector<8x16x64xf32>
    %54 = vector.extract_strided_slice %53 {offsets = [0, 0, 0], sizes = [1, 16, 64], strides = [1, 1, 1]} : vector<8x16x64xf32> to vector<1x16x64xf32>
    %55 = vector.shape_cast %54 : vector<1x16x64xf32> to vector<16x64xf32>
    %56 = vector.extract_strided_slice %53 {offsets = [1, 0, 0], sizes = [1, 16, 64], strides = [1, 1, 1]} : vector<8x16x64xf32> to vector<1x16x64xf32>
    %57 = vector.shape_cast %56 : vector<1x16x64xf32> to vector<16x64xf32>
    %58 = arith.maximumf %55, %57 : vector<16x64xf32>
    %c0_26 = arith.constant 0 : index
    %c0_27 = arith.constant 0 : index
    %59 = vector.load %arg9[%c0_26, %c0_27] : memref<16x64xf32, #tpu.memory_space<vmem>>, vector<16x64xf32>
    tpu.vector_store %arg9[%c0_26, %c0_27], %58 {strides = array<i32>} : memref<16x64xf32, #tpu.memory_space<vmem>>, vector<16x64xf32>,
    %c0_28 = arith.constant 0 : index
    %c0_29 = arith.constant 0 : index
    %60 = tpu.strided_load %arg9[%c0_28, %c0_29] {strides = array<i32: 2, 1>} : memref<16x64xf32, #tpu.memory_space<vmem>>, vector<8x64xf32>
    %c1_30 = arith.constant 1 : index
    %c0_31 = arith.constant 0 : index
    %61 = tpu.strided_load %arg9[%c1_30, %c0_31] {strides = array<i32: 2, 1>} : memref<16x64xf32, #tpu.memory_space<vmem>>, vector<8x64xf32>
    %62 = arith.maximumf %60, %61 : vector<8x64xf32>
    %63 = arith.truncf %62 : vector<8x64xf32> to vector<8x64xbf16>
    %c0_32 = arith.constant 0 : index
    %c0_33 = arith.constant 0 : index
    %c0_34 = arith.constant 0 : index
    %c0_35 = arith.constant 0 : index
    %64 = vector.load %arg8[%c0_32, %c0_33, %c0_34, %c0_35] : memref<1x4x8x64xbf16, #tpu.memory_space<vmem>>, vector<1x1x8x64xbf16>
    %65 = vector.shape_cast %64 : vector<1x1x8x64xbf16> to vector<8x64xbf16>
    %66 = vector.shape_cast %63 : vector<8x64xbf16> to vector<1x1x8x64xbf16>
    tpu.vector_store %arg8[%c0_32, %c0_33, %c0_34, %c0_35], %66 {strides = array<i32>} : memref<1x4x8x64xbf16, #tpu.memory_space<vmem>>, vector<1x1x8x64xbf16>,
    %67 = vector.extract_strided_slice %53 {offsets = [2, 0, 0], sizes = [1, 16, 64], strides = [1, 1, 1]} : vector<8x16x64xf32> to vector<1x16x64xf32>
    %68 = vector.shape_cast %67 : vector<1x16x64xf32> to vector<16x64xf32>
    %69 = vector.extract_strided_slice %53 {offsets = [3, 0, 0], sizes = [1, 16, 64], strides = [1, 1, 1]} : vector<8x16x64xf32> to vector<1x16x64xf32>
    %70 = vector.shape_cast %69 : vector<1x16x64xf32> to vector<16x64xf32>
    %71 = arith.maximumf %68, %70 : vector<16x64xf32>
    %c0_36 = arith.constant 0 : index
    %c0_37 = arith.constant 0 : index
    %72 = vector.load %arg9[%c0_36, %c0_37] : memref<16x64xf32, #tpu.memory_space<vmem>>, vector<16x64xf32>
    tpu.vector_store %arg9[%c0_36, %c0_37], %71 {strides = array<i32>} : memref<16x64xf32, #tpu.memory_space<vmem>>, vector<16x64xf32>,
    %c0_38 = arith.constant 0 : index
    %c0_39 = arith.constant 0 : index
    %73 = tpu.strided_load %arg9[%c0_38, %c0_39] {strides = array<i32: 2, 1>} : memref<16x64xf32, #tpu.memory_space<vmem>>, vector<8x64xf32>
    %c1_40 = arith.constant 1 : index
    %c0_41 = arith.constant 0 : index
    %74 = tpu.strided_load %arg9[%c1_40, %c0_41] {strides = array<i32: 2, 1>} : memref<16x64xf32, #tpu.memory_space<vmem>>, vector<8x64xf32>
    %75 = arith.maximumf %73, %74 : vector<8x64xf32>
    %76 = arith.truncf %75 : vector<8x64xf32> to vector<8x64xbf16>
    %c0_42 = arith.constant 0 : index
    %c1_43 = arith.constant 1 : index
    %c0_44 = arith.constant 0 : index
    %c0_45 = arith.constant 0 : index
    %77 = vector.load %arg8[%c0_42, %c1_43, %c0_44, %c0_45] : memref<1x4x8x64xbf16, #tpu.memory_space<vmem>>, vector<1x1x8x64xbf16>
    %78 = vector.shape_cast %77 : vector<1x1x8x64xbf16> to vector<8x64xbf16>
    %79 = vector.shape_cast %76 : vector<8x64xbf16> to vector<1x1x8x64xbf16>
    tpu.vector_store %arg8[%c0_42, %c1_43, %c0_44, %c0_45], %79 {strides = array<i32>} : memref<1x4x8x64xbf16, #tpu.memory_space<vmem>>, vector<1x1x8x64xbf16>,
    %80 = vector.extract_strided_slice %53 {offsets = [4, 0, 0], sizes = [1, 16, 64], strides = [1, 1, 1]} : vector<8x16x64xf32> to vector<1x16x64xf32>
    %81 = vector.shape_cast %80 : vector<1x16x64xf32> to vector<16x64xf32>
    %82 = vector.extract_strided_slice %53 {offsets = [5, 0, 0], sizes = [1, 16, 64], strides = [1, 1, 1]} : vector<8x16x64xf32> to vector<1x16x64xf32>
    %83 = vector.shape_cast %82 : vector<1x16x64xf32> to vector<16x64xf32>
    %84 = arith.maximumf %81, %83 : vector<16x64xf32>
    %c0_46 = arith.constant 0 : index
    %c0_47 = arith.constant 0 : index
    %85 = vector.load %arg9[%c0_46, %c0_47] : memref<16x64xf32, #tpu.memory_space<vmem>>, vector<16x64xf32>
    tpu.vector_store %arg9[%c0_46, %c0_47], %84 {strides = array<i32>} : memref<16x64xf32, #tpu.memory_space<vmem>>, vector<16x64xf32>,
    %c0_48 = arith.constant 0 : index
    %c0_49 = arith.constant 0 : index
    %86 = tpu.strided_load %arg9[%c0_48, %c0_49] {strides = array<i32: 2, 1>} : memref<16x64xf32, #tpu.memory_space<vmem>>, vector<8x64xf32>
    %c1_50 = arith.constant 1 : index
    %c0_51 = arith.constant 0 : index
    %87 = tpu.strided_load %arg9[%c1_50, %c0_51] {strides = array<i32: 2, 1>} : memref<16x64xf32, #tpu.memory_space<vmem>>, vector<8x64xf32>
    %88 = arith.maximumf %86, %87 : vector<8x64xf32>
    %89 = arith.truncf %88 : vector<8x64xf32> to vector<8x64xbf16>
    %c0_52 = arith.constant 0 : index
    %c2_53 = arith.constant 2 : index
    %c0_54 = arith.constant 0 : index
    %c0_55 = arith.constant 0 : index
    %90 = vector.load %arg8[%c0_52, %c2_53, %c0_54, %c0_55] : memref<1x4x8x64xbf16, #tpu.memory_space<vmem>>, vector<1x1x8x64xbf16>
    %91 = vector.shape_cast %90 : vector<1x1x8x64xbf16> to vector<8x64xbf16>
    %92 = vector.shape_cast %89 : vector<8x64xbf16> to vector<1x1x8x64xbf16>
    tpu.vector_store %arg8[%c0_52, %c2_53, %c0_54, %c0_55], %92 {strides = array<i32>} : memref<1x4x8x64xbf16, #tpu.memory_space<vmem>>, vector<1x1x8x64xbf16>,
    %93 = vector.extract_strided_slice %53 {offsets = [6, 0, 0], sizes = [1, 16, 64], strides = [1, 1, 1]} : vector<8x16x64xf32> to vector<1x16x64xf32>
    %94 = vector.shape_cast %93 : vector<1x16x64xf32> to vector<16x64xf32>
    %95 = vector.extract_strided_slice %53 {offsets = [7, 0, 0], sizes = [1, 16, 64], strides = [1, 1, 1]} : vector<8x16x64xf32> to vector<1x16x64xf32>
    %96 = vector.shape_cast %95 : vector<1x16x64xf32> to vector<16x64xf32>
    %97 = arith.maximumf %94, %96 : vector<16x64xf32>
    %c0_56 = arith.constant 0 : index
    %c0_57 = arith.constant 0 : index
    %98 = vector.load %arg9[%c0_56, %c0_57] : memref<16x64xf32, #tpu.memory_space<vmem>>, vector<16x64xf32>
    tpu.vector_store %arg9[%c0_56, %c0_57], %97 {strides = array<i32>} : memref<16x64xf32, #tpu.memory_space<vmem>>, vector<16x64xf32>,
    %c0_58 = arith.constant 0 : index
    %c0_59 = arith.constant 0 : index
    %99 = tpu.strided_load %arg9[%c0_58, %c0_59] {strides = array<i32: 2, 1>} : memref<16x64xf32, #tpu.memory_space<vmem>>, vector<8x64xf32>
    %c1_60 = arith.constant 1 : index
    %c0_61 = arith.constant 0 : index
    %100 = tpu.strided_load %arg9[%c1_60, %c0_61] {strides = array<i32: 2, 1>} : memref<16x64xf32, #tpu.memory_space<vmem>>, vector<8x64xf32>
    %101 = arith.maximumf %99, %100 : vector<8x64xf32>
    %102 = arith.truncf %101 : vector<8x64xf32> to vector<8x64xbf16>
    %c0_62 = arith.constant 0 : index
    %c3 = arith.constant 3 : index
    %c0_63 = arith.constant 0 : index
    %c0_64 = arith.constant 0 : index
    %103 = vector.load %arg8[%c0_62, %c3, %c0_63, %c0_64] : memref<1x4x8x64xbf16, #tpu.memory_space<vmem>>, vector<1x1x8x64xbf16>
    %104 = vector.shape_cast %103 : vector<1x1x8x64xbf16> to vector<8x64xbf16>
    %105 = vector.shape_cast %102 : vector<8x64xbf16> to vector<1x1x8x64xbf16>
    tpu.vector_store %arg8[%c0_62, %c3, %c0_63, %c0_64], %105 {strides = array<i32>} : memref<1x4x8x64xbf16, #tpu.memory_space<vmem>>, vector<1x1x8x64xbf16>,
    return
  }
  func.func @transform_0(%arg0: i32, %arg1: i32) -> (i32, i32, i32, i32) {
    %c8_i32 = arith.constant 8 : i32
    %0 = arith.muli %arg1, %c8_i32 : i32
    %c1_i32 = arith.constant 1 : i32
    %1 = arith.subi %0, %c1_i32 : i32
    %c0_i32 = arith.constant 0 : i32
    %2 = arith.maxsi %1, %c0_i32 : i32
    %c0_i32_0 = arith.constant 0 : i32
    %c0_i32_1 = arith.constant 0 : i32
    %c0_i32_2 = arith.constant 0 : i32
    return %arg0, %2, %c0_i32_0, %c0_i32_1 : i32, i32, i32, i32
  }
  func.func @transform_1(%arg0: i32, %arg1: i32) -> (i32, i32, i32, i32) {
    %c0_i32 = arith.constant 0 : i32
    %c0_i32_0 = arith.constant 0 : i32
    %c0_i32_1 = arith.constant 0 : i32
    return %arg0, %arg1, %c0_i32, %c0_i32_0 : i32, i32, i32, i32
  }
  func.func @transform_2(%arg0: i32, %arg1: i32) -> (i32, i32, i32, i32) {
    %c1_i32 = arith.constant 1 : i32
    %0 = arith.addi %arg1, %c1_i32 : i32
    %c8_i32 = arith.constant 8 : i32
    %1 = arith.muli %0, %c8_i32 : i32
    %c15_i32 = arith.constant 15 : i32
    %2 = arith.minsi %1, %c15_i32 : i32
    %c0_i32 = arith.constant 0 : i32
    %c0_i32_0 = arith.constant 0 : i32
    %c0_i32_1 = arith.constant 0 : i32
    return %arg0, %2, %c0_i32, %c0_i32_0 : i32, i32, i32, i32
  }
  func.func @transform_3(%arg0: i32, %arg1: i32) -> (i32, i32) {
    %c0_i32 = arith.constant 0 : i32
    %c0_i32_0 = arith.constant 0 : i32
    %c0_i32_1 = arith.constant 0 : i32
    return %c0_i32, %c0_i32_0 : i32, i32
  }
  func.func @transform_4(%arg0: i32, %arg1: i32) -> (i32, i32, i32) {
    %c0_i32 = arith.constant 0 : i32
    %c0_i32_0 = arith.constant 0 : i32
    %c0_i32_1 = arith.constant 0 : i32
    %c0_i32_2 = arith.constant 0 : i32
    return %c0_i32, %c0_i32_0, %c0_i32_1 : i32, i32, i32
  }
  func.func @transform_5(%arg0: i32, %arg1: i32) -> (i32, i32) {
    %c0_i32 = arith.constant 0 : i32
    %c0_i32_0 = arith.constant 0 : i32
    %c0_i32_1 = arith.constant 0 : i32
    return %c0_i32, %c0_i32_0 : i32, i32
  }
  func.func @transform_6(%arg0: i32, %arg1: i32) -> (i32, i32, i32, i32) {
    %c0_i32 = arith.constant 0 : i32
    %c0_i32_0 = arith.constant 0 : i32
    %c0_i32_1 = arith.constant 0 : i32
    return %arg0, %arg1, %c0_i32, %c0_i32_0 : i32, i32, i32, i32
  }
}

module attributes {stable_mosaic.version = 11 : i64} {
  func.func @_conv_kernel(%arg0: i32, %arg1: i32, %arg2: memref<1x1x8x64xbf16, #tpu.memory_space<vmem>>, %arg3: memref<1x8x8x64xbf16, #tpu.memory_space<vmem>>, %arg4: memref<1x1x8x64xbf16, #tpu.memory_space<vmem>>, %arg5: memref<1x64xbf16, #tpu.memory_space<vmem>>, %arg6: memref<3x192x128xbf16, #tpu.memory_space<vmem>>, %arg7: memref<1x128xf32, #tpu.memory_space<vmem>>, %arg8: memref<1x8x8x128xbf16, #tpu.memory_space<vmem>>) attributes {dimension_semantics = [#tpu.dimension_semantics<parallel>, #tpu.dimension_semantics<parallel>], iteration_bounds = array<i64: 4, 1>, scalar_prefetch = 0 : i64, scratch_operands = 0 : i64, tpu.core_type = #tpu.core_type<tc>, window_params = [{transform_indices = @transform_0, window_bounds = array<i64: 1, 1, 8, 64>}, {transform_indices = @transform_1, window_bounds = array<i64: 1, 8, 8, 64>}, {transform_indices = @transform_2, window_bounds = array<i64: 1, 1, 8, 64>}, {pipeline_mode = #tpu.pipeline_mode<synchronous>, transform_indices = @transform_3, window_bounds = array<i64: 1, 64>}, {pipeline_mode = #tpu.pipeline_mode<synchronous>, transform_indices = @transform_4, window_bounds = array<i64: 3, 192, 128>}, {pipeline_mode = #tpu.pipeline_mode<synchronous>, transform_indices = @transform_5, window_bounds = array<i64: 1, 128>}, {transform_indices = @transform_6, window_bounds = array<i64: 1, 8, 8, 128>}]} {
    %c0 = arith.constant 0 : index
    %c0_0 = arith.constant 0 : index
    %0 = vector.load %arg5[%c0, %c0_0] : memref<1x64xbf16, #tpu.memory_space<vmem>>, vector<1x64xbf16>
    %1 = vector.shape_cast %0 : vector<1x64xbf16> to vector<1x1x64xbf16>
    %c0_i32 = arith.constant 0 : i32
    %2 = arith.cmpi eq, %arg1, %c0_i32 : i32
    %3 = vector.shape_cast %1 : vector<1x1x64xbf16> to vector<1x1x64xbf16>
    %4 = vector.broadcast %3 : vector<1x1x64xbf16> to vector<1x8x64xbf16>
    %c0_1 = arith.constant 0 : index
    %c0_2 = arith.constant 0 : index
    %c0_3 = arith.constant 0 : index
    %c0_4 = arith.constant 0 : index
    %5 = vector.load %arg2[%c0_1, %c0_2, %c0_3, %c0_4] : memref<1x1x8x64xbf16, #tpu.memory_space<vmem>>, vector<1x1x8x64xbf16>
    %6 = vector.shape_cast %5 : vector<1x1x8x64xbf16> to vector<1x8x64xbf16>
    %7 = arith.select %2, %4, %6 : vector<1x8x64xbf16>
    %c0_i32_5 = arith.constant 0 : i32
    %8 = arith.cmpi eq, %arg1, %c0_i32_5 : i32
    %9 = vector.shape_cast %1 : vector<1x1x64xbf16> to vector<1x1x64xbf16>
    %10 = vector.broadcast %9 : vector<1x1x64xbf16> to vector<1x8x64xbf16>
    %c0_6 = arith.constant 0 : index
    %c0_7 = arith.constant 0 : index
    %c0_8 = arith.constant 0 : index
    %c0_9 = arith.constant 0 : index
    %11 = vector.load %arg4[%c0_6, %c0_7, %c0_8, %c0_9] : memref<1x1x8x64xbf16, #tpu.memory_space<vmem>>, vector<1x1x8x64xbf16>
    %12 = vector.shape_cast %11 : vector<1x1x8x64xbf16> to vector<1x8x64xbf16>
    %13 = arith.select %8, %10, %12 : vector<1x8x64xbf16>
    %c0_10 = arith.constant 0 : index
    %c0_11 = arith.constant 0 : index
    %c0_12 = arith.constant 0 : index
    %c0_13 = arith.constant 0 : index
    %14 = vector.load %arg3[%c0_10, %c0_11, %c0_12, %c0_13] : memref<1x8x8x64xbf16, #tpu.memory_space<vmem>>, vector<1x8x8x64xbf16>
    %15 = vector.shape_cast %14 : vector<1x8x8x64xbf16> to vector<8x8x64xbf16>
    %16 = tpu.concatenate %7, %15, %13 in 0 : vector<1x8x64xbf16>, vector<8x8x64xbf16>, vector<1x8x64xbf16> -> vector<10x8x64xbf16>
    %17 = vector.shape_cast %1 : vector<1x1x64xbf16> to vector<1x1x64xbf16>
    %18 = vector.broadcast %17 : vector<1x1x64xbf16> to vector<10x1x64xbf16>
    %19 = tpu.concatenate %18, %16, %18 in 1 : vector<10x1x64xbf16>, vector<10x8x64xbf16>, vector<10x1x64xbf16> -> vector<10x10x64xbf16>
    %cst = arith.constant 0.000000e+00 : f32
    %20 = vector.broadcast %cst : f32 to vector<64x128xf32>
    %21 = vector.extract_strided_slice %19 {offsets = [0, 0, 0], sizes = [8, 8, 64], strides = [1, 1, 1]} : vector<10x10x64xbf16> to vector<8x8x64xbf16>
    %22 = vector.extract_strided_slice %19 {offsets = [0, 1, 0], sizes = [8, 8, 64], strides = [1, 1, 1]} : vector<10x10x64xbf16> to vector<8x8x64xbf16>
    %23 = vector.extract_strided_slice %19 {offsets = [0, 2, 0], sizes = [8, 8, 64], strides = [1, 1, 1]} : vector<10x10x64xbf16> to vector<8x8x64xbf16>
    %24 = tpu.concatenate %21, %22, %23 in 2 : vector<8x8x64xbf16>, vector<8x8x64xbf16>, vector<8x8x64xbf16> -> vector<8x8x192xbf16>
    %25 = vector.shape_cast %24 : vector<8x8x192xbf16> to vector<64x192xbf16>
    %c0_14 = arith.constant 0 : index
    %c0_15 = arith.constant 0 : index
    %c0_16 = arith.constant 0 : index
    %26 = vector.load %arg6[%c0_14, %c0_15, %c0_16] : memref<3x192x128xbf16, #tpu.memory_space<vmem>>, vector<1x192x128xbf16>
    %27 = vector.shape_cast %26 : vector<1x192x128xbf16> to vector<192x128xbf16>
    %cst_17 = arith.constant dense<0.000000e+00> : vector<64x128xf32>
    %28 = tpu.matmul %25, %27, %cst_17 {dimension_numbers = #tpu.dot_dimension_numbers<[1], [0], [0], [1], [0, 0, 1, 1], [], []>} : vector<64x192xbf16>, vector<192x128xbf16>, vector<64x128xf32> -> vector<64x128xf32>
    %29 = arith.addf %20, %28 : vector<64x128xf32>
    %30 = vector.extract_strided_slice %19 {offsets = [1, 0, 0], sizes = [8, 8, 64], strides = [1, 1, 1]} : vector<10x10x64xbf16> to vector<8x8x64xbf16>
    %31 = vector.extract_strided_slice %19 {offsets = [1, 1, 0], sizes = [8, 8, 64], strides = [1, 1, 1]} : vector<10x10x64xbf16> to vector<8x8x64xbf16>
    %32 = vector.extract_strided_slice %19 {offsets = [1, 2, 0], sizes = [8, 8, 64], strides = [1, 1, 1]} : vector<10x10x64xbf16> to vector<8x8x64xbf16>
    %33 = tpu.concatenate %30, %31, %32 in 2 : vector<8x8x64xbf16>, vector<8x8x64xbf16>, vector<8x8x64xbf16> -> vector<8x8x192xbf16>
    %34 = vector.shape_cast %33 : vector<8x8x192xbf16> to vector<64x192xbf16>
    %c1 = arith.constant 1 : index
    %c0_18 = arith.constant 0 : index
    %c0_19 = arith.constant 0 : index
    %35 = vector.load %arg6[%c1, %c0_18, %c0_19] : memref<3x192x128xbf16, #tpu.memory_space<vmem>>, vector<1x192x128xbf16>
    %36 = vector.shape_cast %35 : vector<1x192x128xbf16> to vector<192x128xbf16>
    %cst_20 = arith.constant dense<0.000000e+00> : vector<64x128xf32>
    %37 = tpu.matmul %34, %36, %cst_20 {dimension_numbers = #tpu.dot_dimension_numbers<[1], [0], [0], [1], [0, 0, 1, 1], [], []>} : vector<64x192xbf16>, vector<192x128xbf16>, vector<64x128xf32> -> vector<64x128xf32>
    %38 = arith.addf %29, %37 : vector<64x128xf32>
    %39 = vector.extract_strided_slice %19 {offsets = [2, 0, 0], sizes = [8, 8, 64], strides = [1, 1, 1]} : vector<10x10x64xbf16> to vector<8x8x64xbf16>
    %40 = vector.extract_strided_slice %19 {offsets = [2, 1, 0], sizes = [8, 8, 64], strides = [1, 1, 1]} : vector<10x10x64xbf16> to vector<8x8x64xbf16>
    %41 = vector.extract_strided_slice %19 {offsets = [2, 2, 0], sizes = [8, 8, 64], strides = [1, 1, 1]} : vector<10x10x64xbf16> to vector<8x8x64xbf16>
    %42 = tpu.concatenate %39, %40, %41 in 2 : vector<8x8x64xbf16>, vector<8x8x64xbf16>, vector<8x8x64xbf16> -> vector<8x8x192xbf16>
    %43 = vector.shape_cast %42 : vector<8x8x192xbf16> to vector<64x192xbf16>
    %c2 = arith.constant 2 : index
    %c0_21 = arith.constant 0 : index
    %c0_22 = arith.constant 0 : index
    %44 = vector.load %arg6[%c2, %c0_21, %c0_22] : memref<3x192x128xbf16, #tpu.memory_space<vmem>>, vector<1x192x128xbf16>
    %45 = vector.shape_cast %44 : vector<1x192x128xbf16> to vector<192x128xbf16>
    %cst_23 = arith.constant dense<0.000000e+00> : vector<64x128xf32>
    %46 = tpu.matmul %43, %45, %cst_23 {dimension_numbers = #tpu.dot_dimension_numbers<[1], [0], [0], [1], [0, 0, 1, 1], [], []>} : vector<64x192xbf16>, vector<192x128xbf16>, vector<64x128xf32> -> vector<64x128xf32>
    %47 = arith.addf %38, %46 : vector<64x128xf32>
    %c0_24 = arith.constant 0 : index
    %c0_25 = arith.constant 0 : index
    %48 = vector.load %arg7[%c0_24, %c0_25] : memref<1x128xf32, #tpu.memory_space<vmem>>, vector<1x128xf32>
    %49 = vector.broadcast %48 : vector<1x128xf32> to vector<64x128xf32>
    %50 = arith.addf %47, %49 : vector<64x128xf32>
    %cst_26 = arith.constant 0.000000e+00 : f32
    %51 = vector.broadcast %cst_26 : f32 to vector<64x128xf32>
    %52 = arith.maximumf %50, %51 : vector<64x128xf32>
    %53 = vector.shape_cast %52 : vector<64x128xf32> to vector<8x8x128xf32>
    %54 = arith.truncf %53 : vector<8x8x128xf32> to vector<8x8x128xbf16>
    %c0_27 = arith.constant 0 : index
    %c0_28 = arith.constant 0 : index
    %c0_29 = arith.constant 0 : index
    %c0_30 = arith.constant 0 : index
    %55 = vector.load %arg8[%c0_27, %c0_28, %c0_29, %c0_30] : memref<1x8x8x128xbf16, #tpu.memory_space<vmem>>, vector<1x8x8x128xbf16>
    %56 = vector.shape_cast %55 : vector<1x8x8x128xbf16> to vector<8x8x128xbf16>
    %57 = vector.shape_cast %54 : vector<8x8x128xbf16> to vector<1x8x8x128xbf16>
    tpu.vector_store %arg8[%c0_27, %c0_28, %c0_29, %c0_30], %57 {strides = array<i32>} : memref<1x8x8x128xbf16, #tpu.memory_space<vmem>>, vector<1x8x8x128xbf16>,
    return
  }
  func.func @transform_0(%arg0: i32, %arg1: i32) -> (i32, i32, i32, i32) {
    %c8_i32 = arith.constant 8 : i32
    %0 = arith.muli %arg1, %c8_i32 : i32
    %c1_i32 = arith.constant 1 : i32
    %1 = arith.subi %0, %c1_i32 : i32
    %c0_i32 = arith.constant 0 : i32
    %2 = arith.maxsi %1, %c0_i32 : i32
    %c0_i32_0 = arith.constant 0 : i32
    %c0_i32_1 = arith.constant 0 : i32
    %c0_i32_2 = arith.constant 0 : i32
    return %arg0, %2, %c0_i32_0, %c0_i32_1 : i32, i32, i32, i32
  }
  func.func @transform_1(%arg0: i32, %arg1: i32) -> (i32, i32, i32, i32) {
    %c0_i32 = arith.constant 0 : i32
    %c0_i32_0 = arith.constant 0 : i32
    %c0_i32_1 = arith.constant 0 : i32
    return %arg0, %arg1, %c0_i32, %c0_i32_0 : i32, i32, i32, i32
  }
  func.func @transform_2(%arg0: i32, %arg1: i32) -> (i32, i32, i32, i32) {
    %c1_i32 = arith.constant 1 : i32
    %0 = arith.addi %arg1, %c1_i32 : i32
    %c8_i32 = arith.constant 8 : i32
    %1 = arith.muli %0, %c8_i32 : i32
    %c7_i32 = arith.constant 7 : i32
    %2 = arith.minsi %1, %c7_i32 : i32
    %c0_i32 = arith.constant 0 : i32
    %c0_i32_0 = arith.constant 0 : i32
    %c0_i32_1 = arith.constant 0 : i32
    return %arg0, %2, %c0_i32, %c0_i32_0 : i32, i32, i32, i32
  }
  func.func @transform_3(%arg0: i32, %arg1: i32) -> (i32, i32) {
    %c0_i32 = arith.constant 0 : i32
    %c0_i32_0 = arith.constant 0 : i32
    %c0_i32_1 = arith.constant 0 : i32
    return %c0_i32, %c0_i32_0 : i32, i32
  }
  func.func @transform_4(%arg0: i32, %arg1: i32) -> (i32, i32, i32) {
    %c0_i32 = arith.constant 0 : i32
    %c0_i32_0 = arith.constant 0 : i32
    %c0_i32_1 = arith.constant 0 : i32
    %c0_i32_2 = arith.constant 0 : i32
    return %c0_i32, %c0_i32_0, %c0_i32_1 : i32, i32, i32
  }
  func.func @transform_5(%arg0: i32, %arg1: i32) -> (i32, i32) {
    %c0_i32 = arith.constant 0 : i32
    %c0_i32_0 = arith.constant 0 : i32
    %c0_i32_1 = arith.constant 0 : i32
    return %c0_i32, %c0_i32_0 : i32, i32
  }
  func.func @transform_6(%arg0: i32, %arg1: i32) -> (i32, i32, i32, i32) {
    %c0_i32 = arith.constant 0 : i32
    %c0_i32_0 = arith.constant 0 : i32
    %c0_i32_1 = arith.constant 0 : i32
    return %arg0, %arg1, %c0_i32, %c0_i32_0 : i32, i32, i32, i32
  }
}

module attributes {stable_mosaic.version = 11 : i64} {
  func.func @_conv_mse_kernel(%arg0: i32, %arg1: i32, %arg2: memref<1x1x8x128xbf16, #tpu.memory_space<vmem>>, %arg3: memref<1x8x8x128xbf16, #tpu.memory_space<vmem>>, %arg4: memref<1x1x8x128xbf16, #tpu.memory_space<vmem>>, %arg5: memref<1x1x8x128xbf16, #tpu.memory_space<vmem>>, %arg6: memref<1x8x8x128xbf16, #tpu.memory_space<vmem>>, %arg7: memref<1x1x8x128xbf16, #tpu.memory_space<vmem>>, %arg8: memref<3x384x128xbf16, #tpu.memory_space<vmem>>, %arg9: memref<1x8x128xf32, #tpu.memory_space<vmem>>) attributes {dimension_semantics = [#tpu.dimension_semantics<parallel>, #tpu.dimension_semantics<arbitrary>], iteration_bounds = array<i64: 2, 1>, scalar_prefetch = 0 : i64, scratch_operands = 0 : i64, tpu.core_type = #tpu.core_type<tc>, window_params = [{transform_indices = @transform_0, window_bounds = array<i64: 1, 1, 8, 128>}, {transform_indices = @transform_1, window_bounds = array<i64: 1, 8, 8, 128>}, {transform_indices = @transform_2, window_bounds = array<i64: 1, 1, 8, 128>}, {transform_indices = @transform_3, window_bounds = array<i64: 1, 1, 8, 128>}, {transform_indices = @transform_4, window_bounds = array<i64: 1, 8, 8, 128>}, {transform_indices = @transform_5, window_bounds = array<i64: 1, 1, 8, 128>}, {pipeline_mode = #tpu.pipeline_mode<synchronous>, transform_indices = @transform_6, window_bounds = array<i64: 3, 384, 128>}, {transform_indices = @transform_7, window_bounds = array<i64: 1, 8, 128>}]} {
    %c0_i32 = arith.constant 0 : i32
    %0 = arith.cmpi eq, %arg1, %c0_i32 : i32
    %1 = arith.extui %0 : i1 to i32
    %c0_i32_0 = arith.constant 0 : i32
    %2 = arith.cmpi ne, %1, %c0_i32_0 : i32
    scf.if %2 {
      %cst_59 = arith.constant 0.000000e+00 : f32
      %108 = vector.broadcast %cst_59 : f32 to vector<8x128xf32>
      %c0_60 = arith.constant 0 : index
      %c0_61 = arith.constant 0 : index
      %c0_62 = arith.constant 0 : index
      %109 = vector.load %arg9[%c0_60, %c0_61, %c0_62] : memref<1x8x128xf32, #tpu.memory_space<vmem>>, vector<1x8x128xf32>
      %110 = vector.shape_cast %109 : vector<1x8x128xf32> to vector<8x128xf32>
      %111 = vector.shape_cast %108 : vector<8x128xf32> to vector<1x8x128xf32>
      tpu.vector_store %arg9[%c0_60, %c0_61, %c0_62], %111 {strides = array<i32>} : memref<1x8x128xf32, #tpu.memory_space<vmem>>, vector<1x8x128xf32>,
    } else {
    }
    %cst = arith.constant 0.000000e+00 : bf16
    %3 = vector.broadcast %cst : bf16 to vector<1x128xbf16>
    %4 = vector.shape_cast %3 : vector<1x128xbf16> to vector<1x1x128xbf16>
    %c0_i32_1 = arith.constant 0 : i32
    %5 = arith.cmpi eq, %arg1, %c0_i32_1 : i32
    %6 = vector.shape_cast %4 : vector<1x1x128xbf16> to vector<1x1x128xbf16>
    %7 = vector.broadcast %6 : vector<1x1x128xbf16> to vector<1x8x128xbf16>
    %c0 = arith.constant 0 : index
    %c0_2 = arith.constant 0 : index
    %c0_3 = arith.constant 0 : index
    %c0_4 = arith.constant 0 : index
    %8 = vector.load %arg2[%c0, %c0_2, %c0_3, %c0_4] : memref<1x1x8x128xbf16, #tpu.memory_space<vmem>>, vector<1x1x8x128xbf16>
    %9 = vector.shape_cast %8 : vector<1x1x8x128xbf16> to vector<1x8x128xbf16>
    %10 = arith.select %5, %7, %9 : vector<1x8x128xbf16>
    %c0_i32_5 = arith.constant 0 : i32
    %11 = arith.cmpi eq, %arg1, %c0_i32_5 : i32
    %12 = vector.shape_cast %4 : vector<1x1x128xbf16> to vector<1x1x128xbf16>
    %13 = vector.broadcast %12 : vector<1x1x128xbf16> to vector<1x8x128xbf16>
    %c0_6 = arith.constant 0 : index
    %c0_7 = arith.constant 0 : index
    %c0_8 = arith.constant 0 : index
    %c0_9 = arith.constant 0 : index
    %14 = vector.load %arg4[%c0_6, %c0_7, %c0_8, %c0_9] : memref<1x1x8x128xbf16, #tpu.memory_space<vmem>>, vector<1x1x8x128xbf16>
    %15 = vector.shape_cast %14 : vector<1x1x8x128xbf16> to vector<1x8x128xbf16>
    %16 = arith.select %11, %13, %15 : vector<1x8x128xbf16>
    %c0_10 = arith.constant 0 : index
    %c0_11 = arith.constant 0 : index
    %c0_12 = arith.constant 0 : index
    %c0_13 = arith.constant 0 : index
    %17 = vector.load %arg3[%c0_10, %c0_11, %c0_12, %c0_13] : memref<1x8x8x128xbf16, #tpu.memory_space<vmem>>, vector<1x8x8x128xbf16>
    %18 = vector.shape_cast %17 : vector<1x8x8x128xbf16> to vector<8x8x128xbf16>
    %19 = tpu.concatenate %10, %18, %16 in 0 : vector<1x8x128xbf16>, vector<8x8x128xbf16>, vector<1x8x128xbf16> -> vector<10x8x128xbf16>
    %20 = vector.shape_cast %4 : vector<1x1x128xbf16> to vector<1x1x128xbf16>
    %21 = vector.broadcast %20 : vector<1x1x128xbf16> to vector<10x1x128xbf16>
    %22 = tpu.concatenate %21, %19, %21 in 1 : vector<10x1x128xbf16>, vector<10x8x128xbf16>, vector<10x1x128xbf16> -> vector<10x10x128xbf16>
    %cst_14 = arith.constant 0.000000e+00 : f32
    %23 = vector.broadcast %cst_14 : f32 to vector<64x128xf32>
    %24 = vector.extract_strided_slice %22 {offsets = [0, 0, 0], sizes = [8, 8, 128], strides = [1, 1, 1]} : vector<10x10x128xbf16> to vector<8x8x128xbf16>
    %25 = vector.extract_strided_slice %22 {offsets = [0, 1, 0], sizes = [8, 8, 128], strides = [1, 1, 1]} : vector<10x10x128xbf16> to vector<8x8x128xbf16>
    %26 = vector.extract_strided_slice %22 {offsets = [0, 2, 0], sizes = [8, 8, 128], strides = [1, 1, 1]} : vector<10x10x128xbf16> to vector<8x8x128xbf16>
    %27 = tpu.concatenate %24, %25, %26 in 2 : vector<8x8x128xbf16>, vector<8x8x128xbf16>, vector<8x8x128xbf16> -> vector<8x8x384xbf16>
    %28 = vector.shape_cast %27 : vector<8x8x384xbf16> to vector<64x384xbf16>
    %c0_15 = arith.constant 0 : index
    %c0_16 = arith.constant 0 : index
    %c0_17 = arith.constant 0 : index
    %29 = vector.load %arg8[%c0_15, %c0_16, %c0_17] : memref<3x384x128xbf16, #tpu.memory_space<vmem>>, vector<1x384x128xbf16>
    %30 = vector.shape_cast %29 : vector<1x384x128xbf16> to vector<384x128xbf16>
    %cst_18 = arith.constant dense<0.000000e+00> : vector<64x128xf32>
    %31 = tpu.matmul %28, %30, %cst_18 {dimension_numbers = #tpu.dot_dimension_numbers<[1], [0], [0], [1], [0, 0, 1, 1], [], []>} : vector<64x384xbf16>, vector<384x128xbf16>, vector<64x128xf32> -> vector<64x128xf32>
    %32 = arith.addf %23, %31 : vector<64x128xf32>
    %33 = vector.extract_strided_slice %22 {offsets = [1, 0, 0], sizes = [8, 8, 128], strides = [1, 1, 1]} : vector<10x10x128xbf16> to vector<8x8x128xbf16>
    %34 = vector.extract_strided_slice %22 {offsets = [1, 1, 0], sizes = [8, 8, 128], strides = [1, 1, 1]} : vector<10x10x128xbf16> to vector<8x8x128xbf16>
    %35 = vector.extract_strided_slice %22 {offsets = [1, 2, 0], sizes = [8, 8, 128], strides = [1, 1, 1]} : vector<10x10x128xbf16> to vector<8x8x128xbf16>
    %36 = tpu.concatenate %33, %34, %35 in 2 : vector<8x8x128xbf16>, vector<8x8x128xbf16>, vector<8x8x128xbf16> -> vector<8x8x384xbf16>
    %37 = vector.shape_cast %36 : vector<8x8x384xbf16> to vector<64x384xbf16>
    %c1 = arith.constant 1 : index
    %c0_19 = arith.constant 0 : index
    %c0_20 = arith.constant 0 : index
    %38 = vector.load %arg8[%c1, %c0_19, %c0_20] : memref<3x384x128xbf16, #tpu.memory_space<vmem>>, vector<1x384x128xbf16>
    %39 = vector.shape_cast %38 : vector<1x384x128xbf16> to vector<384x128xbf16>
    %cst_21 = arith.constant dense<0.000000e+00> : vector<64x128xf32>
    %40 = tpu.matmul %37, %39, %cst_21 {dimension_numbers = #tpu.dot_dimension_numbers<[1], [0], [0], [1], [0, 0, 1, 1], [], []>} : vector<64x384xbf16>, vector<384x128xbf16>, vector<64x128xf32> -> vector<64x128xf32>
    %41 = arith.addf %32, %40 : vector<64x128xf32>
    %42 = vector.extract_strided_slice %22 {offsets = [2, 0, 0], sizes = [8, 8, 128], strides = [1, 1, 1]} : vector<10x10x128xbf16> to vector<8x8x128xbf16>
    %43 = vector.extract_strided_slice %22 {offsets = [2, 1, 0], sizes = [8, 8, 128], strides = [1, 1, 1]} : vector<10x10x128xbf16> to vector<8x8x128xbf16>
    %44 = vector.extract_strided_slice %22 {offsets = [2, 2, 0], sizes = [8, 8, 128], strides = [1, 1, 1]} : vector<10x10x128xbf16> to vector<8x8x128xbf16>
    %45 = tpu.concatenate %42, %43, %44 in 2 : vector<8x8x128xbf16>, vector<8x8x128xbf16>, vector<8x8x128xbf16> -> vector<8x8x384xbf16>
    %46 = vector.shape_cast %45 : vector<8x8x384xbf16> to vector<64x384xbf16>
    %c2 = arith.constant 2 : index
    %c0_22 = arith.constant 0 : index
    %c0_23 = arith.constant 0 : index
    %47 = vector.load %arg8[%c2, %c0_22, %c0_23] : memref<3x384x128xbf16, #tpu.memory_space<vmem>>, vector<1x384x128xbf16>
    %48 = vector.shape_cast %47 : vector<1x384x128xbf16> to vector<384x128xbf16>
    %cst_24 = arith.constant dense<0.000000e+00> : vector<64x128xf32>
    %49 = tpu.matmul %46, %48, %cst_24 {dimension_numbers = #tpu.dot_dimension_numbers<[1], [0], [0], [1], [0, 0, 1, 1], [], []>} : vector<64x384xbf16>, vector<384x128xbf16>, vector<64x128xf32> -> vector<64x128xf32>
    %50 = arith.addf %41, %49 : vector<64x128xf32>
    %51 = vector.shape_cast %3 : vector<1x128xbf16> to vector<1x1x128xbf16>
    %c0_i32_25 = arith.constant 0 : i32
    %52 = arith.cmpi eq, %arg1, %c0_i32_25 : i32
    %53 = vector.shape_cast %51 : vector<1x1x128xbf16> to vector<1x1x128xbf16>
    %54 = vector.broadcast %53 : vector<1x1x128xbf16> to vector<1x8x128xbf16>
    %c0_26 = arith.constant 0 : index
    %c0_27 = arith.constant 0 : index
    %c0_28 = arith.constant 0 : index
    %c0_29 = arith.constant 0 : index
    %55 = vector.load %arg5[%c0_26, %c0_27, %c0_28, %c0_29] : memref<1x1x8x128xbf16, #tpu.memory_space<vmem>>, vector<1x1x8x128xbf16>
    %56 = vector.shape_cast %55 : vector<1x1x8x128xbf16> to vector<1x8x128xbf16>
    %57 = arith.select %52, %54, %56 : vector<1x8x128xbf16>
    %c0_i32_30 = arith.constant 0 : i32
    %58 = arith.cmpi eq, %arg1, %c0_i32_30 : i32
    %59 = vector.shape_cast %51 : vector<1x1x128xbf16> to vector<1x1x128xbf16>
    %60 = vector.broadcast %59 : vector<1x1x128xbf16> to vector<1x8x128xbf16>
    %c0_31 = arith.constant 0 : index
    %c0_32 = arith.constant 0 : index
    %c0_33 = arith.constant 0 : index
    %c0_34 = arith.constant 0 : index
    %61 = vector.load %arg7[%c0_31, %c0_32, %c0_33, %c0_34] : memref<1x1x8x128xbf16, #tpu.memory_space<vmem>>, vector<1x1x8x128xbf16>
    %62 = vector.shape_cast %61 : vector<1x1x8x128xbf16> to vector<1x8x128xbf16>
    %63 = arith.select %58, %60, %62 : vector<1x8x128xbf16>
    %c0_35 = arith.constant 0 : index
    %c0_36 = arith.constant 0 : index
    %c0_37 = arith.constant 0 : index
    %c0_38 = arith.constant 0 : index
    %64 = vector.load %arg6[%c0_35, %c0_36, %c0_37, %c0_38] : memref<1x8x8x128xbf16, #tpu.memory_space<vmem>>, vector<1x8x8x128xbf16>
    %65 = vector.shape_cast %64 : vector<1x8x8x128xbf16> to vector<8x8x128xbf16>
    %66 = tpu.concatenate %57, %65, %63 in 0 : vector<1x8x128xbf16>, vector<8x8x128xbf16>, vector<1x8x128xbf16> -> vector<10x8x128xbf16>
    %67 = vector.shape_cast %51 : vector<1x1x128xbf16> to vector<1x1x128xbf16>
    %68 = vector.broadcast %67 : vector<1x1x128xbf16> to vector<10x1x128xbf16>
    %69 = tpu.concatenate %68, %66, %68 in 1 : vector<10x1x128xbf16>, vector<10x8x128xbf16>, vector<10x1x128xbf16> -> vector<10x10x128xbf16>
    %cst_39 = arith.constant 0.000000e+00 : f32
    %70 = vector.broadcast %cst_39 : f32 to vector<64x128xf32>
    %71 = vector.extract_strided_slice %69 {offsets = [0, 0, 0], sizes = [8, 8, 128], strides = [1, 1, 1]} : vector<10x10x128xbf16> to vector<8x8x128xbf16>
    %72 = vector.extract_strided_slice %69 {offsets = [0, 1, 0], sizes = [8, 8, 128], strides = [1, 1, 1]} : vector<10x10x128xbf16> to vector<8x8x128xbf16>
    %73 = vector.extract_strided_slice %69 {offsets = [0, 2, 0], sizes = [8, 8, 128], strides = [1, 1, 1]} : vector<10x10x128xbf16> to vector<8x8x128xbf16>
    %74 = tpu.concatenate %71, %72, %73 in 2 : vector<8x8x128xbf16>, vector<8x8x128xbf16>, vector<8x8x128xbf16> -> vector<8x8x384xbf16>
    %75 = vector.shape_cast %74 : vector<8x8x384xbf16> to vector<64x384xbf16>
    %c0_40 = arith.constant 0 : index
    %c0_41 = arith.constant 0 : index
    %c0_42 = arith.constant 0 : index
    %76 = vector.load %arg8[%c0_40, %c0_41, %c0_42] : memref<3x384x128xbf16, #tpu.memory_space<vmem>>, vector<1x384x128xbf16>
    %77 = vector.shape_cast %76 : vector<1x384x128xbf16> to vector<384x128xbf16>
    %cst_43 = arith.constant dense<0.000000e+00> : vector<64x128xf32>
    %78 = tpu.matmul %75, %77, %cst_43 {dimension_numbers = #tpu.dot_dimension_numbers<[1], [0], [0], [1], [0, 0, 1, 1], [], []>} : vector<64x384xbf16>, vector<384x128xbf16>, vector<64x128xf32> -> vector<64x128xf32>
    %79 = arith.addf %70, %78 : vector<64x128xf32>
    %80 = vector.extract_strided_slice %69 {offsets = [1, 0, 0], sizes = [8, 8, 128], strides = [1, 1, 1]} : vector<10x10x128xbf16> to vector<8x8x128xbf16>
    %81 = vector.extract_strided_slice %69 {offsets = [1, 1, 0], sizes = [8, 8, 128], strides = [1, 1, 1]} : vector<10x10x128xbf16> to vector<8x8x128xbf16>
    %82 = vector.extract_strided_slice %69 {offsets = [1, 2, 0], sizes = [8, 8, 128], strides = [1, 1, 1]} : vector<10x10x128xbf16> to vector<8x8x128xbf16>
    %83 = tpu.concatenate %80, %81, %82 in 2 : vector<8x8x128xbf16>, vector<8x8x128xbf16>, vector<8x8x128xbf16> -> vector<8x8x384xbf16>
    %84 = vector.shape_cast %83 : vector<8x8x384xbf16> to vector<64x384xbf16>
    %c1_44 = arith.constant 1 : index
    %c0_45 = arith.constant 0 : index
    %c0_46 = arith.constant 0 : index
    %85 = vector.load %arg8[%c1_44, %c0_45, %c0_46] : memref<3x384x128xbf16, #tpu.memory_space<vmem>>, vector<1x384x128xbf16>
    %86 = vector.shape_cast %85 : vector<1x384x128xbf16> to vector<384x128xbf16>
    %cst_47 = arith.constant dense<0.000000e+00> : vector<64x128xf32>
    %87 = tpu.matmul %84, %86, %cst_47 {dimension_numbers = #tpu.dot_dimension_numbers<[1], [0], [0], [1], [0, 0, 1, 1], [], []>} : vector<64x384xbf16>, vector<384x128xbf16>, vector<64x128xf32> -> vector<64x128xf32>
    %88 = arith.addf %79, %87 : vector<64x128xf32>
    %89 = vector.extract_strided_slice %69 {offsets = [2, 0, 0], sizes = [8, 8, 128], strides = [1, 1, 1]} : vector<10x10x128xbf16> to vector<8x8x128xbf16>
    %90 = vector.extract_strided_slice %69 {offsets = [2, 1, 0], sizes = [8, 8, 128], strides = [1, 1, 1]} : vector<10x10x128xbf16> to vector<8x8x128xbf16>
    %91 = vector.extract_strided_slice %69 {offsets = [2, 2, 0], sizes = [8, 8, 128], strides = [1, 1, 1]} : vector<10x10x128xbf16> to vector<8x8x128xbf16>
    %92 = tpu.concatenate %89, %90, %91 in 2 : vector<8x8x128xbf16>, vector<8x8x128xbf16>, vector<8x8x128xbf16> -> vector<8x8x384xbf16>
    %93 = vector.shape_cast %92 : vector<8x8x384xbf16> to vector<64x384xbf16>
    %c2_48 = arith.constant 2 : index
    %c0_49 = arith.constant 0 : index
    %c0_50 = arith.constant 0 : index
    %94 = vector.load %arg8[%c2_48, %c0_49, %c0_50] : memref<3x384x128xbf16, #tpu.memory_space<vmem>>, vector<1x384x128xbf16>
    %95 = vector.shape_cast %94 : vector<1x384x128xbf16> to vector<384x128xbf16>
    %cst_51 = arith.constant dense<0.000000e+00> : vector<64x128xf32>
    %96 = tpu.matmul %93, %95, %cst_51 {dimension_numbers = #tpu.dot_dimension_numbers<[1], [0], [0], [1], [0, 0, 1, 1], [], []>} : vector<64x384xbf16>, vector<384x128xbf16>, vector<64x128xf32> -> vector<64x128xf32>
    %97 = arith.addf %88, %96 : vector<64x128xf32>
    %98 = arith.subf %50, %97 : vector<64x128xf32>
    %c0_52 = arith.constant 0 : index
    %c0_53 = arith.constant 0 : index
    %c0_54 = arith.constant 0 : index
    %99 = vector.load %arg9[%c0_52, %c0_53, %c0_54] : memref<1x8x128xf32, #tpu.memory_space<vmem>>, vector<1x8x128xf32>
    %100 = vector.shape_cast %99 : vector<1x8x128xf32> to vector<8x128xf32>
    %101 = arith.mulf %98, %98 : vector<64x128xf32>
    %102 = vector.shape_cast %101 : vector<64x128xf32> to vector<8x8x128xf32>
    %cst_55 = arith.constant dense<0.000000e+00> : vector<8x128xf32>
    %103 = vector.multi_reduction <add>, %102, %cst_55 [0] : vector<8x8x128xf32> to vector<8x128xf32>
    %104 = arith.addf %100, %103 : vector<8x128xf32>
    %c0_56 = arith.constant 0 : index
    %c0_57 = arith.constant 0 : index
    %c0_58 = arith.constant 0 : index
    %105 = vector.load %arg9[%c0_56, %c0_57, %c0_58] : memref<1x8x128xf32, #tpu.memory_space<vmem>>, vector<1x8x128xf32>
    %106 = vector.shape_cast %105 : vector<1x8x128xf32> to vector<8x128xf32>
    %107 = vector.shape_cast %104 : vector<8x128xf32> to vector<1x8x128xf32>
    tpu.vector_store %arg9[%c0_56, %c0_57, %c0_58], %107 {strides = array<i32>} : memref<1x8x128xf32, #tpu.memory_space<vmem>>, vector<1x8x128xf32>,
    return
  }
  func.func @transform_0(%arg0: i32, %arg1: i32) -> (i32, i32, i32, i32) {
    %c0_i32 = arith.constant 0 : i32
    %0 = arith.addi %arg0, %c0_i32 : i32
    %c8_i32 = arith.constant 8 : i32
    %1 = arith.muli %arg1, %c8_i32 : i32
    %c1_i32 = arith.constant 1 : i32
    %2 = arith.subi %1, %c1_i32 : i32
    %c0_i32_0 = arith.constant 0 : i32
    %3 = arith.maxsi %2, %c0_i32_0 : i32
    %c0_i32_1 = arith.constant 0 : i32
    %c0_i32_2 = arith.constant 0 : i32
    %c0_i32_3 = arith.constant 0 : i32
    return %0, %3, %c0_i32_1, %c0_i32_2 : i32, i32, i32, i32
  }
  func.func @transform_1(%arg0: i32, %arg1: i32) -> (i32, i32, i32, i32) {
    %c0_i32 = arith.constant 0 : i32
    %0 = arith.addi %arg0, %c0_i32 : i32
    %c0_i32_0 = arith.constant 0 : i32
    %c0_i32_1 = arith.constant 0 : i32
    %c0_i32_2 = arith.constant 0 : i32
    return %0, %arg1, %c0_i32_0, %c0_i32_1 : i32, i32, i32, i32
  }
  func.func @transform_2(%arg0: i32, %arg1: i32) -> (i32, i32, i32, i32) {
    %c0_i32 = arith.constant 0 : i32
    %0 = arith.addi %arg0, %c0_i32 : i32
    %c1_i32 = arith.constant 1 : i32
    %1 = arith.addi %arg1, %c1_i32 : i32
    %c8_i32 = arith.constant 8 : i32
    %2 = arith.muli %1, %c8_i32 : i32
    %c7_i32 = arith.constant 7 : i32
    %3 = arith.minsi %2, %c7_i32 : i32
    %c0_i32_0 = arith.constant 0 : i32
    %c0_i32_1 = arith.constant 0 : i32
    %c0_i32_2 = arith.constant 0 : i32
    return %0, %3, %c0_i32_0, %c0_i32_1 : i32, i32, i32, i32
  }
  func.func @transform_3(%arg0: i32, %arg1: i32) -> (i32, i32, i32, i32) {
    %c2_i32 = arith.constant 2 : i32
    %0 = arith.addi %arg0, %c2_i32 : i32
    %c8_i32 = arith.constant 8 : i32
    %1 = arith.muli %arg1, %c8_i32 : i32
    %c1_i32 = arith.constant 1 : i32
    %2 = arith.subi %1, %c1_i32 : i32
    %c0_i32 = arith.constant 0 : i32
    %3 = arith.maxsi %2, %c0_i32 : i32
    %c0_i32_0 = arith.constant 0 : i32
    %c0_i32_1 = arith.constant 0 : i32
    %c0_i32_2 = arith.constant 0 : i32
    return %0, %3, %c0_i32_0, %c0_i32_1 : i32, i32, i32, i32
  }
  func.func @transform_4(%arg0: i32, %arg1: i32) -> (i32, i32, i32, i32) {
    %c2_i32 = arith.constant 2 : i32
    %0 = arith.addi %arg0, %c2_i32 : i32
    %c0_i32 = arith.constant 0 : i32
    %c0_i32_0 = arith.constant 0 : i32
    %c0_i32_1 = arith.constant 0 : i32
    return %0, %arg1, %c0_i32, %c0_i32_0 : i32, i32, i32, i32
  }
  func.func @transform_5(%arg0: i32, %arg1: i32) -> (i32, i32, i32, i32) {
    %c2_i32 = arith.constant 2 : i32
    %0 = arith.addi %arg0, %c2_i32 : i32
    %c1_i32 = arith.constant 1 : i32
    %1 = arith.addi %arg1, %c1_i32 : i32
    %c8_i32 = arith.constant 8 : i32
    %2 = arith.muli %1, %c8_i32 : i32
    %c7_i32 = arith.constant 7 : i32
    %3 = arith.minsi %2, %c7_i32 : i32
    %c0_i32 = arith.constant 0 : i32
    %c0_i32_0 = arith.constant 0 : i32
    %c0_i32_1 = arith.constant 0 : i32
    return %0, %3, %c0_i32, %c0_i32_0 : i32, i32, i32, i32
  }
  func.func @transform_6(%arg0: i32, %arg1: i32) -> (i32, i32, i32) {
    %c0_i32 = arith.constant 0 : i32
    %c0_i32_0 = arith.constant 0 : i32
    %c0_i32_1 = arith.constant 0 : i32
    %c0_i32_2 = arith.constant 0 : i32
    return %c0_i32, %c0_i32_0, %c0_i32_1 : i32, i32, i32
  }
  func.func @transform_7(%arg0: i32, %arg1: i32) -> (i32, i32, i32) {
    %c0_i32 = arith.constant 0 : i32
    %c0_i32_0 = arith.constant 0 : i32
    %c0_i32_1 = arith.constant 0 : i32
    return %arg0, %c0_i32, %c0_i32_0 : i32, i32, i32
  }
}

module attributes {stable_mosaic.version = 11 : i64} {
  func.func @_l1_kernel(%arg0: i32, %arg1: memref<32x48xf32, #tpu.memory_space<vmem>>, %arg2: memref<32x48xf32, #tpu.memory_space<vmem>>, %arg3: memref<8x48xf32, #tpu.memory_space<vmem>>) attributes {dimension_semantics = [#tpu.dimension_semantics<arbitrary>], iteration_bounds = array<i64: 1>, scalar_prefetch = 0 : i64, scratch_operands = 0 : i64, tpu.core_type = #tpu.core_type<tc>, window_params = [{transform_indices = @transform_0, window_bounds = array<i64: 32, 48>}, {transform_indices = @transform_1, window_bounds = array<i64: 32, 48>}, {pipeline_mode = #tpu.pipeline_mode<synchronous>, transform_indices = @transform_2, window_bounds = array<i64: 8, 48>}]} {
    %c0_i32 = arith.constant 0 : i32
    %0 = arith.cmpi eq, %arg0, %c0_i32 : i32
    %1 = arith.extui %0 : i1 to i32
    %c0_i32_0 = arith.constant 0 : i32
    %2 = arith.cmpi ne, %1, %c0_i32_0 : i32
    scf.if %2 {
      %cst_8 = arith.constant 0.000000e+00 : f32
      %12 = vector.broadcast %cst_8 : f32 to vector<8x48xf32>
      %c0_9 = arith.constant 0 : index
      %c0_10 = arith.constant 0 : index
      %13 = vector.load %arg3[%c0_9, %c0_10] : memref<8x48xf32, #tpu.memory_space<vmem>>, vector<8x48xf32>
      tpu.vector_store %arg3[%c0_9, %c0_10], %12 {strides = array<i32>} : memref<8x48xf32, #tpu.memory_space<vmem>>, vector<8x48xf32>,
    } else {
    }
    %c0 = arith.constant 0 : index
    %c0_1 = arith.constant 0 : index
    %3 = vector.load %arg1[%c0, %c0_1] : memref<32x48xf32, #tpu.memory_space<vmem>>, vector<32x48xf32>
    %c0_2 = arith.constant 0 : index
    %c0_3 = arith.constant 0 : index
    %4 = vector.load %arg2[%c0_2, %c0_3] : memref<32x48xf32, #tpu.memory_space<vmem>>, vector<32x48xf32>
    %5 = arith.subf %3, %4 : vector<32x48xf32>
    %6 = math.absf %5 : vector<32x48xf32>
    %c0_4 = arith.constant 0 : index
    %c0_5 = arith.constant 0 : index
    %7 = vector.load %arg3[%c0_4, %c0_5] : memref<8x48xf32, #tpu.memory_space<vmem>>, vector<8x48xf32>
    %8 = vector.shape_cast %6 : vector<32x48xf32> to vector<4x8x48xf32>
    %cst = arith.constant dense<0.000000e+00> : vector<8x48xf32>
    %9 = vector.multi_reduction <add>, %8, %cst [0] : vector<4x8x48xf32> to vector<8x48xf32>
    %10 = arith.addf %7, %9 : vector<8x48xf32>
    %c0_6 = arith.constant 0 : index
    %c0_7 = arith.constant 0 : index
    %11 = vector.load %arg3[%c0_6, %c0_7] : memref<8x48xf32, #tpu.memory_space<vmem>>, vector<8x48xf32>
    tpu.vector_store %arg3[%c0_6, %c0_7], %10 {strides = array<i32>} : memref<8x48xf32, #tpu.memory_space<vmem>>, vector<8x48xf32>,
    return
  }
  func.func @transform_0(%arg0: i32) -> (i32, i32) {
    %c0_i32 = arith.constant 0 : i32
    %c0_i32_0 = arith.constant 0 : i32
    return %arg0, %c0_i32 : i32, i32
  }
  func.func @transform_1(%arg0: i32) -> (i32, i32) {
    %c0_i32 = arith.constant 0 : i32
    %c0_i32_0 = arith.constant 0 : i32
    return %arg0, %c0_i32 : i32, i32
  }
  func.func @transform_2(%arg0: i32) -> (i32, i32) {
    %c0_i32 = arith.constant 0 : i32
    %c0_i32_0 = arith.constant 0 : i32
    %c0_i32_1 = arith.constant 0 : i32
    return %c0_i32, %c0_i32_0 : i32, i32
  }
}

</mosaic_0001>

<bundles_post_ra>
// kernel: _lambda_.5
= control target key start
LH: loop header
LB: loop body
LE: loop exit
PB: predicated region body
PF: predicated region fallthrough
CT: control target
= control target key end

     0   :  { %s1740_s21 = smov 0   ;;  %s1742_s22 = smov 0   ;;  %s2307_s0 = inlined_call_operand.vmem [shape: bf16[4,16,16,3], index: 0, kind: input, shape index: {}, may-alias: {0,1,2}]   ;;  %s2308_s1 = inlined_call_operand.vmem [shape: bf16[4,16,16,3], index: 1, kind: input, shape index: {}, may-alias: {0,1,2}]   ;;  %s2309_s2 = inlined_call_operand.vmem [shape: bf16[4,16,16,3], index: 2, kind: input, shape index: {}, may-alias: {0,1,2}]   ;;  %s2310_s3 = inlined_call_operand.vmem [shape: bf16[1,3], index: 3, kind: input, shape index: {}]   ;;  %s2311_s4 = inlined_call_operand.vmem [shape: bf16[1,27,64], index: 4, kind: input, shape index: {}]   ;;  %s2312_s5 = inlined_call_operand.vmem [shape: f32[1,64], index: 5, kind: input, shape index: {}]   ;;  %s2313_s6 = inlined_call_operand.vmem [shape: bf16[4,16,16,64], index: 6, kind: output, shape index: {}]  }
   0x1   :  { %s1744_s23 = smov 0   ;;  %s1746_s24 = smov 0  }
   0x2   :  { %s1748_s25 = smov 0  }
   0x3 LB: > { %s25_s26 = sadd.s32 1, %s1685_s23  ;;  %s28_s27 = sadd.s32 1, %s1689_s24  ;;  %s1693_s25 = sphi %s1748_s25, %s16_s25   ;;  %s1689_s24 = sphi %s1746_s24, %s2320_s24   ;;  %s1685_s23 = sphi %s1744_s23, %s2319_s23   ;;  %s1681_s22 = sphi %s1742_s22, %s2318_s22   ;;  %s1677_s21 = sphi %s1740_s21, %s2317_s21  }
   0x4   : > { %p26_p0 = scmp.ge.s32.totalorder %s25_s26, 2  ;;  %p1470_p1 = scmp.ge.s32.totalorder %s1693_s25, 1 }
   0x5   : > { %p298_p2 = scmp.lt.s32.totalorder %s1693_s25, 9 }
   0x6   : > { %s2322_s26 = smov (%p26_p0, %s25_s26), 0  ;;  %s2324_s27 = smov (!%p26_p0, %s28_s27), %s1689_s24 }
   0x7   : > { %p299_p3 = pnand %p1470_p1, %p298_p2  ;;  %p30_p4 = scmp.ge.s32.totalorder %s2324_s27, 4 }
   0x8   : > { %s1773_s28 = sshll.u32 (!%p299_p3), %s1677_s21, 3  ;;  %p368_p5 = scmp.lt.s32.totalorder (!%p299_p3), %s1681_s22, 3  ;;  %v426_v0 = vlaneseq (!%p299_p3)  ;;  %v1695_v2 = vmov (!%p299_p3), 1966171168   ;;  %v1784_v5 = vld [vmem:[%s2310_s3] sm:$0x1] (!%p299_p3) }
   0x9   : > { %s2326_s27 = smov (%p30_p4, %s2324_s27), 0  ;;  %302 = sbr.rel (%p299_p3) target bundleno = 494 (0x1ee), region = 44 }
   0xa   : > { %p384_p6 = scmp.lt.s32.totalorder (!%p299_p3), %s1773_s28, 15  ;;  %v1776_v1 = vshrl.u32 (!%p299_p3), %v426_v0, 7  ;;  %v603_v3 = vunpack.c.l.s4 (!%p299_p3), %v1695_v2  ;;  %s1791_s11 = sadd.s32 (!%p299_p3), 4294967295, %s1773_s28  ;;  %vm620_vm0 = vcmask (!%p299_p3), 1040384   ;;  %vm621_vm1 = vsmask.f32 (!%p299_p3), 256 }
   0xb   : > { %p366_p7 = scmp.gt.s32.totalorder (!%p299_p3), %s1791_s11, 0  ;;  %p1473_p8 = scmp.lt.s32.totalorder (!%p299_p3), %s1791_s11, 15  ;;  %vm772_vm2 = vcmask (!%p299_p3), 1046528   ;;  %vm1813_vm3 = vmand (!%p299_p3), %vm620_vm0, %vm621_vm1  ;;  %vm643_vm4 = vsmask.f32 (!%p299_p3), 7424  ;;  %v424_v34 = vpack.i.b16 (!%p299_p3), %v1784_v5, %v1784_v5  ;;  %v1653_v19 = vld [vmem:[%s2311_s4] sm:$0xff] (!%p299_p3)  }
   0xc   : > { %v604_v4 = vunpack.c.0.s8 (!%p299_p3), %v603_v3  ;;  %p422_p9 = scmp.eq.s32.totalorder (!%p299_p3), %s1677_s21, 0  ;;  %v428_v35 = vsub.s32 (!%p299_p3), 0, %v1776_v1  ;;  %s1696_s19 = smov (!%p299_p3), 9   ;;  %vm1118_vm7 = vcmask (!%p299_p3), 1044480   ;;  %1569 = vmatprep.subr.bf16.mxu0 (!%p299_p3), %v1653_v19  ;;  %vm1119_vm8 = vcmask (!%p299_p3), 1045504   ;;  %1589 = vmatprep.subr.bf16.mxu1 (!%p299_p3), %v1653_v19 }
   0xd   : > { %s1542_s9 = sadd.s32 (!%p299_p3), 8, %s1773_s28  ;;  %s1697_s13 = smov (!%p299_p3), 6   ;;  %1570 = vmatpush3.bf16.msra.mxu0 (!%p299_p3), %v1653_v19  ;;  %1591 = vmatpush3.bf16.msra.mxu1 (!%p299_p3), %v1653_v19  ;;  %vm943_vm9 = vcmask (!%p299_p3), 23552   ;;  %vm960_vm10 = vcmask (!%p299_p3), 48128   ;;  %vm977_vm11 = vcmask (!%p299_p3), 72704   ;;  %vm994_vm12 = vcmask (!%p299_p3), 97280  }
   0xe   : > { %v607_v6 = vsub.s32 (!%p299_p3), %v604_v4, %v1776_v1  ;;  %v1878_v51 = vrot.slane (!%p299_p3), %v424_v34, %v428_v35  ;;  %p1897_p10 = scmp.lt.s32.totalorder (!%p299_p3), %s1542_s9, 15  ;;  %p442_p11 = scmp.eq.s32.totalorder (!%p299_p3), %s1677_s21, 1  ;;  %vm1011_vm13 = vcmask (!%p299_p3), 121856   ;;  %vm1028_vm14 = vcmask (!%p299_p3), 146432  }
   0xf   : > { %s1698_s14 = smov (!%p299_p3), 3   ;;  %s1699_s21 = smov (!%p299_p3), 12   ;;  %vm1045_vm15 = vcmask (!%p299_p3), 171008   ;;  %vm1062_vm0 = vcmask (!%p299_p3), 195584   ;;  %vm1101_vm1 = vcmask (!%p299_p3), 220160  }
  0x10   : > { %s2328_s22 = smov (!%p368_p5, %s1681_s22), 3  ;;  %v608_v7 = vrot.slane %v1784_v5, %v607_v6  ;;  %s2332_s9 = smov (!%p1897_p10, %s1542_s9), 15 }
  0x11   : > { %s385_s29 = scalar_select %p384_p6, %s1773_s28, 15 }
  0x12   : > { %s1779_s30 = sshll.u32 %s2328_s22, 5  ;;  %v615_v16 = vrot.slane %v608_v7, %v607_v6  ;;  %s2334_s9 = smov (!%p1897_p10, %s2332_s9), 15 }
  0x13   : > { %s1482_s7 = sshll.u32 %s385_s29, 1  ;;  %s1489_s28 = sshll.u32 %s2334_s9, 1 }
  0x14   : > { %s1787_s10 = sadd.s32 %s1482_s7, %s1779_s30  ;;  %v1823_v31 = vshll.u32 %v615_v16, 16  ;;  %s1701_s29 = smov 18  }
  0x15   : > { %s1484_s12 = sshll.u32 %s1787_s10, 2 }
  0x16   : > { %s1800_s15 = scalar_lea.vmem %s2308_s1, %s1484_s12 }
  0x17   : > { %v1643_v8 = vld [vmem:[%s1800_s15 + $0x20] sm:$0xff]   ;;  %s367_s16 = scalar_select %p366_p7, %s1791_s11, 0  ;;  %v1645_v14 = vld [vmem:[%s1800_s15 + $0x28] sm:$0xff]   ;;  %v1647_v18 = vld [vmem:[%s1800_s15 + $0x18] sm:$0xff]  }
  0x18   : > { %v1644_v9 = vld [vmem:[%s1800_s15] sm:$0xff]   ;;  %v547_v10 = vshrl.u32 %v1643_v8, 16  ;;  %v550_v11 = vshll.u32 %v1643_v8, 16  ;;  %v1646_v15 = vld [vmem:[%s1800_s15 + $0x8] sm:$0xff]   ;;  %v554_v21 = vshrl.u32 %v1645_v14, 16  ;;  %v557_v22 = vshll.u32 %v1645_v14, 16 }
  0x19   : > { %v519_v12 = vshrl.u32 %v1644_v9, 16  ;;  %v522_v13 = vshll.u32 %v1644_v9, 16  ;;  %v526_v23 = vshrl.u32 %v1646_v15, 16  ;;  %v529_v25 = vshll.u32 %v1646_v15, 16  ;;  %s2330_s16 = smov (!%p1473_p8, %s367_s16), 15  ;;  %v1651_v34 = vld [vmem:[%s1800_s15 + $0x38] sm:$0xff]  }
  0x1a   : > { %v549_v17 = vrot.slane %v547_v10, 7  ;;  %v540_v26 = vshrl.u32 %v1647_v18, 16  ;;  %v543_v27 = vshll.u32 %v1647_v18, 16  ;;  %v1819_v29 = vrot.slane %v554_v21, 7  ;;  %s1827_s17 = scalar_select %p422_p9, 1, 0 }
  0x1b   : > { %v521_v20 = vrot.slane %v519_v12, 7  ;;  %v1821_v30 = vrot.slane %v526_v23, 7  ;;  %s1478_s18 = sshll.u32 %s2330_s16, 1  ;;  %s402_s16 = sadd.s32 %s1489_s28, %s1779_s30 }
  0x1c   : > { %v552_v24 = vor.u32 %v550_v11, %v549_v17  ;;  %v542_v33 = vrot.slane %v540_v26, 7  ;;  %v559_v37 = vor.u32 %v557_v22, %v1819_v29  ;;  %s374_s20 = sadd.s32 %s1779_s30, %s1478_s18  ;;  %v638_v47 = vsel %vm1813_vm3, %v549_v17, %v1823_v31  ;;  %s1703_s28 = smov 21  }
  0x1d   : > { %v524_v28 = vor.u32 %v522_v13, %v521_v20  ;;  %v531_v38 = vor.u32 %v529_v25, %v1821_v30  ;;  %v634_v39 = vsel %vm1813_vm3, %v521_v20, %v1823_v31  ;;  %s1480_s22 = sshll.u32 %s374_s20, 2  ;;  %v789_v50 = vrot.slane %v638_v47, 1  ;;  %s2245_s30 = scalar_lea.vmem %s2313_s6, %s1484_s12 }
  0x1e   : > { %v1832_v32 = vsel %vm1813_vm3, %v1784_v5, %v552_v24  ;;  %v545_v40 = vor.u32 %v543_v27, %v542_v33  ;;  %v637_v41 = vsel %vm1813_vm3, %v542_v33, %v1823_v31  ;;  %v777_v43 = vrot.slane %v634_v39, 1  ;;  %s376_s8 = scalar_lea.vmem %s2307_s0, %s1480_s22 }
  0x1f   : > { %822 = vrot.lane.b32.xlu1 %v1832_v32, %s1696_s19  ;;  %v1842_v36 = vsel %vm1813_vm3, %v1784_v5, %v524_v28  ;;  %v1859_v44 = vsel %vm1813_vm3, %v1784_v5, %v559_v37  ;;  %v1864_v45 = vsel %vm1813_vm3, %v1784_v5, %v531_v38  ;;  %v786_v46 = vrot.slane %v637_v41, 1  ;;  %v1648_v56 = vld [vmem:[%s376_s8] sm:$0xff]   ;;  %s445_s22 = scalar_select %p442_p11, 1, 0 }
  0x20   : > { %814 = vrot.lane.b32.xlu0 %v1842_v36, %s1696_s19  ;;  %v776_v42 = vrot.slane %v1842_v36, 1  ;;  %v1875_v48 = vsel %vm1813_vm3, %v1784_v5, %v545_v40  ;;  %v788_v49 = vrot.slane %v1832_v32, 1  ;;  %v700_v55 = vshll.u32 %v637_v41, 16 }
  0x21   : > { %v785_v52 = vrot.slane %v1875_v48, 1  ;;  %v693_v53 = vshrl.u32 %v1875_v48, 16  ;;  %v695_v54 = vshll.u32 %v1875_v48, 16  ;;  %v657_v58 = vshrl.u32 %v1842_v36, 16 }
  0x22   : > { %v1888_v57 = vsel %vm772_vm2, %v776_v42, %v777_v43  ;;  %v659_v59 = vshll.u32 %v1842_v36, 16  ;;  %v664_v60 = vshll.u32 %v634_v39, 16  ;;  %v702_v63 = vrot.slane %v700_v55, 1  ;;  %v1649_v42 = vld [vmem:[%s1800_s15 + $0x30] sm:$0xff]  }
  0x23   : > { %824 = vrot.lane.b32.xlu1 %v1859_v44, %s1696_s19  ;;  %v1894_v61 = vsel %vm772_vm2, %v785_v52, %v786_v46  ;;  %v697_v62 = vrot.slane %v695_v54, 1  ;;  %v433_v0 = vstv %s1827_s17  ;;  %v1902_v1 = vsel %vm772_vm2, %v788_v49, %v789_v50  ;;  %s1491_s17 = sshll.u32 %s402_s16, 2  ;;  %s1704_s16 = smov 24  }
  0x24   : > { %816 = vrot.lane.b32.xlu0 %v1864_v45, %s1696_s19  ;;  %v661_v2 = vrot.slane %v659_v59, 1  ;;  %v666_v3 = vrot.slane %v664_v60, 1  ;;  %vm434_vm5 = vcmp.eq.s32.totalorder %v433_v0, 1  ;;  %v707_v7 = vshll.u32 %v1832_v32, 16  ;;  %s404_s20 = scalar_lea.vmem %s2309_s2, %s1491_s17 }
  0x25   : > { %v698_v4 = vor.u32 %v697_v62, %v693_v53  ;;  %v441_v6 = vsel %vm434_vm5, %v1878_v51, %v1648_v56  ;;  %v712_v8 = vshll.u32 %v638_v47, 16  ;;  %v705_v12 = vshrl.u32 %v1832_v32, 16  ;;  %v1652_v47 = vld [vmem:[%s404_s20] sm:$0xff]   ;;  %v1650_v56 = vld [vmem:[%s1800_s15 + $0x10] sm:$0xff]   ;;  %s1700_s15 = smov 15  }
  0x26   : > { %v662_v9 = vor.u32 %v661_v2, %v657_v58  ;;  %v512_v10 = vshrl.u32 %v441_v6, 16  ;;  %v515_v11 = vshll.u32 %v441_v6, 16  ;;  %v709_v14 = vrot.slane %v707_v7, 1 }
  0x27   : > { %805 = vrot.lane.b32.xlu1 %v1894_v61, %s1697_s13  ;;  %v1914_v13 = vsel %vm643_vm4, %v698_v4, %v702_v63  ;;  %v671_v16 = vshll.u32 %v1864_v45, 16  ;;  %v714_v18 = vrot.slane %v712_v8, 1  ;;  %v1926_v20 = vsel %vm1813_vm3, %v1821_v30, %v1823_v31 }
  0x28   : > { %799 = vrot.lane.b32.xlu0 %v1888_v57, %s1697_s13  ;;  %v514_v15 = vrot.slane %v512_v10, 7  ;;  %v667_v17 = vsel %vm643_vm4, %v662_v9, %v666_v3  ;;  %v710_v23 = vor.u32 %v709_v14, %v705_v12  ;;  %v719_v24 = vshll.u32 %v1859_v44, 16 }
  0x29   : > { %v1940_v26 = vsel %vm1813_vm3, %v1819_v29, %v1823_v31  ;;  %v669_v28 = vshrl.u32 %v1864_v45, 16  ;;  %v673_v30 = vrot.slane %v671_v16, 1  ;;  %v676_v33 = vshll.u32 %v1926_v20, 16 }
  0x2a   : > { %v517_v21 = vor.u32 %v515_v11, %v514_v15  ;;  %v633_v22 = vsel %vm1813_vm3, %v514_v15, %v1823_v31  ;;  %v717_v35 = vshrl.u32 %v1859_v44, 16  ;;  %v1959_v37 = vsel %vm643_vm4, %v710_v23, %v714_v18 }
  0x2b   : > { %807 = vrot.lane.b32.xlu1 %v1902_v1, %s1697_s13  ;;  %v774_v25 = vrot.slane %v633_v22, 1  ;;  %v721_v38 = vrot.slane %v719_v24, 1  ;;  %v724_v39 = vshll.u32 %v1940_v26, 16  ;;  %v674_v43 = vor.u32 %v673_v30, %v669_v28 }
  0x2c   : > { %748 = vrot.lane.b32.xlu0 %v1914_v13, %s1698_s14  ;;  %v1945_v27 = vsel %vm1813_vm3, %v1784_v5, %v517_v21  ;;  %v678_v46 = vrot.slane %v676_v33, 1  ;;  %v652_v52 = vshll.u32 %v633_v22, 16  ;;  %v568_v53 = vshrl.u32 %v1651_v34, 16 }
  0x2d   : > { %v773_v29 = vrot.slane %v1945_v27, 1  ;;  %v647_v40 = vshll.u32 %v1945_v27, 16  ;;  %v645_v49 = vshrl.u32 %v1945_v27, 16  ;;  %v722_v54 = vor.u32 %v721_v38, %v717_v35 }
  0x2e   : > { %v726_v55 = vrot.slane %v724_v39, 1  ;;  %v571_v58 = vshll.u32 %v1651_v34, 16  ;;  %v446_v59 = vstv %s445_s22  ;;  %v561_v60 = vshrl.u32 %v1649_v42, 16 }
  0x2f   : > { %742 = vrot.lane.b32.xlu1 %v667_v17, %s1698_s14  ;;  %v775_v41 = vsel %vm772_vm2, %v773_v29, %v774_v25  ;;  %v649_v50 = vrot.slane %v647_v40, 1  ;;  %v570_v62 = vrot.slane %v568_v53, 7  ;;  %vm447_vm6 = vcmp.eq.s32.totalorder %v446_v59, 1 }
  0x30   : > { %797 = vrot.lane.b32.xlu0 %v775_v41, %s1697_s13  ;;  %v454_v63 = vsel %vm447_vm6, %v1878_v51, %v1652_v47  ;;  %v1975_v0 = vsel %vm643_vm4, %v674_v43, %v678_v46  ;;  %v654_v3 = vrot.slane %v652_v52, 1  ;;  %v1978_v4 = vsel %vm643_vm4, %v722_v54, %v726_v55 }
  0x31   : > { %v650_v2 = vor.u32 %v649_v50, %v645_v49  ;;  %v533_v6 = vshrl.u32 %v1650_v56, 16  ;;  %v573_v7 = vor.u32 %v571_v58, %v570_v62  ;;  %v563_v8 = vrot.slane %v561_v60, 7 }
  0x32   : > { %v564_v9 = vshll.u32 %v1649_v42, 16  ;;  %v791_v51 = vrot.slane %v1859_v44, 1  ;;  %v792_v11 = vrot.slane %v1940_v26, 1  ;;  %v641_v14 = vsel %vm1813_vm3, %v570_v62, %v1823_v31 }
  0x33   : > { %750 = vrot.lane.b32.xlu1 %v1959_v37, %s1698_s14  ;;  %v655_v10 = vsel %vm643_vm4, %v650_v2, %v654_v3  ;;  %v1990_v12 = vsel %vm1813_vm3, %v1784_v5, %v573_v7  ;;  %v535_v15 = vrot.slane %v533_v6, 7  ;;  %v536_v16 = vshll.u32 %v1650_v56, 16 }
  0x34   : > { %842 = vrot.lane.b32.xlu0 %v667_v17, %s1699_s21  ;;  %v831_v17 = vshrl.u32 %v1990_v12, 16  ;;  %v833_v18 = vshll.u32 %v1990_v12, 16  ;;  %v566_v21 = vor.u32 %v564_v9, %v563_v8  ;;  %v838_v22 = vshll.u32 %v641_v14, 16 }
  0x35   : > { %v859_v23 = vrot.slane %v1990_v12, 1  ;;  %v779_v24 = vrot.slane %v1864_v45, 1  ;;  %v860_v26 = vrot.slane %v641_v14, 1  ;;  %v575_v28 = vshrl.u32 %v454_v63, 16 }
  0x36   : > { %v835_v25 = vrot.slane %v833_v18, 1  ;;  %v2003_v30 = vsel %vm772_vm2, %v791_v51, %v792_v11  ;;  %v780_v33 = vrot.slane %v1926_v20, 1  ;;  %v840_v34 = vrot.slane %v838_v22, 1 }
  0x37   : > { %850 = vrot.lane.b32.xlu1 %v1959_v37, %s1699_s21  ;;  %v578_v29 = vshll.u32 %v454_v63, 16  ;;  %v538_v35 = vor.u32 %v536_v16, %v535_v15  ;;  %v2007_v39 = vsel %vm772_vm2, %v859_v23, %v860_v26  ;;  %v577_v40 = vrot.slane %v575_v28, 7 }
  0x38   : > { %844 = vrot.lane.b32.xlu0 %v1975_v0, %s1699_s21  ;;  %v836_v38 = vor.u32 %v835_v25, %v831_v17  ;;  %v2012_v41 = vsel %vm1813_vm3, %v1784_v5, %v566_v21  ;;  %v2025_v46 = vsel %vm772_vm2, %v779_v24, %v780_v33  ;;  %v640_v53 = vsel %vm1813_vm3, %v563_v8, %v1823_v31 }
  0x39   : > { %v580_v20 = vor.u32 %v578_v29, %v577_v40  ;;  %v642_v43 = vsel %vm1813_vm3, %v577_v40, %v1823_v31  ;;  %v731_v50 = vshll.u32 %v2012_v41, 16  ;;  %v729_v62 = vshrl.u32 %v2012_v41, 16 }
  0x3a   : > { %v2017_v42 = vsel %vm643_vm4, %v836_v38, %v840_v34  ;;  %v903_v47 = vshll.u32 %v642_v43, 16  ;;  %v925_v49 = vrot.slane %v642_v43, 1  ;;  %v736_v2 = vshll.u32 %v640_v53, 16 }
  0x3b   : > { %852 = vrot.lane.b32.xlu1 %v1978_v4, %s1699_s21  ;;  %v2036_v52 = vsel %vm1813_vm3, %v1784_v5, %v580_v20  ;;  %v733_v63 = vrot.slane %v731_v50, 1  ;;  %v636_v3 = vsel %vm1813_vm3, %v535_v15, %v1823_v31  ;;  %v1654_v31 = vld [vmem:[%s2311_s4 + $0x8] sm:$0x3f]   ;;  %v1702_v14 = vmov 65535  }
  0x3c   : > { %740 = vrot.lane.b32.xlu0 %v655_v10, %s1698_s14  ;;  %v896_v54 = vshrl.u32 %v2036_v52, 16  ;;  %v898_v55 = vshll.u32 %v2036_v52, 16  ;;  %v924_v56 = vrot.slane %v2036_v52, 1  ;;  %v905_v59 = vrot.slane %v903_v47, 1 }
  0x3d   : > { %v688_v9 = vshll.u32 %v636_v3, 16  ;;  %v734_v10 = vor.u32 %v733_v63, %v729_v62  ;;  %v738_v11 = vrot.slane %v736_v2, 1  ;;  %v1120_v15 = vsel %vm1118_vm7, 4294967295, %v1702_v14 }
  0x3e   : > { %v900_v58 = vrot.slane %v898_v55, 1  ;;  %v2050_v60 = vsel %vm772_vm2, %v924_v56, %v925_v49  ;;  %v1121_v18 = vsel %vm1119_vm8, %v1120_v15, 0  ;;  %v794_v24 = vrot.slane %v2012_v41, 1 }
  0x3f   : > { %870 = vrot.lane.b32.xlu1 %v1902_v1, %s1700_s15  ;;  %v690_v17 = vrot.slane %v688_v9, 1  ;;  %v739_v21 = vsel %vm643_vm4, %v734_v10, %v738_v11  ;;  %v1123_v22 = vand.u32 %v1654_v31, %v1121_v18  ;;  %v795_v25 = vrot.slane %v640_v53, 1 }
  0x40   : > { %862 = vrot.lane.b32.xlu0 %v1888_v57, %s1700_s15  ;;  %v2030_v57 = vsel %vm1813_vm3, %v1784_v5, %v538_v35  ;;  %v901_v6 = vor.u32 %v900_v58, %v896_v54  ;;  %v783_v28 = vrot.slane %v636_v3, 1 }
  0x41   : > { %v683_v5 = vshll.u32 %v2030_v57, 16  ;;  %v681_v7 = vshrl.u32 %v2030_v57, 16  ;;  %1571 = vmatprep.subr.bf16.mxu0 %v1123_v22  ;;  %1590 = vmatprep.subr.bf16.mxu1 %v1123_v22  ;;  %v782_v26 = vrot.slane %v2030_v57, 1  ;;  %v796_v33 = vsel %vm772_vm2, %v794_v24, %v795_v25 }
  0x42   : > { %v2062_v51 = vsel %vm643_vm4, %v901_v6, %v905_v59  ;;  %1572 = vmatpush3.bf16.msra.mxu0 %v1123_v22  ;;  %1592 = vmatpush3.bf16.msra.mxu1 %v1123_v22 }
  0x43   : > { %872 = vrot.lane.b32.xlu1 %v2003_v30, %s1700_s15  ;;  %v685_v8 = vrot.slane %v683_v5, 1  ;;  %v784_v34 = vsel %vm772_vm2, %v782_v26, %v783_v28  ;;  %vm1302_vm2 = vcmask 519168  }
  0x44   : > { %864 = vrot.lane.b32.xlu0 %v2025_v46, %s1700_s15 }
  0x45   : > { %v686_v16 = vor.u32 %v685_v8, %v681_v7 }
  0x47   : > { %887 = vrot.lane.b32.xlu1 %v1859_v44, %s1701_s29  ;;  %v691_v23 = vsel %vm643_vm4, %v686_v16, %v690_v17 }
  0x48   : > { %879 = vrot.lane.b32.xlu0 %v1864_v45, %s1701_s29 }
  0x4b   : > { %889 = vrot.lane.b32.xlu1 %v2012_v41, %s1701_s29 }
  0x4c   : > { %881 = vrot.lane.b32.xlu0 %v2030_v57, %s1701_s29 }
  0x4f   : > { %915 = vrot.lane.b32.xlu1 %v1978_v4, %s1703_s28 }
  0x50   : > { %907 = vrot.lane.b32.xlu0 %v1975_v0, %s1703_s28 }
  0x53   : > { %917 = vrot.lane.b32.xlu1 %v739_v21, %s1703_s28 }
  0x54   : > { %909 = vrot.lane.b32.xlu0 %v691_v23, %s1703_s28 }
  0x57   : > { %935 = vrot.lane.b32.xlu1 %v2003_v30, %s1704_s16 }
  0x58   : > { %927 = vrot.lane.b32.xlu0 %v2025_v46, %s1704_s16 }
  0x5b   : > { %752 = vrot.lane.b32.xlu1 %v1978_v4, %s1698_s14 }
  0x5c   : > { %744 = vrot.lane.b32.xlu0 %v1975_v0, %s1698_s14 }
  0x5f   : > { %937 = vrot.lane.b32.xlu1 %v796_v33, %s1704_s16 }
  0x60   : > { %929 = vrot.lane.b32.xlu0 %v784_v34, %s1704_s16 }
  0x63   : > { %754 = vrot.lane.b32.xlu1 %v739_v21, %s1698_s14 }
  0x64   : > { %746 = vrot.lane.b32.xlu0 %v691_v23, %s1698_s14 }
  0x67   : > { %809 = vrot.lane.b32.xlu1 %v2003_v30, %s1697_s13 }
  0x68   : > { %801 = vrot.lane.b32.xlu0 %v2025_v46, %s1697_s13 }
  0x6b   : > { %811 = vrot.lane.b32.xlu1 %v796_v33, %s1697_s13 }
  0x6c   : > { %803 = vrot.lane.b32.xlu0 %v784_v34, %s1697_s13 }
  0x6f   : > { %826 = vrot.lane.b32.xlu1 %v2012_v41, %s1696_s19 }
  0x70   : > { %818 = vrot.lane.b32.xlu0 %v2030_v57, %s1696_s19 }
  0x73   : > { %828 = vrot.lane.b32.xlu1 %v1990_v12, %s1696_s19 }
  0x74   : > { %820 = vrot.lane.b32.xlu0 %v1875_v48, %s1696_s19 }
  0x77   : > { %854 = vrot.lane.b32.xlu1 %v739_v21, %s1699_s21 }
  0x78   : > { %846 = vrot.lane.b32.xlu0 %v691_v23, %s1699_s21 }
  0x7b   : > { %856 = vrot.lane.b32.xlu1 %v2017_v42, %s1699_s21 }
  0x7c   : > { %848 = vrot.lane.b32.xlu0 %v1914_v13, %s1699_s21 }
  0x7f   : > { %874 = vrot.lane.b32.xlu1 %v796_v33, %s1700_s15 }
  0x80   : > { %866 = vrot.lane.b32.xlu0 %v784_v34, %s1700_s15 }
  0x83   : > { %876 = vrot.lane.b32.xlu1 %v2007_v39, %s1700_s15 }
  0x84   : > { %868 = vrot.lane.b32.xlu0 %v1894_v61, %s1700_s15 }
  0x87   : > { %891 = vrot.lane.b32.xlu1 %v1990_v12, %s1701_s29 }
  0x88   : > { %883 = vrot.lane.b32.xlu0 %v1875_v48, %s1701_s29 }
  0x8b   : > { %893 = vrot.lane.b32.xlu1 %v2036_v52, %s1701_s29 }
  0x8c   : > { %885 = vrot.lane.b32.xlu0 %v1832_v32, %s1701_s29 }
  0x8f   : > { %919 = vrot.lane.b32.xlu1 %v2017_v42, %s1703_s28 }
  0x90   : > { %911 = vrot.lane.b32.xlu0 %v1914_v13, %s1703_s28 }
  0x91   : > { %v823_v0 = vpop.permute.xlu1 %822 }
  0x92   : > { %v815_v4 = vpop.permute.xlu0 %814 }
  0x93   : > { %921 = vrot.lane.b32.xlu1 %v2062_v51, %s1703_s28 }
  0x94   : > { %913 = vrot.lane.b32.xlu0 %v1959_v37, %s1703_s28 }
  0x95   : > { %v2136_v12 = vpop.permute.xlu1 %824 }
  0x96   : > { %v2140_v30 = vpop.permute.xlu0 %816 }
  0x97   : > { %939 = vrot.lane.b32.xlu1 %v2007_v39, %s1704_s16 }
  0x98   : > { %931 = vrot.lane.b32.xlu0 %v1894_v61, %s1704_s16 }
  0x99   : > { %v806_v29 = vpop.permute.xlu1 %805 }
  0x9a   : > { %v800_v35 = vpop.permute.xlu0 %799 }
  0x9b   : > { %941 = vrot.lane.b32.xlu1 %v2050_v60, %s1704_s16 }
  0x9c   : > { %933 = vrot.lane.b32.xlu0 %v1902_v1, %s1704_s16 }
  0x9d   : > { %v808_v13 = vpop.permute.xlu1 %807 }
  0x9e   : > { %v749_v38 = vpop.permute.xlu0 %748 }
  0x9f   : > { %v953_v56 = vsel %vm943_vm9, %v1875_v48, %v749_v38 }
  0xa0   : > { %v970_v60 = vsel %vm960_vm10, %v953_v56, %v806_v29 }
  0xa1   : > { %v743_v40 = vpop.permute.xlu1 %742  ;;  %v987_v2 = vsel %vm977_vm11, %v970_v60, %v823_v0 }
  0xa2   : > { %v798_v37 = vpop.permute.xlu0 %797  ;;  %v947_v11 = vsel %vm943_vm9, %v1842_v36, %v743_v40 }
  0xa3   : > { %v964_v17 = vsel %vm960_vm10, %v947_v11, %v800_v35 }
  0xa4   : > { %v981_v24 = vsel %vm977_vm11, %v964_v17, %v2140_v30 }
  0xa5   : > { %v751_v42 = vpop.permute.xlu1 %750 }
  0xa6   : > { %v843_v20 = vpop.permute.xlu0 %842  ;;  %v955_v48 = vsel %vm943_vm9, %v1832_v32, %v751_v42 }
  0xa7   : > { %v972_v19 = vsel %vm960_vm10, %v955_v48, %v808_v13 }
  0xa8   : > { %v989_v18 = vsel %vm977_vm11, %v972_v19, %v2136_v12 }
  0xa9   : > { %v851_v43 = vpop.permute.xlu1 %850 }
  0xaa   : > { %v845_v46 = vpop.permute.xlu0 %844  ;;  %v1004_v3 = vsel %vm994_vm12, %v987_v2, %v851_v43 }
  0xab   : > { %v998_v28 = vsel %vm994_vm12, %v981_v24, %v845_v46 }
  0xad   : > { %v853_v39 = vpop.permute.xlu1 %852 }
  0xae   : > { %v741_v47 = vpop.permute.xlu0 %740  ;;  %v1006_v22 = vsel %vm994_vm12, %v989_v18, %v853_v39 }
  0xaf   : > { %v945_v1 = vsel %vm943_vm9, %v1945_v27, %v741_v47 }
  0xb0   : > { %v962_v58 = vsel %vm960_vm10, %v945_v1, %v798_v37 }
  0xb1   : > { %v871_v49 = vpop.permute.xlu1 %870  ;;  %v979_v62 = vsel %vm977_vm11, %v962_v58, %v815_v4 }
  0xb2   : > { %v863_v50 = vpop.permute.xlu0 %862  ;;  %v1021_v6 = vsel %vm1011_vm13, %v1004_v3, %v871_v49  ;;  %v996_v7 = vsel %vm994_vm12, %v979_v62, %v843_v20 }
  0xb3   : > { %v1013_v31 = vsel %vm1011_vm13, %v996_v7, %v863_v50 }
  0xb5   : > { %v873_v61 = vpop.permute.xlu1 %872 }
  0xb6   : > { %v865_v52 = vpop.permute.xlu0 %864  ;;  %v1023_v23 = vsel %vm1011_vm13, %v1006_v22, %v873_v61 }
  0xb7   : > { %v1015_v0 = vsel %vm1011_vm13, %v998_v28, %v865_v52 }
  0xb9   : > { %v888_v53 = vpop.permute.xlu1 %887 }
  0xba   : > { %v880_v54 = vpop.permute.xlu0 %879  ;;  %v1038_v8 = vsel %vm1028_vm14, %v1021_v6, %v888_v53 }
  0xbb   : > { %v1030_v14 = vsel %vm1028_vm14, %v1013_v31, %v880_v54 }
  0xbd   : > { %v890_v55 = vpop.permute.xlu1 %889 }
  0xbe   : > { %v882_v5 = vpop.permute.xlu0 %881  ;;  %v1040_v25 = vsel %vm1028_vm14, %v1023_v23, %v890_v55 }
  0xbf   : > { %v1032_v12 = vsel %vm1028_vm14, %v1015_v0, %v882_v5 }
  0xc1   : > { %v916_v59 = vpop.permute.xlu1 %915 }
  0xc2   : > { %v908_v63 = vpop.permute.xlu0 %907  ;;  %v1055_v51 = vsel %vm1045_vm15, %v1038_v8, %v916_v59 }
  0xc3   : > { %v1047_v15 = vsel %vm1045_vm15, %v1030_v14, %v908_v63 }
  0xc5   : > { %v918_v27 = vpop.permute.xlu1 %917 }
  0xc6   : > { %v910_v9 = vpop.permute.xlu0 %909  ;;  %v1057_v33 = vsel %vm1045_vm15, %v1040_v25, %v918_v27 }
  0xc7   : > { %v1049_v29 = vsel %vm1045_vm15, %v1032_v12, %v910_v9 }
  0xc9   : > { %v936_v10 = vpop.permute.xlu1 %935 }
  0xca   : > { %v1072_v32 = vsel %vm1062_vm0, %v1055_v51, %v936_v10  ;;  %v928_v16 = vpop.permute.xlu0 %927 }
  0xcb   : > { %1581 = vmatprep.mubr.msk.bf16.mxu1 %vm1101_vm1, %v1072_v32  ;;  %v1064_v36 = vsel %vm1062_vm0, %v1047_v15, %v928_v16 }
  0xcc   : > { %1573 = vmatprep.mubr.msk.bf16.mxu0 %vm1101_vm1, %v1064_v36 }
  0xcd   : > { %v753_v21 = vpop.permute.xlu1 %752 }
  0xce   : > { %v745_v26 = vpop.permute.xlu0 %744  ;;  %v957_v62 = vsel %vm943_vm9, %v1859_v44, %v753_v21 }
  0xcf   : > { %v949_v48 = vsel %vm943_vm9, %v1864_v45, %v745_v26 }
  0xd1   : > { %v938_v34 = vpop.permute.xlu1 %937 }
  0xd2   : > { %v1074_v4 = vsel %vm1062_vm0, %v1057_v33, %v938_v34  ;;  %v930_v35 = vpop.permute.xlu0 %929 }
  0xd3   : > { %1582 = vmatmul.mubr.msk.bf16.vlgmr.msra.gmra.mrb[0].mxu1 %vm1101_vm1, %v1074_v4  ;;  %v1066_v30 = vsel %vm1062_vm0, %v1049_v29, %v930_v35  ;;  %v2235_v35 = vld [vmem:[%s2312_s5] ss:$0 sm:$0xff] }
  0xd4   : > { %1574 = vmatmul.mubr.msk.bf16.vlgmr.msra.gmra.mrb[0].mxu0 %vm1101_vm1, %v1066_v30 }
  0xd5   : > { %v755_v13 = vpop.permute.xlu1 %754 }
  0xd6   : > { %v747_v38 = vpop.permute.xlu0 %746  ;;  %v959_v7 = vsel %vm943_vm9, %v2012_v41, %v755_v13 }
  0xd7   : > { %v951_v41 = vsel %vm943_vm9, %v2030_v57, %v747_v38 }
  0xd9   : > { %v810_v40 = vpop.permute.xlu1 %809 }
  0xda   : > { %v802_v37 = vpop.permute.xlu0 %801  ;;  %v974_v63 = vsel %vm960_vm10, %v957_v62, %v810_v40 }
  0xdb   : > { %v966_v8 = vsel %vm960_vm10, %v949_v48, %v802_v37 }
  0xdd   : > { %v812_v42 = vpop.permute.xlu1 %811 }
  0xde   : > { %v804_v20 = vpop.permute.xlu0 %803  ;;  %v976_v44 = vsel %vm960_vm10, %v959_v7, %v812_v42 }
  0xdf   : > { %v968_v17 = vsel %vm960_vm10, %v951_v41, %v804_v20 }
  0xe1   : > { %v827_v43 = vpop.permute.xlu1 %826 }
  0xe2   : > { %v819_v46 = vpop.permute.xlu0 %818  ;;  %v991_v27 = vsel %vm977_vm11, %v974_v63, %v827_v43 }
  0xe3   : > { %v983_v51 = vsel %vm977_vm11, %v966_v8, %v819_v46 }
  0xe5   : > { %v829_v39 = vpop.permute.xlu1 %828 }
  0xe6   : > { %v821_v47 = vpop.permute.xlu0 %820  ;;  %v993_v19 = vsel %vm977_vm11, %v976_v44, %v829_v39 }
  0xe7   : > { %v985_v21 = vsel %vm977_vm11, %v968_v17, %v821_v47 }
  0xe9   : > { %v855_v49 = vpop.permute.xlu1 %854 }
  0xea   : > { %v847_v50 = vpop.permute.xlu0 %846  ;;  %v1008_v6 = vsel %vm994_vm12, %v991_v27, %v855_v49 }
  0xeb   : > { %v1000_v45 = vsel %vm994_vm12, %v983_v51, %v847_v50 }
  0xed   : > { %v857_v61 = vpop.permute.xlu1 %856 }
  0xee   : > { %v849_v52 = vpop.permute.xlu0 %848  ;;  %v1010_v14 = vsel %vm994_vm12, %v993_v19, %v857_v61 }
  0xef   : > { %v1002_v24 = vsel %vm994_vm12, %v985_v21, %v849_v52 }
  0xf1   : > { %v875_v53 = vpop.permute.xlu1 %874 }
  0xf2   : > { %v867_v54 = vpop.permute.xlu0 %866  ;;  %v1025_v9 = vsel %vm1011_vm13, %v1008_v6, %v875_v53 }
  0xf3   : > { %v1017_v15 = vsel %vm1011_vm13, %v1000_v45, %v867_v54 }
  0xf5   : > { %v877_v55 = vpop.permute.xlu1 %876 }
  0xf6   : > { %v869_v1 = vpop.permute.xlu0 %868  ;;  %v1027_v18 = vsel %vm1011_vm13, %v1010_v14, %v877_v55 }
  0xf7   : > { %v1019_v33 = vsel %vm1011_vm13, %v1002_v24, %v869_v1 }
  0xf9   : > { %v892_v56 = vpop.permute.xlu1 %891 }
  0xfa   : > { %v884_v5 = vpop.permute.xlu0 %883  ;;  %v1042_v10 = vsel %vm1028_vm14, %v1025_v9, %v892_v56 }
  0xfb   : > { %v1034_v36 = vsel %vm1028_vm14, %v1017_v15, %v884_v5 }
  0xfd   : > { %v894_v58 = vpop.permute.xlu1 %893 }
  0xfe   : > { %v886_v59 = vpop.permute.xlu0 %885  ;;  %v1044_v22 = vsel %vm1028_vm14, %v1027_v18, %v894_v58 }
  0xff   : > { %v1036_v0 = vsel %vm1028_vm14, %v1019_v33, %v886_v59 }
 0x101   : > { %v920_v60 = vpop.permute.xlu1 %919 }
 0x102   : > { %v912_v2 = vpop.permute.xlu0 %911  ;;  %v1059_v31 = vsel %vm1045_vm15, %v1042_v10, %v920_v60 }
 0x103   : > { %v1051_v57 = vsel %vm1045_vm15, %v1034_v36, %v912_v2 }
 0x105   : > { %v922_v3 = vpop.permute.xlu1 %921 }
 0x106   : > { %v914_v11 = vpop.permute.xlu0 %913  ;;  %v1061_v25 = vsel %vm1045_vm15, %v1044_v22, %v922_v3 }
 0x107   : > { %v1053_v4 = vsel %vm1045_vm15, %v1036_v0, %v914_v11 }
 0x109   : > { %v940_v32 = vpop.permute.xlu1 %939 }
 0x10a   : > { %v1076_v16 = vsel %vm1062_vm0, %v1059_v31, %v940_v32  ;;  %v932_v23 = vpop.permute.xlu0 %931 }
 0x10b   : > { %1585 = vmatprep.mubr.msk.bf16.mxu1 %vm1101_vm1, %v1076_v16  ;;  %v1068_v26 = vsel %vm1062_vm0, %v1051_v57, %v932_v23 }
 0x10c   : > { %1577 = vmatprep.mubr.msk.bf16.mxu0 %vm1101_vm1, %v1068_v26 }
 0x10d   : > { %v942_v28 = vpop.permute.xlu1 %941 }
 0x10e   : > { %v1078_v34 = vsel %vm1062_vm0, %v1061_v25, %v942_v28  ;;  %v934_v12 = vpop.permute.xlu0 %933 }
 0x10f   : > { %1586 = vmatmul.mubr.msk.bf16.gmra.mrb[4].mxu1 %vm1101_vm1, %v1078_v34  ;;  %v1070_v29 = vsel %vm1062_vm0, %v1053_v4, %v934_v12 }
 0x110   : > { %1578 = vmatmul.mubr.msk.bf16.gmra.mrb[4].mxu0 %vm1101_vm1, %v1070_v29 }
 0x1a6   : > { %v1583_v30 = vpop.f32.mrb[0].mxu1 }
 0x1a7   : > { %v1200_v13 = vadd.f32 %v1583_v30, %v2235_v35  ;;  %v1191_v38 = vpop.f32.mrb[1].mxu1  ;;  %v1575_v42 = vpop.f32.mrb[0].mxu0 }
 0x1a8   : > { %v1192_v40 = vadd.f32 %v2235_v35, %v1191_v38  ;;  %v1584_v37 = vpop.f32.mrb[2].mxu1  ;;  %v1168_v39 = vadd.f32 %v1575_v42, %v2235_v35  ;;  %v1159_v47 = vpop.f32.mrb[1].mxu0 }
 0x1a9   : > { %v1232_v20 = vmax.f32 %v1200_v13, 0.0  ;;  %v1203_v43 = vadd.f32 %v1584_v37, %v2235_v35  ;;  %v1194_v46 = vpop.f32.mrb[3].mxu1  ;;  %v1160_v52 = vadd.f32 %v2235_v35, %v1159_v47  ;;  %v1576_v53 = vpop.f32.mrb[2].mxu0 }
 0x1aa   : > { %v1230_v49 = vmax.f32 %v1192_v40, 0.0  ;;  %v1195_v50 = vadd.f32 %v2235_v35, %v1194_v46  ;;  %v1224_v55 = vmax.f32 %v1168_v39, 0.0  ;;  %v1171_v56 = vadd.f32 %v1576_v53, %v2235_v35  ;;  %v1162_v5 = vpop.f32.mrb[3].mxu0 }
 0x1ab   : > { %v1553_v61 = vpack.c.bf16 %v1232_v20, %v1232_v20  ;;  %v1233_v54 = vmax.f32 %v1203_v43, 0.0  ;;  %v1222_v59 = vmax.f32 %v1160_v52, 0.0  ;;  %v1163_v62 = vadd.f32 %v2235_v35, %v1162_v5 }
 0x1ac   : > { %v1551_v1 = vpack.c.bf16 %v1230_v49, %v1230_v49  ;;  %v1231_v58 = vmax.f32 %v1195_v50, 0.0  ;;  %v1545_v63 = vpack.c.bf16 %v1224_v55, %v1224_v55  ;;  %v1225_v2 = vmax.f32 %v1171_v56, 0.0 }
 0x1ad   : > { %1313 = vst.msk [vmem:[%s2245_s30 + $0x28] sm:$0xf] %vm1302_vm2, %v1553_v61  ;;  %v1554_v60 = vpack.c.bf16 %v1233_v54, %v1233_v54  ;;  %v1543_v3 = vpack.c.bf16 %v1222_v59, %v1222_v59  ;;  %v1223_v48 = vmax.f32 %v1163_v62, 0.0 }
 0x1ae   : > { %1311 = vst.msk [vmem:[%s2245_s30 + $0x20] sm:$0xf] %vm1302_vm2, %v1551_v1  ;;  %v1552_v27 = vpack.c.bf16 %v1231_v58, %v1231_v58  ;;  %1305 = vst.msk [vmem:[%s2245_s30 + $0x8] sm:$0xf] %vm1302_vm2, %v1545_v63  ;;  %v1546_v6 = vpack.c.bf16 %v1225_v2, %v1225_v2 }
 0x1af   : > { %1314 = vst.msk [vmem:[%s2245_s30 + $0x2c] sm:$0xf] %vm1302_vm2, %v1554_v60  ;;  %1303 = vst.msk [vmem:[%s2245_s30] sm:$0xf] %vm1302_vm2, %v1543_v3  ;;  %v1544_v7 = vpack.c.bf16 %v1223_v48, %v1223_v48 }
 0x1b0   : > { %1312 = vst.msk [vmem:[%s2245_s30 + $0x24] sm:$0xf] %vm1302_vm2, %v1552_v27  ;;  %1306 = vst.msk [vmem:[%s2245_s30 + $0xc] sm:$0xf] %vm1302_vm2, %v1546_v6 }
 0x1b1   : > { %1304 = vst.msk [vmem:[%s2245_s30 + $0x4] sm:$0xf] %vm1302_vm2, %v1544_v7 }
 0x1e2   : > { %v1587_v8 = vpop.f32.mrb[4].mxu1 }
 0x1e3   : > { %v1216_v9 = vadd.f32 %v1587_v8, %v2235_v35  ;;  %v1207_v44 = vpop.f32.mrb[5].mxu1  ;;  %v1579_v11 = vpop.f32.mrb[4].mxu0 }
 0x1e4   : > { %v1208_v51 = vadd.f32 %v2235_v35, %v1207_v44  ;;  %v1588_v10 = vpop.f32.mrb[6].mxu1  ;;  %v1184_v32 = vadd.f32 %v1579_v11, %v2235_v35  ;;  %v1175_v41 = vpop.f32.mrb[5].mxu0 }
 0x1e5   : > { %v1236_v19 = vmax.f32 %v1216_v9, 0.0  ;;  %v1219_v45 = vadd.f32 %v1588_v10, %v2235_v35  ;;  %v1210_v31 = vpop.f32.mrb[7].mxu1  ;;  %v1176_v17 = vadd.f32 %v2235_v35, %v1175_v41  ;;  %v1580_v18 = vpop.f32.mrb[6].mxu0 }
 0x1e6   : > { %v1234_v14 = vmax.f32 %v1208_v51, 0.0  ;;  %v1211_v15 = vadd.f32 %v2235_v35, %v1210_v31  ;;  %v1228_v21 = vmax.f32 %v1184_v32, 0.0  ;;  %v1187_v57 = vadd.f32 %v1580_v18, %v2235_v35  ;;  %v1178_v23 = vpop.f32.mrb[7].mxu0 }
 0x1e7   : > { %v1557_v16 = vpack.c.bf16 %v1236_v19, %v1236_v19  ;;  %v1237_v36 = vmax.f32 %v1219_v45, 0.0  ;;  %v1226_v25 = vmax.f32 %v1176_v17, 0.0  ;;  %v1179_v28 = vadd.f32 %v2235_v35, %v1178_v23 }
 0x1e8   : > { %v1555_v22 = vpack.c.bf16 %v1234_v14, %v1234_v14  ;;  %v1235_v24 = vmax.f32 %v1211_v15, 0.0  ;;  %v1549_v33 = vpack.c.bf16 %v1228_v21, %v1228_v21  ;;  %v1229_v34 = vmax.f32 %v1187_v57, 0.0 }
 0x1e9   : > { %1317 = vst.msk [vmem:[%s2245_s30 + $0x38] sm:$0xf] %vm1302_vm2, %v1557_v16  ;;  %v1558_v26 = vpack.c.bf16 %v1237_v36, %v1237_v36  ;;  %v1547_v4 = vpack.c.bf16 %v1226_v25, %v1226_v25  ;;  %v1227_v12 = vmax.f32 %v1179_v28, 0.0 }
 0x1ea   : > { %1315 = vst.msk [vmem:[%s2245_s30 + $0x30] sm:$0xf] %vm1302_vm2, %v1555_v22  ;;  %v1556_v0 = vpack.c.bf16 %v1235_v24, %v1235_v24  ;;  %1309 = vst.msk [vmem:[%s2245_s30 + $0x18] sm:$0xf] %vm1302_vm2, %v1549_v33  ;;  %v1550_v29 = vpack.c.bf16 %v1229_v34, %v1229_v34 }
 0x1eb   : > { %1318 = vst.msk [vmem:[%s2245_s30 + $0x3c] sm:$0xf] %vm1302_vm2, %v1558_v26  ;;  %1307 = vst.msk [vmem:[%s2245_s30 + $0x10] sm:$0xf] %vm1302_vm2, %v1547_v4  ;;  %v1548_v30 = vpack.c.bf16 %v1227_v12, %v1227_v12 }
 0x1ec   : > { %1316 = vst.msk [vmem:[%s2245_s30 + $0x34] sm:$0xf] %vm1302_vm2, %v1556_v0  ;;  %1310 = vst.msk [vmem:[%s2245_s30 + $0x1c] sm:$0xf] %vm1302_vm2, %v1550_v29 }
 0x1ed   : > { %1308 = vst.msk [vmem:[%s2245_s30 + $0x14] sm:$0xf] %vm1302_vm2, %v1548_v30 }
 0x1ee PF: > { %s16_s25 = sadd.s32 1, %s1693_s25   ;;  %s2317_s21 = smov %s1685_s23 }
 0x1ef   : > { %p13_p12 = scmp.ge.s32.totalorder %s16_s25, 10   ;;  %s2318_s22 = smov %s1689_s24 }
 0x1f0   : > { %s2319_s23 = smov %s2322_s26  ;;  %s2320_s24 = smov %s2326_s27 }
 0x1f1   :  { %15 = sbr.rel (!%p13_p12) target bundleno = 3 (0x3), region = 80 }

// kernel: _lambda_.7
= control target key start
LH: loop header
LB: loop body
LE: loop exit
PB: predicated region body
PF: predicated region fallthrough
CT: control target
= control target key end

     0   :  { %s1737_s21 = smov 0   ;;  %s1739_s0 = smov 0   ;;  %s2137_s0 = inlined_call_operand.vmem [shape: bf16[4,8,8,64], index: 0, kind: input, shape index: {}, may-alias: {0,1,2}]   ;;  %s2138_s1 = inlined_call_operand.vmem [shape: bf16[4,8,8,64], index: 1, kind: input, shape index: {}, may-alias: {0,1,2}]   ;;  %s2139_s2 = inlined_call_operand.vmem [shape: bf16[4,8,8,64], index: 2, kind: input, shape index: {}, may-alias: {0,1,2}]   ;;  %s2140_s3 = inlined_call_operand.vmem [shape: bf16[1,64], index: 3, kind: input, shape index: {}]   ;;  %s2141_s4 = inlined_call_operand.vmem [shape: bf16[3,192,128], index: 4, kind: input, shape index: {}]   ;;  %s2142_s5 = inlined_call_operand.vmem [shape: f32[1,128], index: 5, kind: input, shape index: {}]   ;;  %s2143_s6 = inlined_call_operand.vmem [shape: bf16[4,8,8,128], index: 6, kind: output, shape index: {}]  }
   0x1   :  { %s1741_s22 = smov 0  }
   0x2 LB: > { %s28_s2 = sadd.s32 1, %s1693_s0  ;;  %p1434_p0 = scmp.ge.s32.totalorder %s1697_s22, 1  ;;  %s1697_s22 = sphi %s1741_s22, %s16_s22   ;;  %s1693_s0 = sphi %s1739_s0, %s2149_s0   ;;  %s1689_s21 = sphi %s1737_s21, %s2148_s21  }
   0x3   : > { %p30_p1 = scmp.ge.s32.totalorder %s28_s2, 4  ;;  %p295_p2 = scmp.lt.s32.totalorder %s1697_s22, 5 }
   0x5   : > { %s2151_s2 = smov (%p30_p1, %s28_s2), 0  ;;  %p296_p3 = pnand %p1434_p0, %p295_p2 }
   0x6   : > { %v1758_v0 = vld [vmem:[%s2140_s3] sm:$0x1] (!%p296_p3)  ;;  %v415_v1 = vlaneseq (!%p296_p3)  ;;  %v1699_v2 = vmov (!%p296_p3), 1966171168   ;;  %vm534_vm0 = vcmask (!%p296_p3), 1040384   ;;  %p374_p4 = scmp.lt.s32.totalorder (!%p296_p3), %s1689_s21, 3 }
   0x7   : > { %299 = sbr.rel (%p296_p3) target bundleno = 433 (0x1b1), region = 44  ;;  %v516_v3 = vunpack.c.l.s4 (!%p296_p3), %v1699_v2  ;;  %vm535_vm1 = vsmask.f32 (!%p296_p3), 256  ;;  %v413_v4 = vpack.i.b16 (!%p296_p3), %v1758_v0, %v1758_v0  ;;  %vm548_vm2 = vsmask.f32 (!%p296_p3), 4352  ;;  %v1639_v8 = vld [vmem:[%s2141_s4 + $0x60] sm:$0xff] (!%p296_p3)  }
   0x8   : > { %v416_v5 = vshrl.u32 (!%p296_p3), %v415_v1, 7  ;;  %v1700_v7 = vmov (!%p296_p3), 0   ;;  %v1640_v10 = vld [vmem:[%s2141_s4] sm:$0xff] (!%p296_p3)   ;;  %v1641_v12 = vld [vmem:[%s2141_s4 + $0x68] sm:$0xff] (!%p296_p3)   ;;  %vm547_vm3 = vcmask (!%p296_p3), 1044480   ;;  %v1643_v29 = vld [vmem:[%s2141_s4 + $0x70] sm:$0xff] (!%p296_p3)  }
   0x9   : > { %v517_v6 = vunpack.c.0.s8 (!%p296_p3), %v516_v3  ;;  %850 = vmatprep.subr.bf16.mxu0 (!%p296_p3), %v1700_v7  ;;  %1011 = vmatprep.subr.bf16.mxu1 (!%p296_p3), %v1700_v7  ;;  %v1642_v14 = vld [vmem:[%s2141_s4 + $0x8] sm:$0xff] (!%p296_p3)   ;;  %vm1800_vm4 = vmand (!%p296_p3), %vm534_vm0, %vm535_vm1  ;;  %v1644_v52 = vld [vmem:[%s2141_s4 + $0x10] sm:$0xff] (!%p296_p3)   ;;  %s1701_s27 = smov (!%p296_p3), 64   ;;  %vm648_vm6 = vcmask (!%p296_p3), 523264  }
   0xa   : > { %v417_v9 = vsub.s32 (!%p296_p3), 0, %v416_v5  ;;  %851 = vmatpush1.bf16.msra.mxu0 (!%p296_p3), %v1639_v8  ;;  %1012 = vmatpush1.bf16.msra.mxu1 (!%p296_p3), %v1640_v10  ;;  %vm1807_vm5 = vmand (!%p296_p3), %vm547_vm3, %vm548_vm2  ;;  %v1645_v57 = vld [vmem:[%s2141_s4 + $0x78] sm:$0xff] (!%p296_p3)  }
   0xb   : > { %v520_v11 = vsub.s32 (!%p296_p3), %v517_v6, %v416_v5  ;;  %852 = vmatprep.subr.bf16.mxu0 (!%p296_p3), %v1700_v7  ;;  %1013 = vmatprep.subr.bf16.mxu1 (!%p296_p3), %v1700_v7  ;;  %v1646_v63 = vld [vmem:[%s2141_s4 + $0x18] sm:$0xff] (!%p296_p3)  }
   0xc   : > { %v418_v13 = vrot.slane (!%p296_p3), %v413_v4, %v417_v9 }
   0xd   : > { %v521_v15 = vrot.slane (!%p296_p3), %v1758_v0, %v520_v11 }
   0xe   : > { %s2153_s21 = smov (!%p374_p4, %s1689_s21), 3  ;;  %v435_v19 = vshrl.u32 %v418_v13, 16  ;;  %v438_v20 = vshll.u32 %v418_v13, 16  ;;  %853 = vmatpush1.bf16.msra.mxu0 %v1641_v12  ;;  %1014 = vmatpush1.bf16.msra.mxu1 %v1642_v14 }
   0xf   : > { %s1561_s29 = sshll.u32 %s2153_s21, 5  ;;  %v528_v24 = vrot.slane %v521_v15, %v520_v11  ;;  %854 = vmatprep.subr.bf16.mxu0 %v1700_v7  ;;  %1015 = vmatprep.subr.bf16.mxu1 %v1700_v7 }
  0x10   : > { %s1781_s10 = scalar_lea.vmem %s2138_s1, %s1561_s29  ;;  %v437_v30 = vrot.slane %v435_v19, 7  ;;  %s407_s19 = scalar_lea.vmem %s2143_s6, %s1561_s29 }
  0x11   : > { %v427_v16 = vld [vmem:[%s1781_s10 + $0x4] sm:$0xf]  ;;  %v428_v17 = vld [vmem:[%s1781_s10 + $0x8] sm:$0xf]  ;;  %v426_v18 = vld [vmem:[%s1781_s10] sm:$0xf] }
  0x12   : > { %v449_v21 = vshrl.u32 %v427_v16, 16  ;;  %v452_v22 = vshll.u32 %v427_v16, 16  ;;  %v429_v23 = vld [vmem:[%s1781_s10 + $0xc] sm:$0xf]  ;;  %v456_v25 = vshrl.u32 %v428_v17, 16  ;;  %v459_v26 = vshll.u32 %v428_v17, 16  ;;  %855 = vmatpush1.bf16.msra.mxu0 %v1643_v29  ;;  %1016 = vmatpush1.bf16.msra.mxu1 %v1644_v52 }
  0x13   : > { %v442_v27 = vshrl.u32 %v426_v18, 16  ;;  %v430_v28 = vld [vmem:[%s1781_s10 + $0x10] sm:$0xf]  ;;  %v445_v32 = vshll.u32 %v426_v18, 16  ;;  %v463_v33 = vshrl.u32 %v429_v23, 16  ;;  %v530_v34 = vshll.u32 %v528_v24, 16  ;;  %856 = vmatprep.subr.bf16.mxu0 %v1700_v7  ;;  %1017 = vmatprep.subr.bf16.mxu1 %v1700_v7 }
  0x14   : > { %v451_v31 = vrot.slane %v449_v21, 7  ;;  %v458_v36 = vrot.slane %v456_v25, 7  ;;  %v466_v38 = vshll.u32 %v429_v23, 16  ;;  %v440_v39 = vor.u32 %v438_v20, %v437_v30  ;;  %v431_v62 = vld [vmem:[%s1781_s10 + $0x14] sm:$0xf]  ;;  %v1647_v16 = vld [vmem:[%s2141_s4 + $0x80] sm:$0xff]  }
  0x15   : > { %v444_v37 = vrot.slane %v442_v27, 7  ;;  %v465_v42 = vrot.slane %v463_v33, 7  ;;  %v470_v43 = vshrl.u32 %v430_v28, 16  ;;  %v1811_v44 = vrot.slane %v530_v34, 4  ;;  %v432_v10 = vld [vmem:[%s1781_s10 + $0x18] sm:$0xf] }
  0x16   : > { %v454_v41 = vor.u32 %v452_v22, %v451_v31  ;;  %v461_v45 = vor.u32 %v459_v26, %v458_v36  ;;  %v473_v47 = vshll.u32 %v430_v28, 16  ;;  %v537_v48 = vsel %vm1800_vm4, %v1758_v0, %v440_v39  ;;  %857 = vmatpush1.bf16.msra.mxu0 %v1645_v57  ;;  %v433_v15 = vld [vmem:[%s1781_s10 + $0x1c] sm:$0xf]  ;;  %v1648_v17 = vld [vmem:[%s2141_s4 + $0x20] sm:$0xff]   ;;  %1018 = vmatpush1.bf16.msra.mxu1 %v1646_v63  ;;  %v1649_v30 = vld [vmem:[%s2141_s4 + $0x88] sm:$0xff]  }
  0x17   : > { %v447_v46 = vor.u32 %v445_v32, %v444_v37  ;;  %v468_v50 = vor.u32 %v466_v38, %v465_v42  ;;  %v472_v51 = vrot.slane %v470_v43, 7  ;;  %v1826_v53 = vsel %vm1807_vm5, %v537_v48, %v1811_v44  ;;  %858 = vmatprep.subr.bf16.mxu0 %v1700_v7  ;;  %1019 = vmatprep.subr.bf16.mxu1 %v1700_v7  ;;  %v1650_v36 = vld [vmem:[%s2141_s4 + $0x28] sm:$0xff]   ;;  %v1652_v57 = vld [vmem:[%s2141_s4 + $0x30] sm:$0xff]  }
  0x18   : > { %v539_v49 = vsel %vm1800_vm4, %v1758_v0, %v454_v41  ;;  %v540_v55 = vsel %vm1800_vm4, %v1758_v0, %v461_v45  ;;  %v561_v58 = vshrl.u32 %v1826_v53, 16  ;;  %v563_v59 = vshll.u32 %v1826_v53, 16 }
  0x19   : > { %v1831_v54 = vsel %vm1807_vm5, %v539_v49, %v1811_v44  ;;  %v538_v56 = vsel %vm1800_vm4, %v1758_v0, %v447_v46  ;;  %v1853_v1 = vsel %vm1807_vm5, %v540_v55, %v1811_v44  ;;  %v541_v3 = vsel %vm1800_vm4, %v1758_v0, %v468_v50 }
  0x1a   : > { %v575_v60 = vshrl.u32 %v1831_v54, 16  ;;  %v577_v61 = vshll.u32 %v1831_v54, 16  ;;  %v1858_v2 = vsel %vm1807_vm5, %v538_v56, %v1811_v44  ;;  %v475_v4 = vor.u32 %v473_v47, %v472_v51  ;;  %859 = vmatpush1.bf16.msra.mxu0 %v1647_v16  ;;  %1020 = vmatpush1.bf16.msra.mxu1 %v1648_v17  ;;  %v1651_v51 = vld [vmem:[%s2141_s4 + $0x90] sm:$0xff]   ;;  %v1656_v17 = vld [vmem:[%s2141_s4 + $0x40] sm:$0xff]  }
  0x1b   : > { %v565_v5 = vrot.slane %v563_v59, 1  ;;  %v582_v8 = vshrl.u32 %v1853_v1, 16  ;;  %v584_v9 = vshll.u32 %v1853_v1, 16  ;;  %v568_v11 = vshrl.u32 %v1858_v2, 16  ;;  %860 = vmatprep.subr.bf16.mxu0 %v1700_v7  ;;  %1021 = vmatprep.subr.bf16.mxu1 %v1700_v7 }
  0x1c   : > { %v579_v6 = vrot.slane %v577_v61, 1  ;;  %v570_v12 = vshll.u32 %v1858_v2, 16  ;;  %v1872_v13 = vsel %vm1807_vm5, %v541_v3, %v1811_v44  ;;  %v542_v14 = vsel %vm1800_vm4, %v1758_v0, %v475_v4  ;;  %v1653_v61 = vld [vmem:[%s2141_s4 + $0x98] sm:$0xff]  }
  0x1d   : > { %v1885_v18 = vor.u32 %v565_v5, %v561_v58  ;;  %v586_v20 = vrot.slane %v584_v9, 1  ;;  %v589_v21 = vshrl.u32 %v1872_v13, 16  ;;  %v591_v23 = vshll.u32 %v1872_v13, 16 }
  0x1e   : > { %v580_v19 = vor.u32 %v579_v6, %v575_v60  ;;  %v572_v22 = vrot.slane %v570_v12, 1  ;;  %v1892_v24 = vsel %vm1807_vm5, %v542_v14, %v1811_v44  ;;  %v477_v25 = vshrl.u32 %v431_v62, 16  ;;  %861 = vmatpush1.bf16.msra.mxu0 %v1649_v30  ;;  %1022 = vmatpush1.bf16.msra.mxu1 %v1650_v36 }
  0x1f   : > { %616 = vrot.lane.b32.xlu0 %v1885_v18, %s1701_s27  ;;  %v587_v26 = vor.u32 %v586_v20, %v582_v8  ;;  %v596_v27 = vshrl.u32 %v1892_v24, 16  ;;  %v598_v28 = vshll.u32 %v1892_v24, 16  ;;  %v480_v29 = vshll.u32 %v431_v62, 16  ;;  %862 = vmatprep.subr.bf16.mxu0 %v1700_v7  ;;  %v1658_v20 = vld [vmem:[%s2141_s4 + $0x48] sm:$0xff]  }
  0x20   : > { %620 = vrot.lane.b32.xlu1 %v580_v19, %s1701_s27  ;;  %v573_v31 = vor.u32 %v572_v22, %v568_v11  ;;  %v593_v32 = vrot.slane %v591_v23, 1  ;;  %v479_v33 = vrot.slane %v477_v25, 7  ;;  %v484_v34 = vshrl.u32 %v432_v10, 16  ;;  %1023 = vmatprep.subr.bf16.mxu1 %v1700_v7  ;;  %v1657_v19 = vld [vmem:[%s2141_s4 + $0xa8] sm:$0xff]   ;;  %v1660_v22 = vld [vmem:[%s2141_s4 + $0x50] sm:$0xff]   ;;  %v1662_v23 = vld [vmem:[%s2141_s4 + $0x58] sm:$0xff]  }
  0x21   : > { %v600_v37 = vrot.slane %v598_v28, 1  ;;  %v487_v38 = vshll.u32 %v432_v10, 16  ;;  %v491_v39 = vshrl.u32 %v433_v15, 16  ;;  %v494_v41 = vshll.u32 %v433_v15, 16  ;;  %v1654_v10 = vld [vmem:[%s2141_s4 + $0x38] sm:$0xff]   ;;  %v1655_v15 = vld [vmem:[%s2141_s4 + $0xa0] sm:$0xff]  }
  0x22   : > { %v482_v42 = vor.u32 %v480_v29, %v479_v33  ;;  %v486_v43 = vrot.slane %v484_v34, 7  ;;  %v594_v45 = vor.u32 %v593_v32, %v589_v21  ;;  %v641_v48 = vrot.slane %v1858_v2, 1  ;;  %863 = vmatpush1.bf16.msra.mxu0 %v1651_v51  ;;  %1024 = vmatpush1.bf16.msra.mxu1 %v1652_v57  ;;  %v1659_v21 = vld [vmem:[%s2141_s4 + $0xb0] sm:$0xff]   ;;  %v1663_v33 = vld [vmem:[%s2141_s4 + $0xc0] sm:$0xff]   ;;  %v1666_v51 = vld [vmem:[%s2141_s4 + $0xd8] sm:$0xff]  }
  0x23   : > { %618 = vrot.lane.b32.xlu0 %v573_v31, %s1701_s27  ;;  %v601_v46 = vor.u32 %v600_v37, %v596_v27  ;;  %v493_v47 = vrot.slane %v491_v39, 7  ;;  %v642_v52 = vrot.slane %v1831_v54, 1  ;;  %v640_v4 = vrot.slane %v1826_v53, 1  ;;  %864 = vmatprep.subr.bf16.mxu0 %v1700_v7 }
  0x24   : > { %622 = vrot.lane.b32.xlu1 %v587_v26, %s1701_s27  ;;  %v543_v49 = vsel %vm1800_vm4, %v1758_v0, %v482_v42  ;;  %v489_v50 = vor.u32 %v487_v38, %v486_v43  ;;  %1025 = vmatprep.subr.bf16.mxu1 %v1700_v7  ;;  %v643_v28 = vrot.slane %v1853_v1, 1  ;;  %v644_v29 = vrot.slane %v1872_v13, 1 }
  0x25   : > { %v1921_v55 = vsel %vm1807_vm5, %v543_v49, %v1811_v44  ;;  %v496_v56 = vor.u32 %v494_v41, %v493_v47  ;;  %v1468_v62 = vcombine.low %v641_v48, %v642_v52  ;;  %v1492_v11 = vcombine.low %v640_v4, %v641_v48 }
  0x26   : > { %v603_v58 = vshrl.u32 %v1921_v55, 16  ;;  %v605_v59 = vshll.u32 %v1921_v55, 16  ;;  %v544_v60 = vsel %vm1800_vm4, %v1758_v0, %v489_v50  ;;  %865 = vmatpush1.bf16.msra.mxu0 %v1653_v61  ;;  %1026 = vmatpush1.bf16.msra.mxu1 %v1654_v10  ;;  %v2019_v37 = vcombine.low %v642_v52, %v643_v28 }
  0x27   : > { %624 = vrot.lane.b32.xlu0 %v594_v45, %s1701_s27  ;;  %v1943_v63 = vsel %vm1807_vm5, %v544_v60, %v1811_v44  ;;  %v545_v3 = vsel %vm1800_vm4, %v1758_v0, %v496_v56  ;;  %1487 = vmatprep.mubr.msk.bf16.mxu0 %vm648_vm6, %v1468_v62  ;;  %v1470_v38 = vcombine.low %v643_v28, %v644_v29  ;;  %v645_v43 = vrot.slane %v1892_v24, 1 }
  0x28   : > { %626 = vrot.lane.b32.xlu1 %v601_v46, %s1701_s27  ;;  %v607_v5 = vrot.slane %v605_v59, 1  ;;  %v610_v6 = vshrl.u32 %v1943_v63, 16  ;;  %v612_v8 = vshll.u32 %v1943_v63, 16  ;;  %v1954_v9 = vsel %vm1807_vm5, %v545_v3, %v1811_v44  ;;  %1511 = vmatprep.mubr.msk.bf16.mxu1 %vm648_vm6, %v1492_v11  ;;  %v1672_v11 = vld [vmem:[%s2141_s4 + $0x108] sm:$0xff]  }
  0x29   : > { %v714_v0 = vshrl.u32 %v1954_v9, 16  ;;  %v716_v35 = vshll.u32 %v1954_v9, 16  ;;  %866 = vmatprep.subr.bf16.mxu0 %v1700_v7  ;;  %1027 = vmatprep.subr.bf16.mxu1 %v1700_v7  ;;  %v646_v45 = vrot.slane %v1921_v55, 1  ;;  %v2042_v49 = vcombine.low %v644_v29, %v645_v43 }
  0x2a   : > { %v608_v40 = vor.u32 %v607_v5, %v603_v58  ;;  %v614_v44 = vrot.slane %v612_v8, 1  ;;  %867 = vmatpush1.bf16.msra.mxu0 %v1655_v15  ;;  %1028 = vmatpush1.bf16.msra.mxu1 %v1656_v17  ;;  %v723_v57 = vrot.slane %v1954_v9, 1  ;;  %v647_v58 = vrot.slane %v1943_v63, 1  ;;  %v1668_v5 = vld [vmem:[%s2141_s4 + $0xe8] sm:$0xff]  }
  0x2b   : > { %v718_v12 = vrot.slane %v716_v35, 1  ;;  %868 = vmatprep.subr.bf16.mxu0 %v1700_v7  ;;  %1029 = vmatprep.subr.bf16.mxu1 %v1700_v7  ;;  %v1472_v50 = vcombine.low %v645_v43, %v646_v45  ;;  %v1669_v35 = vld [vmem:[%s2141_s4 + $0xf0] sm:$0xff]  }
  0x2c   : > { %628 = vrot.lane.b32.xlu0 %v608_v40, %s1701_s27  ;;  %v615_v14 = vor.u32 %v614_v44, %v610_v6  ;;  %v1498_v62 = vcombine.low %v646_v45, %v647_v58  ;;  %v1474_v3 = vcombine.low %v647_v58, %v723_v57  ;;  %v1673_v40 = vld [vmem:[%s2141_s4 + $0x110] sm:$0xff]   ;;  %v1674_v44 = vld [vmem:[%s2141_s4 + $0x118] sm:$0xff]   ;;  %v1557_v58 = vld [vmem:[%s2142_s5] ss:$0 sm:$0xff] }
  0x2d   : > { %v719_v16 = vor.u32 %v718_v12, %v714_v0  ;;  %v1540_v12 = vcombine.low %v723_v57, %v640_v4 }
  0x2e   : > { %630 = vrot.lane.b32.xlu1 %v615_v14, %s1701_s27  ;;  %869 = vmatpush1.bf16.msra.mxu0 %v1657_v19 }
  0x2f   : > { %1030 = vmatpush1.bf16.msra.mxu1 %v1658_v20  ;;  %870 = vmatprep.subr.bf16.mxu0 %v1700_v7 }
  0x30   : > { %720 = vrot.lane.b32.xlu0 %v719_v16, %s1701_s27  ;;  %1031 = vmatprep.subr.bf16.mxu1 %v1700_v7 }
  0x32   : > { %1083 = vrot.lane.b32.xlu1 %v1885_v18, %s1701_s27  ;;  %871 = vmatpush1.bf16.msra.mxu0 %v1659_v21  ;;  %v1661_v18 = vld [vmem:[%s2141_s4 + $0xb8] sm:$0xff]  }
  0x33   : > { %1032 = vmatpush1.bf16.msra.mxu1 %v1660_v22  ;;  %872 = vmatprep.subr.bf16.mxu0 %v1700_v7 }
  0x34   : > { %1033 = vmatprep.subr.bf16.mxu1 %v1700_v7 }
  0x36   : > { %873 = vmatpush1.bf16.msra.mxu0 %v1661_v18 }
  0x37   : > { %1034 = vmatpush1.bf16.msra.mxu1 %v1662_v23  ;;  %1195 = vmatprep.subr.bf16.mxu0 %v1700_v7 }
  0x38   : > { %1588 = vmatprep.subr.bf16.mxu1 %v1700_v7 }
  0x91   : > { %v617_v25 = vpop.permute.xlu0 %616 }
  0x92   : > { %v621_v26 = vpop.permute.xlu1 %620  ;;  %v650_v31 = vsel %vm648_vm6, %v1826_v53, %v617_v25 }
  0x93   : > { %v654_v27 = vsel %vm648_vm6, %v1831_v54, %v621_v26 }
  0x95   : > { %v619_v30 = vpop.permute.xlu0 %618 }
  0x96   : > { %v652_v32 = vsel %vm648_vm6, %v1858_v2, %v619_v30  ;;  %v623_v39 = vpop.permute.xlu1 %622  ;;  %v1664_v2 = vld [vmem:[%s2141_s4 + $0xc8] sm:$0xff]  }
  0x97   : > { %v1467_v34 = vcombine.low %v652_v32, %v654_v27  ;;  %v1491_v36 = vcombine.low %v650_v31, %v652_v32  ;;  %v656_v54 = vsel %vm648_vm6, %v1853_v1, %v623_v39 }
  0x98   : > { %v2038_v47 = vcombine.low %v654_v27, %v656_v54 }
  0x99   : > { %883 = vmatmul.mubr.bf16.vlgmr.msra.gmra.mrb[0].mxu0 %v1467_v34  ;;  %1044 = vmatmul.mubr.bf16.vlgmr.msra.gmra.mrb[0].mxu1 %v1491_v36  ;;  %v625_v41 = vpop.permute.xlu0 %624 }
  0x9a   : > { %1196 = vmatpush1.bf16.msra.mxu0 %v1663_v33  ;;  %1600 = vmatpush1.bf16.msra.mxu1 %v1663_v33  ;;  %v658_v42 = vsel %vm648_vm6, %v1872_v13, %v625_v41  ;;  %v1665_v13 = vld [vmem:[%s2141_s4 + $0xd0] sm:$0xff]   ;;  %v627_v1 = vpop.permute.xlu1 %626 }
  0x9b   : > { %1197 = vmatprep.subr.bf16.mxu0 %v1700_v7  ;;  %1589 = vmatprep.subr.bf16.mxu1 %v1700_v7  ;;  %v1469_v46 = vcombine.low %v656_v54, %v658_v42  ;;  %v660_v52 = vsel %vm648_vm6, %v1892_v24, %v627_v1  ;;  %v1667_v24 = vld [vmem:[%s2141_s4 + $0xe0] sm:$0xff]  }
  0x9c   : > { %1488 = vmatprep.mubr.msk.bf16.mxu0 %vm648_vm6, %v1470_v38  ;;  %1512 = vmatprep.mubr.msk.bf16.mxu1 %vm648_vm6, %v2019_v37  ;;  %v2059_v59 = vcombine.low %v658_v42, %v660_v52 }
  0x9e   : > { %1198 = vmatpush1.bf16.msra.mxu0 %v1664_v2  ;;  %1601 = vmatpush1.bf16.msra.mxu1 %v1664_v2  ;;  %v629_v48 = vpop.permute.xlu0 %628 }
  0x9f   : > { %1199 = vmatprep.subr.bf16.mxu0 %v1700_v7  ;;  %1590 = vmatprep.subr.bf16.mxu1 %v1700_v7  ;;  %v662_v56 = vsel %vm648_vm6, %v1921_v55, %v629_v48 }
  0xa0   : > { %v1471_v60 = vcombine.low %v660_v52, %v662_v56  ;;  %v631_v55 = vpop.permute.xlu1 %630 }
  0xa1   : > { %891 = vmatmul.mubr.bf16.gmra.mrb[4].mxu0 %v1469_v46  ;;  %1052 = vmatmul.mubr.bf16.gmra.mrb[4].mxu1 %v2038_v47  ;;  %v664_v6 = vsel %vm648_vm6, %v1943_v63, %v631_v55  ;;  %v1670_v63 = vld [vmem:[%s2141_s4 + $0xf8] sm:$0xff]  }
  0xa2   : > { %1200 = vmatpush1.bf16.msra.mxu0 %v1665_v13  ;;  %1602 = vmatpush1.bf16.msra.mxu1 %v1665_v13  ;;  %v721_v61 = vpop.permute.xlu0 %720  ;;  %v1497_v10 = vcombine.low %v662_v56, %v664_v6 }
  0xa3   : > { %1201 = vmatprep.subr.bf16.mxu0 %v1700_v7  ;;  %1591 = vmatprep.subr.bf16.mxu1 %v1700_v7  ;;  %v725_v8 = vsel %vm648_vm6, %v1954_v9, %v721_v61  ;;  %v1671_v9 = vld [vmem:[%s2141_s4 + $0x100] sm:$0xff]  }
  0xa4   : > { %1513 = vmatprep.mubr.msk.bf16.mxu1 %vm648_vm6, %v2042_v49  ;;  %1489 = vmatprep.mubr.msk.bf16.mxu0 %vm648_vm6, %v1472_v50  ;;  %v1473_v0 = vcombine.low %v664_v6, %v725_v8  ;;  %v1084_v14 = vpop.permute.xlu1 %1083 }
  0xa5   : > { %v1088_v15 = vsel %vm648_vm6, %v1826_v53, %v1084_v14 }
  0xa6   : > { %1202 = vmatpush1.bf16.msra.mxu0 %v1666_v51  ;;  %1603 = vmatpush1.bf16.msra.mxu1 %v1666_v51  ;;  %v1539_v16 = vcombine.low %v725_v8, %v1088_v15 }
  0xa7   : > { %1203 = vmatprep.subr.bf16.mxu0 %v1700_v7  ;;  %1592 = vmatprep.subr.bf16.mxu1 %v1700_v7 }
  0xa9   : > { %1060 = vmatmul.mubr.bf16.gmra.mrb[8].mxu1 %v2059_v59  ;;  %899 = vmatmul.mubr.bf16.gmra.mrb[8].mxu0 %v1471_v60 }
  0xaa   : > { %1204 = vmatpush1.bf16.msra.mxu0 %v1667_v24  ;;  %1604 = vmatpush1.bf16.msra.mxu1 %v1667_v24 }
  0xab   : > { %1205 = vmatprep.subr.bf16.mxu0 %v1700_v7  ;;  %1593 = vmatprep.subr.bf16.mxu1 %v1700_v7 }
  0xac   : > { %1514 = vmatprep.mubr.msk.bf16.mxu1 %vm648_vm6, %v1498_v62  ;;  %1490 = vmatprep.mubr.msk.bf16.mxu0 %vm648_vm6, %v1474_v3 }
  0xae   : > { %1206 = vmatpush1.bf16.msra.mxu0 %v1668_v5  ;;  %1605 = vmatpush1.bf16.msra.mxu1 %v1668_v5 }
  0xaf   : > { %1207 = vmatprep.subr.bf16.mxu0 %v1700_v7  ;;  %1594 = vmatprep.subr.bf16.mxu1 %v1700_v7 }
  0xb1   : > { %1068 = vmatmul.mubr.bf16.gmra.mrb[12].mxu1 %v1497_v10  ;;  %907 = vmatmul.mubr.bf16.gmra.mrb[12].mxu0 %v1473_v0 }
  0xb2   : > { %1208 = vmatpush1.bf16.msra.mxu0 %v1669_v35  ;;  %1606 = vmatpush1.bf16.msra.mxu1 %v1669_v35 }
  0xb3   : > { %1209 = vmatprep.subr.bf16.mxu0 %v1700_v7  ;;  %1595 = vmatprep.subr.bf16.mxu1 %v1700_v7 }
  0xb4   : > { %1553 = vmatprep.mubr.msk.bf16.mxu0 %vm648_vm6, %v2019_v37  ;;  %1555 = vmatprep.mubr.msk.bf16.mxu1 %vm648_vm6, %v1498_v62 }
  0xb6   : > { %1210 = vmatpush1.bf16.msra.mxu0 %v1670_v63  ;;  %1607 = vmatpush1.bf16.msra.mxu1 %v1670_v63 }
  0xb7   : > { %1211 = vmatprep.subr.bf16.mxu0 %v1700_v7  ;;  %1596 = vmatprep.subr.bf16.mxu1 %v1700_v7 }
  0xba   : > { %1212 = vmatpush1.bf16.msra.mxu0 %v1671_v9  ;;  %1608 = vmatpush1.bf16.msra.mxu1 %v1671_v9 }
  0xbb   : > { %1213 = vmatprep.subr.bf16.mxu0 %v1700_v7  ;;  %1597 = vmatprep.subr.bf16.mxu1 %v1700_v7 }
  0xbe   : > { %1214 = vmatpush1.bf16.msra.mxu0 %v1672_v11  ;;  %1609 = vmatpush1.bf16.msra.mxu1 %v1672_v11 }
  0xbf   : > { %1215 = vmatprep.subr.bf16.mxu0 %v1700_v7  ;;  %1598 = vmatprep.subr.bf16.mxu1 %v1700_v7 }
  0xc2   : > { %1216 = vmatpush1.bf16.msra.mxu0 %v1673_v40  ;;  %1610 = vmatpush1.bf16.msra.mxu1 %v1673_v40 }
  0xc3   : > { %1217 = vmatprep.subr.bf16.mxu0 %v1700_v7  ;;  %1599 = vmatprep.subr.bf16.mxu1 %v1700_v7 }
  0xc6   : > { %1218 = vmatpush1.bf16.msra.mxu0 %v1674_v44  ;;  %1611 = vmatpush1.bf16.msra.mxu1 %v1674_v44 }
  0xc9   : > { %1228 = vmatmul.mubr.bf16.vlgmr.msra.gmra.mrb[16].mxu0 %v2038_v47  ;;  %1244 = vmatmul.mubr.bf16.vlgmr.msra.gmra.mrb[16].mxu1 %v1497_v10 }
  0xca   : > { %1554 = vmatprep.mubr.msk.bf16.mxu0 %vm648_vm6, %v2042_v49  ;;  %1556 = vmatprep.mubr.msk.bf16.mxu1 %vm648_vm6, %v1540_v12 }
  0xd1   : > { %1236 = vmatmul.mubr.bf16.gmra.mrb[20].mxu0 %v2059_v59  ;;  %1252 = vmatmul.mubr.bf16.gmra.mrb[20].mxu1 %v1539_v16 }
 0x16c   : > { %v884_v7 = vpop.f32.mrb[0].mxu0  ;;  %v1045_v4 = vpop.f32.mrb[0].mxu1 }
 0x16d   : > { %v1046_v17 = vadd.f32 %v1045_v4, %v884_v7  ;;  %v886_v19 = vpop.f32.mrb[1].mxu0  ;;  %v1047_v20 = vpop.f32.mrb[1].mxu1 }
 0x16e   : > { %v887_v21 = vpop.f32.mrb[2].mxu0  ;;  %v1048_v22 = vpop.f32.mrb[2].mxu1 }
 0x16f   : > { %v1049_v18 = vadd.f32 %v1048_v22, %v887_v21  ;;  %v889_v23 = vpop.f32.mrb[3].mxu0  ;;  %v1050_v25 = vpop.f32.mrb[3].mxu1 }
 0x174   : > { %v892_v26 = vpop.f32.mrb[4].mxu0  ;;  %v1053_v27 = vpop.f32.mrb[4].mxu1 }
 0x175   : > { %v1054_v28 = vadd.f32 %v1053_v27, %v892_v26  ;;  %v894_v29 = vpop.f32.mrb[5].mxu0  ;;  %v1055_v30 = vpop.f32.mrb[5].mxu1 }
 0x176   : > { %v895_v53 = vpop.f32.mrb[6].mxu0  ;;  %v1056_v31 = vpop.f32.mrb[6].mxu1 }
 0x177   : > { %v1057_v32 = vadd.f32 %v1056_v31, %v895_v53  ;;  %v1058_v33 = vpop.f32.mrb[7].mxu1  ;;  %v897_v34 = vpop.f32.mrb[7].mxu0 }
 0x17c   : > { %v1061_v36 = vpop.f32.mrb[8].mxu1  ;;  %v900_v37 = vpop.f32.mrb[8].mxu0 }
 0x17d   : > { %v1062_v38 = vadd.f32 %v1061_v36, %v900_v37  ;;  %v1063_v39 = vpop.f32.mrb[9].mxu1  ;;  %v902_v41 = vpop.f32.mrb[9].mxu0 }
 0x17e   : > { %v1064_v2 = vpop.f32.mrb[10].mxu1  ;;  %v903_v42 = vpop.f32.mrb[10].mxu0 }
 0x17f   : > { %v1065_v54 = vadd.f32 %v1064_v2, %v903_v42  ;;  %v1066_v43 = vpop.f32.mrb[11].mxu1  ;;  %v905_v45 = vpop.f32.mrb[11].mxu0 }
 0x184   : > { %v1069_v46 = vpop.f32.mrb[12].mxu1  ;;  %v908_v13 = vpop.f32.mrb[12].mxu0 }
 0x185   : > { %v1070_v47 = vadd.f32 %v1069_v46, %v908_v13  ;;  %v1071_v1 = vpop.f32.mrb[13].mxu1  ;;  %v910_v48 = vpop.f32.mrb[13].mxu0 }
 0x186   : > { %v1072_v49 = vpop.f32.mrb[14].mxu1  ;;  %v911_v50 = vpop.f32.mrb[14].mxu0 }
 0x187   : > { %v1073_v51 = vadd.f32 %v1072_v49, %v911_v50  ;;  %v1074_v52 = vpop.f32.mrb[15].mxu1  ;;  %v913_v56 = vpop.f32.mrb[15].mxu0 }
 0x19c   : > { %v1229_v57 = vpop.f32.mrb[16].mxu0  ;;  %v1245_v59 = vpop.f32.mrb[16].mxu1 }
 0x19d   : > { %v1260_v60 = vadd.f32 %v1229_v57, %v1046_v17  ;;  %v1264_v24 = vadd.f32 %v1245_v59, %v1062_v38  ;;  %v1231_v55 = vpop.f32.mrb[17].mxu0  ;;  %v1247_v61 = vpop.f32.mrb[17].mxu1 }
 0x19e   : > { %v1232_v62 = vpop.f32.mrb[18].mxu0  ;;  %v1248_v3 = vpop.f32.mrb[18].mxu1 }
 0x19f   : > { %v1275_v5 = vadd.f32 %v1557_v58, %v1260_v60  ;;  %v1279_v6 = vadd.f32 %v1557_v58, %v1264_v24  ;;  %v1261_v8 = vadd.f32 %v1232_v62, %v1049_v18  ;;  %v1265_v10 = vadd.f32 %v1248_v3, %v1065_v54  ;;  %v1234_v0 = vpop.f32.mrb[19].mxu0  ;;  %v1250_v35 = vpop.f32.mrb[19].mxu1 }
 0x1a1   : > { %v1276_v63 = vadd.f32 %v1557_v58, %v1261_v8  ;;  %v1280_v9 = vadd.f32 %v1557_v58, %v1265_v10  ;;  %v1283_v11 = vmax.f32 %v1275_v5, 0.0  ;;  %v1287_v40 = vmax.f32 %v1279_v6, 0.0 }
 0x1a3   : > { %v1284_v44 = vmax.f32 %v1276_v63, 0.0  ;;  %v1288_v12 = vmax.f32 %v1280_v9, 0.0 }
 0x1a4   : > { %v1237_v14 = vpop.f32.mrb[20].mxu0  ;;  %v1253_v15 = vpop.f32.mrb[20].mxu1 }
 0x1a5   : > { %v1568_v16 = vpack.c.bf16 %v1284_v44, %v1283_v11  ;;  %v1578_v7 = vpack.c.bf16 %v1288_v12, %v1287_v40  ;;  %v1262_v4 = vadd.f32 %v1237_v14, %v1054_v28  ;;  %v1266_v17 = vadd.f32 %v1253_v15, %v1070_v47  ;;  %v1239_v19 = vpop.f32.mrb[21].mxu0  ;;  %v1255_v20 = vpop.f32.mrb[21].mxu1 }
 0x1a6   : > { %v1240_v21 = vpop.f32.mrb[22].mxu0  ;;  %v1256_v22 = vpop.f32.mrb[22].mxu1 }
 0x1a7   : > { %1569 = vst [vmem:[%s407_s19] sm:$0xff] %v1568_v16   ;;  %1586 = vst [vmem:[%s407_s19 + $0x10] sm:$0xff] %v1578_v7   ;;  %v1277_v18 = vadd.f32 %v1557_v58, %v1262_v4  ;;  %v1281_v23 = vadd.f32 %v1557_v58, %v1266_v17  ;;  %v1263_v25 = vadd.f32 %v1240_v21, %v1057_v32  ;;  %v1242_v27 = vpop.f32.mrb[23].mxu0  ;;  %v1258_v29 = vpop.f32.mrb[23].mxu1 }
 0x1a8   : > { %v1267_v26 = vadd.f32 %v1256_v22, %v1073_v51 }
 0x1a9   : > { %v1278_v30 = vadd.f32 %v1557_v58, %v1263_v25  ;;  %v1285_v31 = vmax.f32 %v1277_v18, 0.0  ;;  %v1289_v33 = vmax.f32 %v1281_v23, 0.0 }
 0x1aa   : > { %v1282_v53 = vadd.f32 %v1557_v58, %v1267_v26 }
 0x1ab   : > { %v1286_v34 = vmax.f32 %v1278_v30, 0.0 }
 0x1ac   : > { %v1290_v36 = vmax.f32 %v1282_v53, 0.0 }
 0x1ad   : > { %v1573_v28 = vpack.c.bf16 %v1286_v34, %v1285_v31 }
 0x1ae   : > { %v1583_v37 = vpack.c.bf16 %v1290_v36, %v1289_v33 }
 0x1af   : > { %1585 = vst [vmem:[%s407_s19 + $0x8] sm:$0xff] %v1573_v28  }
 0x1b0   : > { %1587 = vst [vmem:[%s407_s19 + $0x18] sm:$0xff] %v1583_v37  }
 0x1b1 PF: > { %s16_s22 = sadd.s32 1, %s1697_s22   ;;  %s2148_s21 = smov %s1693_s0 }
 0x1b2   : > { %p13_p5 = scmp.ge.s32.totalorder %s16_s22, 6   ;;  %s2149_s0 = smov %s2151_s2 }
 0x1b4   :  { %15 = sbr.rel (!%p13_p5) target bundleno = 2 (0x2), region = 82 }

// kernel: _lambda_.6
= control target key start
LH: loop header
LB: loop body
LE: loop exit
PB: predicated region body
PF: predicated region fallthrough
CT: control target
= control target key end

     0   :  { %s2064_s21 = smov 0   ;;  %s2066_s22 = smov 0   ;;  %s2730_s0 = inlined_call_operand.vmem [shape: bf16[4,16,16,64], index: 0, kind: input, shape index: {}, may-alias: {0,1,2}]   ;;  %s2731_s1 = inlined_call_operand.vmem [shape: bf16[4,16,16,64], index: 1, kind: input, shape index: {}, may-alias: {0,1,2}]   ;;  %s2732_s2 = inlined_call_operand.vmem [shape: bf16[4,16,16,64], index: 2, kind: input, shape index: {}, may-alias: {0,1,2}]   ;;  %s2733_s3 = inlined_call_operand.vmem [shape: bf16[1,64], index: 3, kind: input, shape index: {}]   ;;  %s2734_s4 = inlined_call_operand.vmem [shape: bf16[3,192,64], index: 4, kind: input, shape index: {}]   ;;  %s2735_s5 = inlined_call_operand.vmem [shape: f32[1,64], index: 5, kind: input, shape index: {}]   ;;  %s2736_s6 = inlined_call_operand.vmem [shape: bf16[4,8,8,64], index: 6, kind: output, shape index: {}]  }
   0x1   :  { %s2068_s23 = smov 0   ;;  %s2070_s24 = smov 0  }
   0x2   :  { %s2072_s25 = smov 0  }
   0x3 LB: > { %s25_s26 = sadd.s32 1, %s2016_s23  ;;  %s28_s27 = sadd.s32 1, %s2020_s24  ;;  %s2024_s25 = sphi %s2072_s25, %s16_s25   ;;  %s2020_s24 = sphi %s2070_s24, %s2746_s24   ;;  %s2016_s23 = sphi %s2068_s23, %s2745_s23   ;;  %s2012_s22 = sphi %s2066_s22, %s2744_s22   ;;  %s2008_s21 = sphi %s2064_s21, %s2743_s21  }
   0x4   : > { %p26_p0 = scmp.ge.s32.totalorder %s25_s26, 2  ;;  %p1716_p1 = scmp.ge.s32.totalorder %s2024_s25, 1 }
   0x5   : > { %p298_p2 = scmp.lt.s32.totalorder %s2024_s25, 9 }
   0x6   : > { %s2748_s26 = smov (%p26_p0, %s25_s26), 0  ;;  %s2750_s27 = smov (!%p26_p0, %s28_s27), %s2020_s24 }
   0x7   : > { %p299_p3 = pnand %p1716_p1, %p298_p2  ;;  %p30_p4 = scmp.ge.s32.totalorder %s2750_s27, 4 }
   0x8   : > { %s2097_s28 = sshll.u32 (!%p299_p3), %s2008_s21, 3  ;;  %p367_p5 = scmp.lt.s32.totalorder (!%p299_p3), %s2012_s22, 3  ;;  %v424_v0 = vlaneseq (!%p299_p3)  ;;  %v2026_v1 = vmov (!%p299_p3), 1966171168   ;;  %v1949_v4 = vld [vmem:[%s2734_s4 + $0x60] sm:$0xff] (!%p299_p3)   ;;  %vm618_vm0 = vcmask (!%p299_p3), 1040384  }
   0x9   : > { %s2752_s27 = smov (%p30_p4, %s2750_s27), 0  ;;  %302 = sbr.rel (%p299_p3) target bundleno = 493 (0x1ed), region = 44 }
   0xa   : > { %p383_p6 = scmp.lt.s32.totalorder (!%p299_p3), %s2097_s28, 15  ;;  %v601_v2 = vunpack.c.l.s4 (!%p299_p3), %v2026_v1  ;;  %v425_v3 = vshrl.u32 (!%p299_p3), %v424_v0, 7  ;;  %vm619_vm1 = vsmask.f32 (!%p299_p3), 256  ;;  %v2027_v6 = vmov (!%p299_p3), 0   ;;  %v1950_v9 = vld [vmem:[%s2734_s4 + $0x68] sm:$0xff] (!%p299_p3)  }
   0xb   : > { %987 = vmatprep.subr.bf16.mxu0 (!%p299_p3), %v2027_v6  ;;  %1159 = vmatprep.subr.bf16.mxu1 (!%p299_p3), %v2027_v6  ;;  %v2114_v7 = vld [vmem:[%s2733_s3] sm:$0x1] (!%p299_p3)  ;;  %s1718_s16 = sadd.s32 (!%p299_p3), 4294967295, %s2097_s28  ;;  %v1952_v12 = vld [vmem:[%s2734_s4 + $0x70] sm:$0xff] (!%p299_p3)   ;;  %p420_p9 = scmp.eq.s32.totalorder (!%p299_p3), %s2008_s21, 0  ;;  %v1953_v14 = vld [vmem:[%s2734_s4 + $0x8] sm:$0xff] (!%p299_p3)  }
   0xc   : > { %v602_v5 = vunpack.c.0.s8 (!%p299_p3), %v601_v2  ;;  %v426_v8 = vsub.s32 (!%p299_p3), 0, %v425_v3  ;;  %988 = vmatpush1.bf16.msra.mxu0 (!%p299_p3), %v1949_v4  ;;  %v1951_v10 = vld [vmem:[%s2734_s4] sm:$0xff] (!%p299_p3)   ;;  %p365_p7 = scmp.gt.s32.totalorder (!%p299_p3), %s1718_s16, 0  ;;  %p1719_p8 = scmp.lt.s32.totalorder (!%p299_p3), %s1718_s16, 15  ;;  %v422_v17 = vpack.i.b16 (!%p299_p3), %v2114_v7, %v2114_v7  ;;  %vm641_vm2 = vsmask.f32 (!%p299_p3), 7424  ;;  %vm2156_vm3 = vmand (!%p299_p3), %vm618_vm0, %vm619_vm1 }
   0xd   : > { %989 = vmatprep.subr.bf16.mxu0 (!%p299_p3), %v2027_v6  ;;  %1160 = vmatpush1.bf16.msra.mxu1 (!%p299_p3), %v1951_v10  ;;  %s1872_s19 = sadd.s32 (!%p299_p3), 8, %s2097_s28  ;;  %v1954_v1 = vld [vmem:[%s2734_s4 + $0x78] sm:$0xff] (!%p299_p3)   ;;  %v1956_v10 = vld [vmem:[%s2734_s4 + $0x80] sm:$0xff] (!%p299_p3)   ;;  %p440_p11 = scmp.eq.s32.totalorder (!%p299_p3), %s2008_s21, 1  ;;  %vm770_vm6 = vcmask (!%p299_p3), 1046528   ;;  %vm795_vm7 = vcmask (!%p299_p3), 523264  }
   0xe   : > { %v605_v11 = vsub.s32 (!%p299_p3), %v602_v5, %v425_v3  ;;  %1161 = vmatprep.subr.bf16.mxu1 (!%p299_p3), %v2027_v6  ;;  %v2161_v29 = vrot.slane (!%p299_p3), %v422_v17, %v426_v8  ;;  %p2283_p10 = scmp.lt.s32.totalorder (!%p299_p3), %s1872_s19, 15  ;;  %v1972_v28 = vld [vmem:[%s2734_s4 + $0x50] sm:$0xff] (!%p299_p3)   ;;  %vm1539_vm8 = vcmask (!%p299_p3), 519168  }
  0x10   : > { %s2754_s22 = smov (!%p367_p5, %s2012_s22), 3  ;;  %v606_v13 = vrot.slane %v2114_v7, %v605_v11  ;;  %990 = vmatpush1.bf16.msra.mxu0 %v1950_v9  ;;  %v1955_v9 = vld [vmem:[%s2734_s4 + $0x10] sm:$0xff]   ;;  %s2758_s19 = smov (!%p2283_p10, %s1872_s19), 15 }
  0x11   : > { %s384_s7 = scalar_select %p383_p6, %s2097_s28, 15  ;;  %991 = vmatprep.subr.bf16.mxu0 %v2027_v6  ;;  %1162 = vmatpush1.bf16.msra.mxu1 %v1953_v14 }
  0x12   : > { %s2109_s8 = sshll.u32 %s2754_s22, 5  ;;  %v613_v16 = vrot.slane %v606_v13, %v605_v11  ;;  %1163 = vmatprep.subr.bf16.mxu1 %v2027_v6  ;;  %s2760_s19 = smov (!%p2283_p10, %s2758_s19), 15 }
  0x13   : > { %s1728_s15 = sshll.u32 %s384_s7, 1 }
  0x14   : > { %s387_s17 = sadd.s32 %s1728_s15, %s2109_s8  ;;  %v2145_v20 = vshll.u32 %v613_v16, 16  ;;  %992 = vmatpush1.bf16.msra.mxu0 %v1952_v12  ;;  %v1957_v16 = vld [vmem:[%s2734_s4 + $0x18] sm:$0xff]  }
  0x15   : > { %s1730_s20 = sshll.u32 %s387_s17, 2  ;;  %993 = vmatprep.subr.bf16.mxu0 %v2027_v6  ;;  %1164 = vmatpush1.bf16.msra.mxu1 %v1955_v9 }
  0x16   : > { %s2133_s7 = scalar_lea.vmem %s2731_s1, %s1730_s20  ;;  %1165 = vmatprep.subr.bf16.mxu1 %v2027_v6 }
  0x17   : > { %v1940_v15 = vld [vmem:[%s2133_s7] sm:$0xff]   ;;  %s366_s11 = scalar_select %p365_p7, %s1718_s16, 0  ;;  %v1942_v21 = vld [vmem:[%s2133_s7 + $0x8] sm:$0xff]   ;;  %v1943_v22 = vld [vmem:[%s2133_s7 + $0x10] sm:$0xff]  }
  0x18   : > { %s2143_s12 = scalar_select %p420_p9, 1, 0  ;;  %v517_v18 = vshrl.u32 %v1940_v15, 16  ;;  %v520_v19 = vshll.u32 %v1940_v15, 16  ;;  %v524_v25 = vshrl.u32 %v1942_v21, 16  ;;  %v527_v26 = vshll.u32 %v1942_v21, 16  ;;  %994 = vmatpush1.bf16.msra.mxu0 %v1954_v1 }
  0x19   : > { %s2756_s11 = smov (!%p1719_p8, %s366_s11), 15  ;;  %v1944_v27 = vld [vmem:[%s2133_s7 + $0x18] sm:$0xff]   ;;  %v531_v30 = vshrl.u32 %v1943_v22, 16  ;;  %v534_v31 = vshll.u32 %v1943_v22, 16  ;;  %v1945_v0 = vld [vmem:[%s2133_s7 + $0x20] sm:$0xff]   ;;  %v2217_v8 = vld [vmem:[%s2133_s7 + $0x28] sm:$0xff]   ;;  %995 = vmatprep.subr.bf16.mxu0 %v2027_v6  ;;  %1166 = vmatpush1.bf16.msra.mxu1 %v1957_v16 }
  0x1a   : > { %v519_v23 = vrot.slane %v517_v18, 7  ;;  %s1724_s13 = sshll.u32 %s2756_s11, 1  ;;  %v431_v24 = vstv %s2143_s12  ;;  %v526_v34 = vrot.slane %v524_v25, 7  ;;  %v538_v35 = vshrl.u32 %v1944_v27, 16  ;;  %v2232_v15 = vld [vmem:[%s2133_s7 + $0x30] sm:$0xff]   ;;  %v2246_v22 = vld [vmem:[%s2133_s7 + $0x38] sm:$0xff]   ;;  %1167 = vmatprep.subr.bf16.mxu1 %v2027_v6 }
  0x1b   : > { %s373_s14 = sadd.s32 %s2109_s8, %s1724_s13  ;;  %vm432_vm4 = vcmp.eq.s32.totalorder %v431_v24, 1  ;;  %v533_v37 = vrot.slane %v531_v30, 7  ;;  %v541_v38 = vshll.u32 %v1944_v27, 16  ;;  %s1735_s12 = sshll.u32 %s2760_s19, 1 }
  0x1c   : > { %v522_v32 = vor.u32 %v520_v19, %v519_v23  ;;  %v2166_v33 = vsel %vm2156_vm3, %v519_v23, %v2145_v20  ;;  %s1726_s15 = sshll.u32 %s373_s14, 2  ;;  %v529_v41 = vor.u32 %v527_v26, %v526_v34  ;;  %v2180_v42 = vsel %vm2156_vm3, %v526_v34, %v2145_v20  ;;  %s2028_s14 = smov 64   ;;  %v1958_v34 = vld [vmem:[%s2734_s4 + $0x88] sm:$0xff]   ;;  %996 = vmatpush1.bf16.msra.mxu0 %v1956_v10 }
  0x1d   : > { %v662_v36 = vshll.u32 %v2166_v33, 16  ;;  %s375_s18 = scalar_lea.vmem %s2730_s0, %s1726_s15  ;;  %v540_v43 = vrot.slane %v538_v35, 7  ;;  %v674_v47 = vshll.u32 %v2180_v42, 16  ;;  %v536_v50 = vor.u32 %v534_v31, %v533_v37  ;;  %997 = vmatprep.subr.bf16.mxu0 %v2027_v6  ;;  %s401_s15 = sadd.s32 %s1735_s12, %s2109_s8 }
  0x1e   : > { %v2175_v39 = vsel %vm2156_vm3, %v2114_v7, %v522_v32  ;;  %v1941_v40 = vld [vmem:[%s375_s18] sm:$0xff]   ;;  %v2189_v49 = vsel %vm2156_vm3, %v2114_v7, %v529_v41  ;;  %v2194_v51 = vsel %vm2156_vm3, %v533_v37, %v2145_v20  ;;  %s2324_s28 = scalar_select %p440_p11, 1, 0 }
  0x1f   : > { %v655_v44 = vshrl.u32 %v2175_v39, 16  ;;  %v657_v45 = vshll.u32 %v2175_v39, 16  ;;  %v664_v46 = vrot.slane %v662_v36, 1  ;;  %v439_v48 = vsel %vm432_vm4, %v2161_v29, %v1941_v40  ;;  %v1959_v40 = vld [vmem:[%s2734_s4 + $0x20] sm:$0xff]   ;;  %s1737_s19 = sshll.u32 %s401_s15, 2  ;;  %s1738_s7 = sshll.u32 %s2008_s21, 2 }
  0x20   : > { %v510_v53 = vshrl.u32 %v439_v48, 16  ;;  %v513_v54 = vshll.u32 %v439_v48, 16  ;;  %v667_v55 = vshrl.u32 %v2189_v49, 16  ;;  %v669_v56 = vshll.u32 %v2189_v49, 16  ;;  %998 = vmatpush1.bf16.msra.mxu0 %v1958_v34  ;;  %1168 = vmatpush1.bf16.msra.mxu1 %v1959_v40  ;;  %s403_s20 = scalar_lea.vmem %s2732_s2, %s1737_s19  ;;  %p2666_p12 = scmp.lt.s32.totalorder %s1738_s7, 7 }
  0x21   : > { %v659_v52 = vrot.slane %v657_v45, 1  ;;  %v676_v57 = vrot.slane %v674_v47, 1  ;;  %v2201_v58 = vsel %vm2156_vm3, %v2114_v7, %v536_v50  ;;  %v686_v59 = vshll.u32 %v2194_v51, 16  ;;  %999 = vmatprep.subr.bf16.mxu0 %v2027_v6  ;;  %1169 = vmatprep.subr.bf16.mxu1 %v2027_v6  ;;  %s1739_s21 = sshll.u32 %s2754_s22, 3 }
  0x22   : > { %v512_v61 = vrot.slane %v510_v53, 7  ;;  %v679_v62 = vshrl.u32 %v2201_v58, 16  ;;  %v681_v63 = vshll.u32 %v2201_v58, 16  ;;  %v671_v2 = vrot.slane %v669_v56, 1  ;;  %v1960_v56 = vld [vmem:[%s2734_s4 + $0x90] sm:$0xff]   ;;  %s2762_s7 = smov (!%p2666_p12, %s1738_s7), 7 }
  0x23   : > { %v660_v60 = vor.u32 %v659_v52, %v655_v44  ;;  %v688_v3 = vrot.slane %v686_v59, 1  ;;  %v543_v4 = vor.u32 %v541_v38, %v540_v43  ;;  %v2214_v5 = vsel %vm2156_vm3, %v540_v43, %v2145_v20  ;;  %s414_s19 = sadd.s32 %s1739_s21, %s2762_s7 }
  0x24   : > { %v515_v12 = vor.u32 %v513_v54, %v512_v61  ;;  %v2229_v13 = vsel %vm2156_vm3, %v512_v61, %v2145_v20  ;;  %v683_v14 = vrot.slane %v681_v63, 1  ;;  %v672_v18 = vor.u32 %v671_v2, %v667_v55  ;;  %1000 = vmatpush1.bf16.msra.mxu0 %v1960_v56  ;;  %s1740_s22 = sshll.u32 %s414_s19, 2 }
  0x25   : > { %v665_v11 = vsel %vm641_vm2, %v660_v60, %v664_v46  ;;  %v650_v17 = vshll.u32 %v2229_v13, 16  ;;  %v2242_v19 = vsel %vm2156_vm3, %v2114_v7, %v543_v4  ;;  %v698_v21 = vshll.u32 %v2214_v5, 16  ;;  %1001 = vmatprep.subr.bf16.mxu0 %v2027_v6  ;;  %s2692_s18 = scalar_lea.vmem %s2736_s6, %s1740_s22 }
  0x26   : > { %740 = vrot.lane.b32.xlu0 %v665_v11, %s2028_s14  ;;  %v2251_v23 = vsel %vm2156_vm3, %v2114_v7, %v515_v12  ;;  %v684_v24 = vor.u32 %v683_v14, %v679_v62  ;;  %v691_v25 = vshrl.u32 %v2242_v19, 16  ;;  %v693_v26 = vshll.u32 %v2242_v19, 16  ;;  %v1962_v62 = vld [vmem:[%s2734_s4 + $0x28] sm:$0xff]  }
  0x27   : > { %v643_v27 = vshrl.u32 %v2251_v23, 16  ;;  %v645_v30 = vshll.u32 %v2251_v23, 16  ;;  %v652_v31 = vrot.slane %v650_v17, 1  ;;  %v677_v32 = vsel %vm641_vm2, %v672_v18, %v676_v57  ;;  %1170 = vmatpush1.bf16.msra.mxu1 %v1962_v62 }
  0x28   : > { %v2264_v35 = vsel %vm641_vm2, %v684_v24, %v688_v3  ;;  %v695_v36 = vrot.slane %v693_v26, 1  ;;  %v700_v37 = vrot.slane %v698_v21, 1  ;;  %v545_v38 = vshrl.u32 %v1945_v0, 16  ;;  %v1963_v21 = vld [vmem:[%s2734_s4 + $0x98] sm:$0xff]   ;;  %1171 = vmatprep.subr.bf16.mxu1 %v2027_v6 }
  0x29   : > { %v647_v41 = vrot.slane %v645_v30, 1  ;;  %v548_v43 = vshll.u32 %v1945_v0, 16  ;;  %v552_v44 = vshrl.u32 %v2217_v8, 16  ;;  %v555_v45 = vshll.u32 %v2217_v8, 16  ;;  %1002 = vmatpush1.bf16.msra.mxu0 %v1963_v21 }
  0x2a   : > { %742 = vrot.lane.b32.xlu0 %v677_v32, %s2028_s14  ;;  %v696_v46 = vor.u32 %v695_v36, %v691_v25  ;;  %v547_v47 = vrot.slane %v545_v38, 7  ;;  %v559_v48 = vshrl.u32 %v2232_v15, 16  ;;  %v562_v50 = vshll.u32 %v2232_v15, 16  ;;  %v1965_v38 = vld [vmem:[%s2734_s4 + $0xa0] sm:$0xff]   ;;  %1003 = vmatprep.subr.bf16.mxu0 %v2027_v6 }
  0x2b   : > { %v648_v52 = vor.u32 %v647_v41, %v643_v27  ;;  %v554_v53 = vrot.slane %v552_v44, 7  ;;  %v566_v54 = vshrl.u32 %v2246_v22, 16  ;;  %v569_v55 = vshll.u32 %v2246_v22, 16  ;;  %v1964_v27 = vld [vmem:[%s2734_s4 + $0x30] sm:$0xff]   ;;  %v1966_v44 = vld [vmem:[%s2734_s4 + $0x38] sm:$0xff]  }
  0x2c   : > { %v701_v57 = vsel %vm641_vm2, %v696_v46, %v700_v37  ;;  %v550_v59 = vor.u32 %v548_v43, %v547_v47  ;;  %v2292_v60 = vsel %vm2156_vm3, %v547_v47, %v2145_v20  ;;  %v561_v61 = vrot.slane %v559_v48, 7  ;;  %v1961_v48 = vld [vmem:[%s403_s20] sm:$0xff]   ;;  %1172 = vmatpush1.bf16.msra.mxu1 %v1964_v27 }
  0x2d   : > { %v653_v63 = vsel %vm641_vm2, %v648_v52, %v652_v31  ;;  %v710_v0 = vshll.u32 %v2292_v60, 16  ;;  %v557_v1 = vor.u32 %v555_v45, %v554_v53  ;;  %v2303_v2 = vsel %vm2156_vm3, %v554_v53, %v2145_v20  ;;  %1173 = vmatprep.subr.bf16.mxu1 %v2027_v6  ;;  %v1967_v53 = vld [vmem:[%s2734_s4 + $0xa8] sm:$0xff]   ;;  %1004 = vmatpush1.bf16.msra.mxu0 %v1965_v38 }
  0x2e   : > { %746 = vrot.lane.b32.xlu0 %v701_v57, %s2028_s14  ;;  %738 = vrot.lane.b32.xlu1 %v653_v63, %s2028_s14  ;;  %v2313_v3 = vsel %vm2156_vm3, %v2114_v7, %v550_v59  ;;  %v722_v4 = vshll.u32 %v2303_v2, 16  ;;  %v564_v8 = vor.u32 %v562_v50, %v561_v61  ;;  %v2319_v9 = vsel %vm2156_vm3, %v561_v61, %v2145_v20  ;;  %v1968_v57 = vld [vmem:[%s2734_s4 + $0x40] sm:$0xff]  }
  0x2f   : > { %v703_v10 = vshrl.u32 %v2313_v3, 16  ;;  %v705_v11 = vshll.u32 %v2313_v3, 16  ;;  %v712_v12 = vrot.slane %v710_v0, 1  ;;  %v2331_v14 = vsel %vm2156_vm3, %v2114_v7, %v557_v1  ;;  %1005 = vmatprep.subr.bf16.mxu0 %v2027_v6 }
  0x30   : > { %v715_v15 = vshrl.u32 %v2331_v14, 16  ;;  %v717_v16 = vshll.u32 %v2331_v14, 16  ;;  %v724_v17 = vrot.slane %v722_v4, 1  ;;  %v2341_v18 = vsel %vm2156_vm3, %v2114_v7, %v564_v8  ;;  %1174 = vmatpush1.bf16.msra.mxu1 %v1966_v44  ;;  %v1974_v44 = vld [vmem:[%s2734_s4 + $0x58] sm:$0xff]  }
  0x31   : > { %v707_v22 = vrot.slane %v705_v11, 1  ;;  %v727_v24 = vshrl.u32 %v2341_v18, 16  ;;  %v729_v25 = vshll.u32 %v2341_v18, 16  ;;  %v734_v26 = vshll.u32 %v2319_v9, 16  ;;  %1175 = vmatprep.subr.bf16.mxu1 %v2027_v6  ;;  %1006 = vmatpush1.bf16.msra.mxu0 %v1967_v53 }
  0x32   : > { %744 = vrot.lane.b32.xlu1 %v2264_v35, %s2028_s14  ;;  %v719_v30 = vrot.slane %v717_v16, 1  ;;  %v568_v31 = vrot.slane %v566_v54, 7  ;;  %v444_v32 = vstv %s2324_s28  ;;  %v774_v59 = vrot.slane %v2175_v39, 1  ;;  %1007 = vmatprep.subr.bf16.mxu0 %v2027_v6 }
  0x33   : > { %v708_v34 = vor.u32 %v707_v22, %v703_v10  ;;  %v731_v36 = vrot.slane %v729_v25, 1  ;;  %v736_v37 = vrot.slane %v734_v26, 1  ;;  %vm2369_vm5 = vcmp.eq.s32.totalorder %v444_v32, 1 }
  0x34   : > { %v720_v40 = vor.u32 %v719_v30, %v715_v15  ;;  %v571_v41 = vor.u32 %v569_v55, %v568_v31  ;;  %v2364_v35 = vsel %vm2156_vm3, %v568_v31, %v2145_v20  ;;  %v452_v61 = vsel %vm2369_vm5, %v2161_v29, %v1961_v48  ;;  %v1969_v29 = vld [vmem:[%s2734_s4 + $0xb0] sm:$0xff]   ;;  %1176 = vmatpush1.bf16.msra.mxu1 %v1968_v57 }
  0x35   : > { %v713_v45 = vsel %vm641_vm2, %v708_v34, %v712_v12  ;;  %v732_v46 = vor.u32 %v731_v36, %v727_v24  ;;  %v852_v47 = vshll.u32 %v2364_v35, 16  ;;  %v573_v0 = vshrl.u32 %v452_v61, 16  ;;  %1177 = vmatprep.subr.bf16.mxu1 %v2027_v6  ;;  %1008 = vmatpush1.bf16.msra.mxu0 %v1969_v29  ;;  %v1979_v29 = vld [vmem:[%s2734_s4 + $0xe8] sm:$0xff]  }
  0x36   : > { %748 = vrot.lane.b32.xlu1 %v713_v45, %s2028_s14  ;;  %v725_v50 = vsel %vm641_vm2, %v720_v40, %v724_v17  ;;  %v2384_v52 = vsel %vm2156_vm3, %v2114_v7, %v571_v41  ;;  %v576_v1 = vshll.u32 %v452_v61, 16  ;;  %v775_v4 = vrot.slane %v2166_v33, 1  ;;  %v1970_v33 = vld [vmem:[%s2734_s4 + $0x48] sm:$0xff]   ;;  %1009 = vmatprep.subr.bf16.mxu0 %v2027_v6 }
  0x37   : > { %750 = vrot.lane.b32.xlu0 %v725_v50, %s2028_s14  ;;  %v737_v54 = vsel %vm641_vm2, %v732_v46, %v736_v37  ;;  %v845_v55 = vshrl.u32 %v2384_v52, 16  ;;  %v847_v56 = vshll.u32 %v2384_v52, 16  ;;  %v854_v63 = vrot.slane %v852_v47, 1 }
  0x38   : > { %v575_v10 = vrot.slane %v573_v0, 7  ;;  %v2409_v11 = vsel %vm770_vm6, %v774_v59, %v775_v4  ;;  %v771_v17 = vrot.slane %v2251_v23, 1  ;;  %v772_v22 = vrot.slane %v2229_v13, 1  ;;  %v1971_v13 = vld [vmem:[%s2734_s4 + $0xb8] sm:$0xff]   ;;  %1178 = vmatpush1.bf16.msra.mxu1 %v1970_v33  ;;  %v1982_v33 = vld [vmem:[%s2734_s4 + $0x100] sm:$0xff]  }
  0x39   : > { %v849_v62 = vrot.slane %v847_v56, 1  ;;  %v777_v24 = vrot.slane %v2189_v49, 1  ;;  %1787 = vmatprep.mubr.msk.bf16.mxu0 %vm795_vm7, %v2409_v11  ;;  %v778_v25 = vrot.slane %v2180_v42, 1  ;;  %v780_v30 = vrot.slane %v2201_v58, 1  ;;  %1179 = vmatprep.subr.bf16.mxu1 %v2027_v6 }
  0x3a   : > { %752 = vrot.lane.b32.xlu1 %v737_v54, %s2028_s14  ;;  %v578_v15 = vor.u32 %v576_v1, %v575_v10  ;;  %v640_v16 = vsel %vm2156_vm3, %v575_v10, %v2145_v20  ;;  %v781_v31 = vrot.slane %v2194_v51, 1  ;;  %v783_v36 = vrot.slane %v2242_v19, 1  ;;  %1010 = vmatpush1.bf16.msra.mxu0 %v1971_v13  ;;  %v1978_v10 = vld [vmem:[%s2734_s4 + $0xe0] sm:$0xff]  }
  0x3b   : > { %v850_v8 = vor.u32 %v849_v62, %v845_v55  ;;  %v1264_v21 = vshll.u32 %v640_v16, 16  ;;  %v2443_v42 = vsel %vm770_vm6, %v777_v24, %v778_v25  ;;  %v784_v37 = vrot.slane %v2214_v5, 1  ;;  %1378 = vmatprep.subr.bf16.mxu0 %v2027_v6  ;;  %v1985_v24 = vld [vmem:[%s2734_s4 + $0x118] sm:$0xff]  }
  0x3c   : > { %v2427_v20 = vsel %vm2156_vm3, %v2114_v7, %v578_v15  ;;  %v773_v7 = vsel %vm770_vm6, %v771_v17, %v772_v22  ;;  %v2452_v38 = vsel %vm770_vm6, %v780_v30, %v781_v31  ;;  %v786_v40 = vrot.slane %v2313_v3, 1  ;;  %1180 = vmatpush1.bf16.msra.mxu1 %v1972_v28  ;;  %v1981_v15 = vld [vmem:[%s2734_s4 + $0xf8] sm:$0xff]   ;;  %v1983_v17 = vld [vmem:[%s2734_s4 + $0x108] sm:$0xff]   ;;  %v1984_v22 = vld [vmem:[%s2734_s4 + $0x110] sm:$0xff]  }
  0x3d   : > { %v855_v12 = vsel %vm641_vm2, %v850_v8, %v854_v63  ;;  %v1257_v26 = vshrl.u32 %v2427_v20, 16  ;;  %v1259_v27 = vshll.u32 %v2427_v20, 16  ;;  %v1266_v34 = vrot.slane %v1264_v21, 1  ;;  %1807 = vmatprep.mubr.msk.bf16.mxu1 %vm795_vm7, %v773_v7  ;;  %1181 = vmatprep.subr.bf16.mxu1 %v2027_v6  ;;  %v1977_v8 = vld [vmem:[%s2734_s4 + $0xd8] sm:$0xff]  }
  0x3e   : > { %856 = vrot.lane.b32.xlu0 %v855_v12, %s2028_s14  ;;  %v2456_v43 = vsel %vm770_vm6, %v783_v36, %v784_v37  ;;  %v787_v51 = vrot.slane %v2292_v60, 1  ;;  %v789_v5 = vrot.slane %v2331_v14, 1  ;;  %v790_v47 = vrot.slane %v2303_v2, 1  ;;  %v1980_v12 = vld [vmem:[%s2734_s4 + $0xf0] sm:$0xff]  }
  0x3f   : > { %v1261_v32 = vrot.slane %v1259_v27, 1  ;;  %v792_v48 = vrot.slane %v2341_v18, 1  ;;  %v793_v50 = vrot.slane %v2319_v9, 1  ;;  %v860_v54 = vrot.slane %v2384_v52, 1  ;;  %v1973_v9 = vld [vmem:[%s2734_s4 + $0xc0] sm:$0xff]  }
  0x40   : > { %v2467_v46 = vsel %vm770_vm6, %v786_v40, %v787_v51  ;;  %v2472_v60 = vsel %vm770_vm6, %v789_v5, %v790_v47  ;;  %1182 = vmatpush1.bf16.msra.mxu1 %v1974_v44  ;;  %v861_v55 = vrot.slane %v2364_v35, 1  ;;  %v1272_v56 = vrot.slane %v2427_v20, 1  ;;  %v1975_v35 = vld [vmem:[%s2734_s4 + $0xc8] sm:$0xff]  }
  0x41   : > { %v1262_v41 = vor.u32 %v1261_v32, %v1257_v26  ;;  %1873 = vmatprep.subr.bf16.mxu1 %v2027_v6  ;;  %v2478_v53 = vsel %vm770_vm6, %v792_v48, %v793_v50  ;;  %v1273_v57 = vrot.slane %v640_v16, 1 }
  0x42   : > { %v2483_v2 = vsel %vm770_vm6, %v860_v54, %v861_v55 }
  0x43   : > { %v1267_v45 = vsel %vm641_vm2, %v1262_v41, %v1266_v34  ;;  %v2487_v59 = vsel %vm770_vm6, %v1272_v56, %v1273_v57 }
  0x44   : > { %1268 = vrot.lane.b32.xlu1 %v1267_v45, %s2028_s14 }
  0x98   : > { %v741_v61 = vpop.permute.xlu0 %740 }
  0x99   : > { %v800_v62 = vsel %vm795_vm7, %v2175_v39, %v741_v61  ;;  %v1976_v39 = vld [vmem:[%s2734_s4 + $0xd0] sm:$0xff]  }
  0x9a   : > { %1020 = vmatmul.mubr.bf16.vlgmr.msra.gmra.mrb[0].mxu0 %v800_v62 }
  0x9b   : > { %1379 = vmatpush1.bf16.msra.mxu0 %v1973_v9  ;;  %1788 = vmatprep.mubr.msk.bf16.mxu0 %vm795_vm7, %v2443_v42 }
  0x9c   : > { %1380 = vmatprep.subr.bf16.mxu0 %v2027_v6  ;;  %v743_v63 = vpop.permute.xlu0 %742 }
  0x9d   : > { %v2502_v0 = vsel %vm795_vm7, %v2189_v49, %v743_v63 }
  0x9f   : > { %1381 = vmatpush1.bf16.msra.mxu0 %v1975_v35 }
  0xa0   : > { %1382 = vmatprep.subr.bf16.mxu0 %v2027_v6  ;;  %v739_v1 = vpop.permute.xlu1 %738 }
  0xa1   : > { %v797_v4 = vsel %vm795_vm7, %v2251_v23, %v739_v1 }
  0xa2   : > { %1028 = vmatmul.mubr.bf16.gmra.mrb[4].mxu0 %v2502_v0  ;;  %1192 = vmatmul.mubr.bf16.vlgmr.msra.gmra.mrb[0].mxu1 %v797_v4 }
  0xa3   : > { %1383 = vmatpush1.bf16.msra.mxu0 %v1976_v39  ;;  %1808 = vmatprep.mubr.msk.bf16.mxu1 %vm795_vm7, %v2409_v11 }
  0xa4   : > { %1789 = vmatprep.mubr.msk.bf16.mxu0 %vm795_vm7, %v2452_v38  ;;  %v745_v49 = vpop.permute.xlu1 %744  ;;  %1384 = vmatprep.subr.bf16.mxu0 %v2027_v6 }
  0xa5   : > { %1885 = vmatpush1.bf16.msra.mxu1 %v1973_v9  ;;  %v2522_v23 = vsel %vm795_vm7, %v2201_v58, %v745_v49  ;;  %v747_v58 = vpop.permute.xlu0 %746 }
  0xa6   : > { %1874 = vmatprep.subr.bf16.mxu1 %v2027_v6  ;;  %v2541_v11 = vsel %vm795_vm7, %v2242_v19, %v747_v58 }
  0xa7   : > { %1385 = vmatpush1.bf16.msra.mxu0 %v1977_v8 }
  0xa8   : > { %1386 = vmatprep.subr.bf16.mxu0 %v2027_v6  ;;  %v749_v19 = vpop.permute.xlu1 %748 }
  0xa9   : > { %1886 = vmatpush1.bf16.msra.mxu1 %v1975_v35  ;;  %v812_v16 = vsel %vm795_vm7, %v2313_v3, %v749_v19  ;;  %v751_v3 = vpop.permute.xlu0 %750 }
  0xaa   : > { %1036 = vmatmul.mubr.bf16.gmra.mrb[8].mxu0 %v2522_v23  ;;  %1875 = vmatprep.subr.bf16.mxu1 %v2027_v6  ;;  %v815_v21 = vsel %vm795_vm7, %v2331_v14, %v751_v3 }
  0xab   : > { %1200 = vmatmul.mubr.bf16.gmra.mrb[4].mxu1 %v800_v62  ;;  %1387 = vmatpush1.bf16.msra.mxu0 %v1978_v10 }
  0xac   : > { %1809 = vmatprep.mubr.msk.bf16.mxu1 %vm795_vm7, %v2443_v42  ;;  %1790 = vmatprep.mubr.msk.bf16.mxu0 %vm795_vm7, %v2456_v43  ;;  %v753_v14 = vpop.permute.xlu1 %752 }
  0xad   : > { %1388 = vmatprep.subr.bf16.mxu0 %v2027_v6  ;;  %1887 = vmatpush1.bf16.msra.mxu1 %v1976_v39  ;;  %v818_v25 = vsel %vm795_vm7, %v2341_v18, %v753_v14 }
  0xae   : > { %1876 = vmatprep.subr.bf16.mxu1 %v2027_v6 }
  0xaf   : > { %1389 = vmatpush1.bf16.msra.mxu0 %v1979_v29 }
  0xb0   : > { %1390 = vmatprep.subr.bf16.mxu0 %v2027_v6  ;;  %v857_v26 = vpop.permute.xlu0 %856 }
  0xb1   : > { %1888 = vmatpush1.bf16.msra.mxu1 %v1977_v8  ;;  %v864_v27 = vsel %vm795_vm7, %v2384_v52, %v857_v26 }
  0xb2   : > { %1044 = vmatmul.mubr.bf16.gmra.mrb[12].mxu0 %v2541_v11  ;;  %1877 = vmatprep.subr.bf16.mxu1 %v2027_v6 }
  0xb3   : > { %1208 = vmatmul.mubr.bf16.gmra.mrb[8].mxu1 %v2502_v0  ;;  %1791 = vmatprep.mubr.msk.bf16.mxu0 %vm795_vm7, %v2467_v46 }
  0xb4   : > { %1810 = vmatprep.mubr.msk.bf16.mxu1 %vm795_vm7, %v2452_v38  ;;  %1391 = vmatpush1.bf16.msra.mxu0 %v1980_v12 }
  0xb5   : > { %1889 = vmatpush1.bf16.msra.mxu1 %v1978_v10  ;;  %1392 = vmatprep.subr.bf16.mxu0 %v2027_v6 }
  0xb6   : > { %1878 = vmatprep.subr.bf16.mxu1 %v2027_v6 }
  0xb8   : > { %1393 = vmatpush1.bf16.msra.mxu0 %v1981_v15 }
  0xb9   : > { %1890 = vmatpush1.bf16.msra.mxu1 %v1979_v29  ;;  %1394 = vmatprep.subr.bf16.mxu0 %v2027_v6 }
  0xba   : > { %1052 = vmatmul.mubr.bf16.gmra.mrb[16].mxu0 %v812_v16  ;;  %1879 = vmatprep.subr.bf16.mxu1 %v2027_v6 }
  0xbb   : > { %1216 = vmatmul.mubr.bf16.gmra.mrb[12].mxu1 %v2522_v23  ;;  %1792 = vmatprep.mubr.msk.bf16.mxu0 %vm795_vm7, %v2472_v60 }
  0xbc   : > { %1811 = vmatprep.mubr.msk.bf16.mxu1 %vm795_vm7, %v2456_v43  ;;  %1395 = vmatpush1.bf16.msra.mxu0 %v1982_v33 }
  0xbd   : > { %1891 = vmatpush1.bf16.msra.mxu1 %v1980_v12  ;;  %1396 = vmatprep.subr.bf16.mxu0 %v2027_v6 }
  0xbe   : > { %1880 = vmatprep.subr.bf16.mxu1 %v2027_v6 }
  0xc0   : > { %1397 = vmatpush1.bf16.msra.mxu0 %v1983_v17 }
  0xc1   : > { %1892 = vmatpush1.bf16.msra.mxu1 %v1981_v15  ;;  %1398 = vmatprep.subr.bf16.mxu0 %v2027_v6 }
  0xc2   : > { %1060 = vmatmul.mubr.bf16.gmra.mrb[20].mxu0 %v815_v21  ;;  %1881 = vmatprep.subr.bf16.mxu1 %v2027_v6 }
  0xc3   : > { %1224 = vmatmul.mubr.bf16.gmra.mrb[16].mxu1 %v2541_v11  ;;  %1793 = vmatprep.mubr.msk.bf16.mxu0 %vm795_vm7, %v2478_v53 }
  0xc4   : > { %1812 = vmatprep.mubr.msk.bf16.mxu1 %vm795_vm7, %v2467_v46  ;;  %1399 = vmatpush1.bf16.msra.mxu0 %v1984_v22 }
  0xc5   : > { %1893 = vmatpush1.bf16.msra.mxu1 %v1982_v33  ;;  %1400 = vmatprep.subr.bf16.mxu0 %v2027_v6 }
  0xc6   : > { %1882 = vmatprep.subr.bf16.mxu1 %v2027_v6 }
  0xc8   : > { %1401 = vmatpush1.bf16.msra.mxu0 %v1985_v24 }
  0xc9   : > { %1894 = vmatpush1.bf16.msra.mxu1 %v1983_v17 }
  0xca   : > { %1068 = vmatmul.mubr.bf16.gmra.mrb[24].mxu0 %v818_v25  ;;  %1883 = vmatprep.subr.bf16.mxu1 %v2027_v6 }
  0xcb   : > { %1232 = vmatmul.mubr.bf16.gmra.mrb[20].mxu1 %v812_v16  ;;  %1794 = vmatprep.mubr.msk.bf16.mxu0 %vm795_vm7, %v2483_v2 }
  0xcc   : > { %1813 = vmatprep.mubr.msk.bf16.mxu1 %vm795_vm7, %v2472_v60 }
  0xcd   : > { %1895 = vmatpush1.bf16.msra.mxu1 %v1984_v22 }
  0xce   : > { %1884 = vmatprep.subr.bf16.mxu1 %v2027_v6  ;;  %v1269_v6 = vpop.permute.xlu1 %1268 }
  0xcf   : > { %v1276_v18 = vsel %vm795_vm7, %v2427_v20, %v1269_v6 }
  0xd1   : > { %1896 = vmatpush1.bf16.msra.mxu1 %v1985_v24 }
  0xd2   : > { %1076 = vmatmul.mubr.bf16.gmra.mrb[28].mxu0 %v864_v27 }
  0xd3   : > { %1240 = vmatmul.mubr.bf16.gmra.mrb[24].mxu1 %v815_v21  ;;  %1851 = vmatprep.mubr.msk.bf16.mxu0 %vm795_vm7, %v2443_v42 }
  0xd4   : > { %1814 = vmatprep.mubr.msk.bf16.mxu1 %vm795_vm7, %v2478_v53 }
  0xda   : > { %1411 = vmatmul.mubr.bf16.vlgmr.msra.gmra.mrb[32].mxu0 %v2502_v0 }
  0xdb   : > { %1248 = vmatmul.mubr.bf16.gmra.mrb[28].mxu1 %v818_v25  ;;  %1852 = vmatprep.mubr.msk.bf16.mxu0 %vm795_vm7, %v2452_v38 }
  0xdc   : > { %1855 = vmatprep.mubr.msk.bf16.mxu1 %vm795_vm7, %v2472_v60 }
  0xe2   : > { %1419 = vmatmul.mubr.bf16.gmra.mrb[36].mxu0 %v2522_v23 }
  0xe3   : > { %1443 = vmatmul.mubr.bf16.vlgmr.msra.gmra.mrb[32].mxu1 %v815_v21  ;;  %1853 = vmatprep.mubr.msk.bf16.mxu0 %vm795_vm7, %v2456_v43 }
  0xe4   : > { %1856 = vmatprep.mubr.msk.bf16.mxu1 %vm795_vm7, %v2478_v53 }
  0xea   : > { %1427 = vmatmul.mubr.bf16.gmra.mrb[40].mxu0 %v2541_v11 }
  0xeb   : > { %1451 = vmatmul.mubr.bf16.gmra.mrb[36].mxu1 %v818_v25  ;;  %1854 = vmatprep.mubr.msk.bf16.mxu0 %vm795_vm7, %v2467_v46 }
  0xec   : > { %1857 = vmatprep.mubr.msk.bf16.mxu1 %vm795_vm7, %v2483_v2 }
  0xf2   : > { %1435 = vmatmul.mubr.bf16.gmra.mrb[44].mxu0 %v812_v16 }
  0xf3   : > { %1459 = vmatmul.mubr.bf16.gmra.mrb[40].mxu1 %v864_v27 }
  0xf4   : > { %1858 = vmatprep.mubr.msk.bf16.mxu1 %vm795_vm7, %v2487_v59 }
  0xfb   : > { %1467 = vmatmul.mubr.bf16.gmra.mrb[44].mxu1 %v1276_v18 }
 0x16d   : > { %v1021_v52 = vpop.f32.mrb[0].mxu0 }
 0x16e   : > { %v1023_v13 = vpop.f32.mrb[1].mxu0 }
 0x16f   : > { %v1024_v28 = vpop.f32.mrb[2].mxu0 }
 0x170   : > { %v1026_v7 = vpop.f32.mrb[3].mxu0 }
 0x175   : > { %v1029_v42 = vpop.f32.mrb[4].mxu0  ;;  %v1193_v30 = vpop.f32.mrb[0].mxu1 }
 0x176   : > { %v1031_v31 = vpop.f32.mrb[5].mxu0  ;;  %v2626_v32 = vadd.f32 %v1193_v30, %v1021_v52  ;;  %v1195_v34 = vpop.f32.mrb[1].mxu1 }
 0x177   : > { %v1032_v36 = vpop.f32.mrb[6].mxu0  ;;  %v1196_v37 = vpop.f32.mrb[2].mxu1 }
 0x178   : > { %v1034_v38 = vpop.f32.mrb[7].mxu0  ;;  %v2628_v40 = vadd.f32 %v1196_v37, %v1024_v28  ;;  %v1198_v41 = vpop.f32.mrb[3].mxu1 }
 0x17d   : > { %v1037_v43 = vpop.f32.mrb[8].mxu0 }
 0x17e   : > { %v1201_v51 = vpop.f32.mrb[4].mxu1  ;;  %v1039_v20 = vpop.f32.mrb[9].mxu0 }
 0x17f   : > { %v2630_v44 = vadd.f32 %v1201_v51, %v1029_v42  ;;  %v1203_v5 = vpop.f32.mrb[5].mxu1  ;;  %v1040_v45 = vpop.f32.mrb[10].mxu0 }
 0x180   : > { %v1204_v46 = vpop.f32.mrb[6].mxu1  ;;  %v1042_v47 = vpop.f32.mrb[11].mxu0 }
 0x181   : > { %v2632_v60 = vadd.f32 %v1204_v46, %v1032_v36  ;;  %v1206_v48 = vpop.f32.mrb[7].mxu1 }
 0x185   : > { %v1045_v50 = vpop.f32.mrb[12].mxu0 }
 0x186   : > { %v1209_v53 = vpop.f32.mrb[8].mxu1  ;;  %v1047_v54 = vpop.f32.mrb[13].mxu0 }
 0x187   : > { %v2634_v55 = vadd.f32 %v1209_v53, %v1037_v43  ;;  %v1211_v2 = vpop.f32.mrb[9].mxu1  ;;  %v1048_v56 = vpop.f32.mrb[14].mxu0  ;;  %v2657_v54 = vld [vmem:[%s2735_s5] ss:$0 sm:$0xff] }
 0x188   : > { %v1212_v57 = vpop.f32.mrb[10].mxu1  ;;  %v1050_v59 = vpop.f32.mrb[15].mxu0 }
 0x189   : > { %v2636_v9 = vadd.f32 %v1212_v57, %v1040_v45  ;;  %v1214_v61 = vpop.f32.mrb[11].mxu1 }
 0x18d   : > { %v1053_v62 = vpop.f32.mrb[16].mxu0 }
 0x18e   : > { %v1217_v35 = vpop.f32.mrb[12].mxu1  ;;  %v1055_v63 = vpop.f32.mrb[17].mxu0 }
 0x18f   : > { %v2638_v0 = vadd.f32 %v1217_v35, %v1045_v50  ;;  %v1219_v39 = vpop.f32.mrb[13].mxu1  ;;  %v1056_v1 = vpop.f32.mrb[18].mxu0 }
 0x190   : > { %v1220_v4 = vpop.f32.mrb[14].mxu1  ;;  %v1058_v8 = vpop.f32.mrb[19].mxu0 }
 0x191   : > { %v2640_v49 = vadd.f32 %v1220_v4, %v1048_v56  ;;  %v1222_v23 = vpop.f32.mrb[15].mxu1 }
 0x195   : > { %v1061_v10 = vpop.f32.mrb[20].mxu0 }
 0x196   : > { %v1225_v29 = vpop.f32.mrb[16].mxu1  ;;  %v1063_v58 = vpop.f32.mrb[21].mxu0 }
 0x197   : > { %v1226_v11 = vadd.f32 %v1225_v29, %v1053_v62  ;;  %v1227_v12 = vpop.f32.mrb[17].mxu1  ;;  %v1064_v19 = vpop.f32.mrb[22].mxu0 }
 0x198   : > { %v1228_v15 = vpop.f32.mrb[18].mxu1  ;;  %v1066_v16 = vpop.f32.mrb[23].mxu0 }
 0x199   : > { %v1229_v33 = vadd.f32 %v1228_v15, %v1056_v1  ;;  %v1230_v3 = vpop.f32.mrb[19].mxu1 }
 0x19d   : > { %v1069_v17 = vpop.f32.mrb[24].mxu0 }
 0x19e   : > { %v1233_v21 = vpop.f32.mrb[20].mxu1  ;;  %v1071_v22 = vpop.f32.mrb[25].mxu0 }
 0x19f   : > { %v1234_v14 = vadd.f32 %v1233_v21, %v1061_v10  ;;  %v1235_v24 = vpop.f32.mrb[21].mxu1  ;;  %v1072_v25 = vpop.f32.mrb[26].mxu0 }
 0x1a0   : > { %v1236_v26 = vpop.f32.mrb[22].mxu1  ;;  %v1074_v27 = vpop.f32.mrb[27].mxu0 }
 0x1a1   : > { %v2642_v6 = vadd.f32 %v1236_v26, %v1064_v19  ;;  %v1238_v18 = vpop.f32.mrb[23].mxu1 }
 0x1a5   : > { %v1077_v52 = vpop.f32.mrb[28].mxu0 }
 0x1a6   : > { %v1241_v13 = vpop.f32.mrb[24].mxu1  ;;  %v1079_v28 = vpop.f32.mrb[29].mxu0 }
 0x1a7   : > { %v2644_v7 = vadd.f32 %v1241_v13, %v1069_v17  ;;  %v1243_v42 = vpop.f32.mrb[25].mxu1  ;;  %v1080_v30 = vpop.f32.mrb[30].mxu0 }
 0x1a8   : > { %v1244_v31 = vpop.f32.mrb[26].mxu1  ;;  %v1082_v34 = vpop.f32.mrb[31].mxu0 }
 0x1a9   : > { %v2646_v36 = vadd.f32 %v1244_v31, %v1072_v25  ;;  %v1246_v37 = vpop.f32.mrb[27].mxu1 }
 0x1ad   : > { %v1412_v38 = vpop.f32.mrb[32].mxu0 }
 0x1ae   : > { %v1249_v41 = vpop.f32.mrb[28].mxu1  ;;  %v1475_v43 = vadd.f32 %v1412_v38, %v2626_v32  ;;  %v1414_v51 = vpop.f32.mrb[33].mxu0 }
 0x1af   : > { %v2649_v20 = vadd.f32 %v1249_v41, %v1077_v52  ;;  %v1251_v5 = vpop.f32.mrb[29].mxu1  ;;  %v1415_v45 = vpop.f32.mrb[34].mxu0 }
 0x1b0   : > { %v1252_v46 = vpop.f32.mrb[30].mxu1  ;;  %v1476_v47 = vadd.f32 %v1415_v45, %v2628_v40  ;;  %v1417_v48 = vpop.f32.mrb[35].mxu0  ;;  %v1498_v32 = vadd.f32 %v2657_v54, %v1475_v43 }
 0x1b1   : > { %v2652_v50 = vadd.f32 %v1252_v46, %v1080_v30  ;;  %v1254_v53 = vpop.f32.mrb[31].mxu1 }
 0x1b2   : > { %v1499_v35 = vadd.f32 %v2657_v54, %v1476_v47  ;;  %v1514_v10 = vmax.f32 %v1498_v32, 0.0 }
 0x1b5   : > { %v1420_v2 = vpop.f32.mrb[36].mxu0 }
 0x1b6   : > { %v1444_v56 = vpop.f32.mrb[32].mxu1  ;;  %v1477_v57 = vadd.f32 %v1420_v2, %v2630_v44  ;;  %v1422_v59 = vpop.f32.mrb[37].mxu0  ;;  %v1515_v44 = vmax.f32 %v1499_v35, 0.0 }
 0x1b7   : > { %v1483_v61 = vadd.f32 %v1444_v56, %v1226_v11  ;;  %v1446_v62 = vpop.f32.mrb[33].mxu1  ;;  %v1423_v40 = vpop.f32.mrb[38].mxu0 }
 0x1b8   : > { %v1447_v63 = vpop.f32.mrb[34].mxu1  ;;  %v1500_v39 = vadd.f32 %v2657_v54, %v1477_v57  ;;  %v1478_v1 = vadd.f32 %v1423_v40, %v2632_v60  ;;  %v1425_v4 = vpop.f32.mrb[39].mxu0 }
 0x1b9   : > { %v1484_v8 = vadd.f32 %v1447_v63, %v1229_v33  ;;  %v1449_v23 = vpop.f32.mrb[35].mxu1  ;;  %v1506_v3 = vadd.f32 %v2657_v54, %v1483_v61 }
 0x1ba   : > { %v1516_v29 = vmax.f32 %v1500_v39, 0.0  ;;  %v1501_v58 = vadd.f32 %v2657_v54, %v1478_v1 }
 0x1bb   : > { %v1507_v27 = vadd.f32 %v2657_v54, %v1484_v8  ;;  %v1522_v13 = vmax.f32 %v1506_v3, 0.0 }
 0x1bc   : > { %v1530_v11 = vmax.f32 %v1514_v10, %v1516_v29  ;;  %v1517_v12 = vmax.f32 %v1501_v58, 0.0 }
 0x1bd   : > { %v1428_v19 = vpop.f32.mrb[40].mxu0  ;;  %v1523_v42 = vmax.f32 %v1507_v27, 0.0 }
 0x1be   : > { %1532 = vst.msk [vmem:[#allocation2] sm:$0xff] %vm795_vm7, %v1530_v11  ;;  %v1531_v60 = vmax.f32 %v1515_v44, %v1517_v12  ;;  %v1452_v15 = vpop.f32.mrb[36].mxu1  ;;  %v1479_v16 = vadd.f32 %v1428_v19, %v2634_v55  ;;  %v1430_v33 = vpop.f32.mrb[41].mxu0 }
 0x1bf   : > { %v1485_v17 = vadd.f32 %v1452_v15, %v1234_v14  ;;  %v1454_v21 = vpop.f32.mrb[37].mxu1  ;;  %v1431_v22 = vpop.f32.mrb[42].mxu0 }
 0x1c0   : > { %1533 = vst.msk [vmem:[#allocation2 + $0x8] sm:$0xff] %vm795_vm7, %v1531_v60  ;;  %v1455_v24 = vpop.f32.mrb[38].mxu1  ;;  %v1480_v25 = vadd.f32 %v1431_v22, %v2636_v9  ;;  %v1433_v26 = vpop.f32.mrb[43].mxu0  ;;  %v1502_v9 = vadd.f32 %v2657_v54, %v1479_v16 }
 0x1c1   : > { %v1508_v18 = vadd.f32 %v2657_v54, %v1485_v17  ;;  %v1486_v55 = vadd.f32 %v1455_v24, %v2642_v6  ;;  %v1457_v52 = vpop.f32.mrb[39].mxu1 }
 0x1c2   : > { %v1503_v47 = vadd.f32 %v2657_v54, %v1480_v25 }
 0x1c3   : > { %v1524_v14 = vmax.f32 %v1508_v18, 0.0  ;;  %v1509_v28 = vadd.f32 %v2657_v54, %v1486_v55 }
 0x1c4   : > { %v1519_v40 = vmax.f32 %v1503_v47, 0.0 }
 0x1c5   : > { %v1551_v30 = vmax.f32 %v1522_v13, %v1524_v14  ;;  %v1525_v31 = vmax.f32 %v1509_v28, 0.0  ;;  %v1436_v34 = vpop.f32.mrb[44].mxu0 }
 0x1c6   : > { %v1460_v37 = vpop.f32.mrb[40].mxu1  ;;  %v1481_v38 = vadd.f32 %v1436_v34, %v2638_v0  ;;  %v1438_v41 = vpop.f32.mrb[45].mxu0 }
 0x1c7   : > { %v1552_v43 = vmax.f32 %v1523_v42, %v1525_v31  ;;  %v1487_v6 = vadd.f32 %v1460_v37, %v2644_v7  ;;  %v1462_v51 = vpop.f32.mrb[41].mxu1  ;;  %v1534_v5 = vld [vmem:[#allocation2] ss:$2 sm:$0xff]  ;;  %v1536_v45 = vld [vmem:[#allocation2 + $0x1] ss:$2 sm:$0xff]  ;;  %v1439_v46 = vpop.f32.mrb[46].mxu0 }
 0x1c8   : > { %v1463_v48 = vpop.f32.mrb[42].mxu1  ;;  %v1504_v53 = vadd.f32 %v2657_v54, %v1481_v38  ;;  %v1537_v2 = vmax.f32 %v1534_v5, %v1536_v45  ;;  %v1482_v32 = vadd.f32 %v1439_v46, %v2640_v49  ;;  %v1441_v56 = vpop.f32.mrb[47].mxu0  ;;  %v1518_v7 = vmax.f32 %v1502_v9, 0.0 }
 0x1c9   : > { %v1488_v57 = vadd.f32 %v1463_v48, %v2646_v36  ;;  %v1465_v0 = vpop.f32.mrb[43].mxu1  ;;  %v1510_v39 = vadd.f32 %v2657_v54, %v1487_v6 }
 0x1ca   : > { %v1520_v59 = vmax.f32 %v1504_v53, 0.0  ;;  %v1538_v61 = vpack.c.bf16 %v1537_v2, %v1537_v2  ;;  %v1505_v62 = vadd.f32 %v2657_v54, %v1482_v32 }
 0x1cb   : > { %v1511_v23 = vadd.f32 %v2657_v54, %v1488_v57  ;;  %v1526_v44 = vmax.f32 %v1510_v39, 0.0 }
 0x1cc   : > { %1540 = vst.msk [vmem:[%s2692_s18] sm:$0xf] %vm1539_vm8, %v1538_v61  ;;  %v1541_v49 = vmax.f32 %v1518_v7, %v1520_v59  ;;  %v1521_v35 = vmax.f32 %v1505_v62, 0.0 }
 0x1cd   : > { %v1527_v19 = vmax.f32 %v1511_v23, 0.0 }
 0x1ce   : > { %1543 = vst.msk [vmem:[#allocation2] sm:$0xff] %vm795_vm7, %v1541_v49  ;;  %v1542_v36 = vmax.f32 %v1519_v40, %v1521_v35  ;;  %v1468_v63 = vpop.f32.mrb[44].mxu1 }
 0x1cf   : > { %v1489_v1 = vadd.f32 %v1468_v63, %v2649_v20  ;;  %v1470_v4 = vpop.f32.mrb[45].mxu1 }
 0x1d0   : > { %1544 = vst.msk [vmem:[#allocation2 + $0x8] sm:$0xff] %vm795_vm7, %v1542_v36  ;;  %v1471_v8 = vpop.f32.mrb[46].mxu1 }
 0x1d1   : > { %v1512_v10 = vadd.f32 %v2657_v54, %v1489_v1  ;;  %v1490_v29 = vadd.f32 %v1471_v8, %v2652_v50  ;;  %v1473_v58 = vpop.f32.mrb[47].mxu1 }
 0x1d3   : > { %v1528_v11 = vmax.f32 %v1512_v10, 0.0  ;;  %v1513_v12 = vadd.f32 %v2657_v54, %v1490_v29 }
 0x1d5   : > { %v1561_v60 = vmax.f32 %v1526_v44, %v1528_v11  ;;  %v1529_v20 = vmax.f32 %v1513_v12, 0.0 }
 0x1d7   : > { %v1545_v15 = vld [vmem:[#allocation2] ss:$2 sm:$0xff]  ;;  %v1546_v16 = vld [vmem:[#allocation2 + $0x1] ss:$2 sm:$0xff]  ;;  %v1562_v33 = vmax.f32 %v1527_v19, %v1529_v20 }
 0x1d8   : > { %v1547_v3 = vmax.f32 %v1545_v15, %v1546_v16  ;;  %1553 = vst.msk [vmem:[#allocation2] sm:$0xff] %vm795_vm7, %v1551_v30  ;;  %1554 = vst.msk [vmem:[#allocation2 + $0x8] sm:$0xff] %vm795_vm7, %v1552_v43 }
 0x1da   : > { %v1548_v17 = vpack.c.bf16 %v1547_v3, %v1547_v3 }
 0x1dc   : > { %1860 = vst.msk [vmem:[%s2692_s18 + $0x4] sm:$0xf] %vm1539_vm8, %v1548_v17 }
 0x1df   : > { %v1555_v50 = vld [vmem:[#allocation2] ss:$2 sm:$0xff]  ;;  %v1556_v21 = vld [vmem:[#allocation2 + $0x1] ss:$2 sm:$0xff] }
 0x1e0   : > { %v1557_v22 = vmax.f32 %v1555_v50, %v1556_v21  ;;  %1563 = vst.msk [vmem:[#allocation2] sm:$0xff] %vm795_vm7, %v1561_v60  ;;  %1564 = vst.msk [vmem:[#allocation2 + $0x8] sm:$0xff] %vm795_vm7, %v1562_v33 }
 0x1e2   : > { %v1558_v54 = vpack.c.bf16 %v1557_v22, %v1557_v22 }
 0x1e4   : > { %1861 = vst.msk [vmem:[%s2692_s18 + $0x8] sm:$0xf] %vm1539_vm8, %v1558_v54 }
 0x1e7   : > { %v1565_v24 = vld [vmem:[#allocation2] ss:$2 sm:$0xff]  ;;  %v1566_v25 = vld [vmem:[#allocation2 + $0x1] ss:$2 sm:$0xff] }
 0x1e8   : > { %v1567_v26 = vmax.f32 %v1565_v24, %v1566_v25 }
 0x1ea   : > { %v1568_v27 = vpack.c.bf16 %v1567_v26, %v1567_v26 }
 0x1ec   : > { %1862 = vst.msk [vmem:[%s2692_s18 + $0xc] sm:$0xf] %vm1539_vm8, %v1568_v27 }
 0x1ed PF: > { %s16_s25 = sadd.s32 1, %s2024_s25   ;;  %s2743_s21 = smov %s2016_s23 }
 0x1ee   : > { %p13_p13 = scmp.ge.s32.totalorder %s16_s25, 10   ;;  %s2744_s22 = smov %s2020_s24 }
 0x1ef   : > { %s2745_s23 = smov %s2748_s26  ;;  %s2746_s24 = smov %s2752_s27 }
 0x1f0   :  { %15 = sbr.rel (!%p13_p13) target bundleno = 3 (0x3), region = 86 }

// kernel: _lambda_.9
= control target key start
LH: loop header
LB: loop body
LE: loop exit
PB: predicated region body
PF: predicated region fallthrough
CT: control target
= control target key end

     0   :  { %vm15_vm0 = vcmask 392192   ;;  %v49_v0 = vmov 0.0   ;;  %s104_s0 = inlined_call_operand.vmem [shape: f32[32,48], index: 0, kind: input, shape index: {}]   ;;  %s105_s1 = inlined_call_operand.vmem [shape: f32[32,48], index: 1, kind: input, shape index: {}]   ;;  %s106_s2 = inlined_call_operand.vmem [shape: f32[8,48], index: 2, kind: output, shape index: {}]  }
   0x1   :  { %16 = vst.msk [vmem:[%s106_s2] sm:$0xff] %vm15_vm0, %v49_v0  ;;  %v17_v1 = vld [vmem:[%s104_s0] sm:$0xff]  ;;  %v18_v2 = vld [vmem:[%s104_s0 + $0x8] sm:$0xff]  ;;  %v19_v3 = vld [vmem:[%s104_s0 + $0x10] sm:$0xff] }
   0x2   :  { %v20_v4 = vld [vmem:[%s104_s0 + $0x18] sm:$0xff]  ;;  %v21_v5 = vld [vmem:[%s105_s1] sm:$0xff]  ;;  %v22_v6 = vld [vmem:[%s105_s1 + $0x8] sm:$0xff] }
   0x3   :  { %v23_v7 = vld [vmem:[%s105_s1 + $0x10] sm:$0xff]  ;;  %v24_v8 = vld [vmem:[%s105_s1 + $0x18] sm:$0xff]  ;;  %v25_v9 = vsub.f32 %v17_v1, %v21_v5  ;;  %v26_v10 = vsub.f32 %v18_v2, %v22_v6 }
   0x4   :  { %v27_v11 = vsub.f32 %v19_v3, %v23_v7  ;;  %v28_v12 = vsub.f32 %v20_v4, %v24_v8 }
   0x5   :  { %v29_v13 = vand.u32 2147483647, %v25_v9  ;;  %v30_v14 = vand.u32 2147483647, %v26_v10 }
   0x6   :  { %v31_v15 = vand.u32 2147483647, %v27_v11  ;;  %v32_v16 = vand.u32 2147483647, %v28_v12 }
   0x7   :  { %v35_v17 = vsel %vm15_vm0, %v29_v13, 0.0  ;;  %v36_v18 = vsel %vm15_vm0, %v30_v14, 0.0 }
   0x8   :  { %v37_v19 = vadd.f32 %v36_v18, %v35_v17  ;;  %v38_v20 = vsel %vm15_vm0, %v31_v15, 0.0  ;;  %v40_v21 = vsel %vm15_vm0, %v32_v16, 0.0  ;;  %v33_v23 = vld [vmem:[%s106_s2] sm:$0xff] }
   0xa   :  { %v39_v22 = vadd.f32 %v38_v20, %v37_v19 }
   0xc   :  { %v41_v24 = vadd.f32 %v40_v21, %v39_v22 }
   0xe   :  { %v42_v25 = vadd.f32 %v41_v24, %v33_v23 }
  0x10   :  { %43 = vst.msk [vmem:[%s106_s2] sm:$0xff] %vm15_vm0, %v42_v25 }

// kernel: _lambda_.8
= control target key start
LH: loop header
LB: loop body
LE: loop exit
PB: predicated region body
PF: predicated region fallthrough
CT: control target
= control target key end

     0   :  { %s3813_s23 = smov 0   ;;  %s3815_s24 = smov 0   ;;  %s4786_s0 = inlined_call_operand.vmem [shape: bf16[4,8,8,128], index: 0, kind: input, shape index: {}, may-alias: {0,1,2,3,4,5}]   ;;  %s4787_s1 = inlined_call_operand.vmem [shape: bf16[4,8,8,128], index: 1, kind: input, shape index: {}, may-alias: {0,1,2,3,4,5}]   ;;  %s4788_s2 = inlined_call_operand.vmem [shape: bf16[4,8,8,128], index: 2, kind: input, shape index: {}, may-alias: {0,1,2,3,4,5}]   ;;  %s4789_s3 = inlined_call_operand.vmem [shape: bf16[4,8,8,128], index: 3, kind: input, shape index: {}, may-alias: {0,1,2,3,4,5}]   ;;  %s4790_s4 = inlined_call_operand.vmem [shape: bf16[4,8,8,128], index: 4, kind: input, shape index: {}, may-alias: {0,1,2,3,4,5}]   ;;  %s4791_s5 = inlined_call_operand.vmem [shape: bf16[4,8,8,128], index: 5, kind: input, shape index: {}, may-alias: {0,1,2,3,4,5}]   ;;  %s4792_s6 = inlined_call_operand.vmem [shape: bf16[3,384,128], index: 6, kind: input, shape index: {}]   ;;  %s4793_s7 = inlined_call_operand.vmem [shape: f32[2,8,128], index: 7, kind: output, shape index: {}]  }
   0x1   :  { %s3817_s2 = smov 0  }
   0x2 LB: > { %s29_s3 = sadd.s32 1, %s3766_s24  ;;  %p2806_p0 = scmp.ge.s32.totalorder %s3770_s2, 1  ;;  %s3770_s2 = sphi %s3817_s2, %s17_s2   ;;  %s3766_s24 = sphi %s3815_s24, %s4863_s24   ;;  %s3762_s23 = sphi %s3813_s23, %s4862_s23  }
   0x3   : > { %p31_p1 = scmp.ge.s32.totalorder %s29_s3, 2  ;;  %p409_p2 = scmp.lt.s32.totalorder %s3770_s2, 3 }
   0x5   : > { %s4865_s3 = smov (%p31_p1, %s29_s3), 0  ;;  %p410_p3 = pnand %p2806_p0, %p409_p2 }
   0x7   : > { %413 = sbr.rel (%p410_p3) target bundleno = 460 (0x1cc), region = 48 }
   0xe   : > { %v3634_v0 = vld [vmem:[%s4792_s6 + $0x100] sm:$0xff]   ;;  %v3637_v3 = vld [vmem:[%s4792_s6 + $0x108] sm:$0xff]   ;;  %v3640_v6 = vld [vmem:[%s4792_s6 + $0x110] sm:$0xff]   ;;  %p521_p4 = scmp.lt.s32.totalorder %s3762_s23, 3  ;;  %vm729_vm0 = vcmask 1040384   ;;  %vm742_vm1 = vcmask 1044480  }
   0xf   : > { %v3635_v1 = vld [vmem:[%s4792_s6 + $0x140] sm:$0xff]   ;;  %3072 = vmatprep.subr.bf16.mxu0 %v3634_v0  ;;  %v3638_v4 = vld [vmem:[%s4792_s6 + $0x148] sm:$0xff]   ;;  %v3641_v7 = vld [vmem:[%s4792_s6 + $0x150] sm:$0xff]   ;;  %vm730_vm2 = vsmask.f32 256  ;;  %v3772_v43 = vmov 0  }
  0x10   : > { %v3636_v2 = vld [vmem:[%s4792_s6 + $0xc0] sm:$0xff]   ;;  %3384 = vmatprep.subr.bf16.mxu1 %v3635_v1  ;;  %v3639_v5 = vld [vmem:[%s4792_s6 + $0xc8] sm:$0xff]   ;;  %v3642_v8 = vld [vmem:[%s4792_s6 + $0xd0] sm:$0xff]   ;;  %s522_s29 = scalar_select %p521_p4, %s3762_s23, 3  ;;  %vm743_vm3 = vsmask.f32 4352  ;;  %v2820_v44 = vcombine.low %v3772_v43, %v3772_v43 }
  0x11   : > { %3073 = vmatpush3.bf16.msra.mxu0 %v3636_v2  ;;  %3385 = vmatpush3.bf16.msra.mxu1 %v3635_v1  ;;  %v3643_v9 = vld [vmem:[%s4792_s6 + $0x118] sm:$0xff]   ;;  %v3646_v12 = vld [vmem:[%s4792_s6 + $0x120] sm:$0xff]   ;;  %v3649_v15 = vld [vmem:[%s4792_s6 + $0x128] sm:$0xff]   ;;  %s564_s12 = sadd.s32 2, %s3762_s23  ;;  %p594_p6 = scmp.lt.s32.totalorder %s3762_s23, 1 }
  0x12   : > { %3074 = vmatprep.subr.bf16.mxu0 %v3637_v3  ;;  %3386 = vmatprep.subr.bf16.mxu1 %v3638_v4  ;;  %v3644_v10 = vld [vmem:[%s4792_s6 + $0x158] sm:$0xff]   ;;  %v3647_v13 = vld [vmem:[%s4792_s6 + $0x160] sm:$0xff]   ;;  %v3650_v16 = vld [vmem:[%s4792_s6 + $0x168] sm:$0xff]   ;;  %s3065_s13 = sshll.u32 %s522_s29, 5  ;;  %v650_v57 = vshrl.u32 %v2820_v44, 16  ;;  %v653_v3 = vshll.u32 %v2820_v44, 16 }
  0x13   : > { %v3645_v11 = vld [vmem:[%s4792_s6 + $0xd8] sm:$0xff]   ;;  %v3648_v14 = vld [vmem:[%s4792_s6 + $0xe0] sm:$0xff]   ;;  %v3651_v17 = vld [vmem:[%s4792_s6 + $0xe8] sm:$0xff]   ;;  %s3898_s22 = scalar_lea.vmem %s4787_s1, %s3065_s13  ;;  %p566_p5 = scmp.lt.s32.totalorder %s564_s12, 3 }
  0x14   : > { %v3652_v18 = vld [vmem:[%s4792_s6 + $0x130] sm:$0xff]   ;;  %v3655_v21 = vld [vmem:[%s4792_s6 + $0x138] sm:$0xff]   ;;  %v3658_v23 = vld [vmem:[%s3898_s22] ss:$0 sps:$4 sm:$0xff]   ;;  %s4869_s23 = smov (!%p594_p6, %s3762_s23), 1 }
  0x15   : > { %3075 = vmatpush3.bf16.msra.mxu0 %v3639_v5  ;;  %3387 = vmatpush3.bf16.msra.mxu1 %v3638_v4  ;;  %v3653_v19 = vld [vmem:[%s4792_s6 + $0x170] sm:$0xff]   ;;  %v3656_v22 = vld [vmem:[%s4792_s6 + $0x178] sm:$0xff]   ;;  %v3659_v24 = vld [vmem:[%s3898_s22 + $0x4] ss:$0 sps:$4 sm:$0xff]   ;;  %v657_v26 = vshrl.u32 %v3658_v23, 16  ;;  %v660_v27 = vshll.u32 %v3658_v23, 16 }
  0x16   : > { %3076 = vmatprep.subr.bf16.mxu0 %v3640_v6  ;;  %3388 = vmatprep.subr.bf16.mxu1 %v3641_v7  ;;  %v3654_v20 = vld [vmem:[%s4792_s6 + $0xf0] sm:$0xff]   ;;  %v3657_v25 = vld [vmem:[%s4792_s6 + $0xf8] sm:$0xff]   ;;  %v3660_v28 = vld [vmem:[%s3898_s22 + $0x8] ss:$0 sps:$4 sm:$0xff]   ;;  %v664_v29 = vshrl.u32 %v3659_v24, 16  ;;  %v667_v30 = vshll.u32 %v3659_v24, 16 }
  0x17   : > { %v659_v31 = vrot.slane %v657_v26, 7  ;;  %vm3916_vm4 = vmand %vm729_vm0, %vm730_vm2  ;;  %v671_v33 = vshrl.u32 %v3660_v28, 16  ;;  %v674_v34 = vshll.u32 %v3660_v28, 16  ;;  %v3661_v35 = vld [vmem:[%s4792_s6 + $0x40] sm:$0xff]   ;;  %v3663_v41 = vld [vmem:[%s3898_s22 + $0xc] ss:$0 sps:$4 sm:$0xff]  }
  0x18   : > { %v666_v36 = vrot.slane %v664_v29, 7  ;;  %v3926_v37 = vld [vmem:[%s4792_s6 + $0x80] sm:$0xff]   ;;  %vm3930_vm5 = vmand %vm742_vm1, %vm743_vm3  ;;  %v678_v49 = vshrl.u32 %v3663_v41, 16  ;;  %v681_v56 = vshll.u32 %v3663_v41, 16  ;;  %v4044_v43 = vld [vmem:[%s4792_s6 + $0x58] sm:$0xff]   ;;  %s4867_s12 = smov (!%p566_p5, %s564_s12), 3 }
  0x19   : > { %3077 = vmatpush3.bf16.msra.mxu0 %v3642_v8  ;;  %3389 = vmatpush3.bf16.msra.mxu1 %v3641_v7  ;;  %v662_v38 = vor.u32 %v660_v27, %v659_v31  ;;  %v673_v40 = vrot.slane %v671_v33, 7  ;;  %v3972_v6 = vld [vmem:[%s4792_s6] sm:$0xff]   ;;  %v652_v7 = vrot.slane %v650_v57, 7  ;;  %v4016_v27 = vld [vmem:[%s4792_s6 + $0x50] sm:$0xff]   ;;  %s3069_s28 = sshll.u32 %s4867_s12, 5  ;;  %s2819_s25 = sshll.u32 %s4869_s23, 3 }
  0x1a   : > { %3078 = vmatprep.subr.bf16.mxu0 %v3643_v9  ;;  %3390 = vmatprep.subr.bf16.mxu1 %v3644_v10  ;;  %v669_v42 = vor.u32 %v667_v30, %v666_v36  ;;  %v680_v63 = vrot.slane %v678_v49, 7  ;;  %v4032_v36 = vld [vmem:[%s4792_s6 + $0x10] sm:$0xff]   ;;  %s4305_s11 = scalar_lea.vmem %s4790_s4, %s3069_s28  ;;  %s597_s28 = scalar_lea.vmem %s4793_s7, %s2819_s25 }
  0x1b   : > { %v733_v45 = vsel %vm3916_vm4, 0, %v662_v38  ;;  %v676_v46 = vor.u32 %v674_v34, %v673_v40  ;;  %v655_v23 = vor.u32 %v653_v3, %v652_v7  ;;  %v4024_v34 = vld [vmem:[%s4792_s6 + $0x90] sm:$0xff]   ;;  %v4095_v3 = vld [vmem:[%s4792_s6 + $0x20] sm:$0xff]  }
  0x1c   : > { %v734_v47 = vsel %vm3916_vm4, 0, %v669_v42  ;;  %v3941_v48 = vsel %vm3930_vm5, %v733_v45, 0  ;;  %v683_v5 = vor.u32 %v681_v56, %v680_v63 }
  0x1d   : > { %3079 = vmatpush3.bf16.msra.mxu0 %v3645_v11  ;;  %3391 = vmatpush3.bf16.msra.mxu1 %v3644_v10  ;;  %v3946_v50 = vsel %vm3930_vm5, %v734_v47, 0  ;;  %v763_v51 = vshrl.u32 %v3941_v48, 16  ;;  %v765_v52 = vshll.u32 %v3941_v48, 16  ;;  %v735_v53 = vsel %vm3916_vm4, 0, %v676_v46  ;;  %v4049_v46 = vld [vmem:[%s4792_s6 + $0x98] sm:$0xff]  }
  0x1e   : > { %3080 = vmatprep.subr.bf16.mxu0 %v3646_v12  ;;  %3392 = vmatprep.subr.bf16.mxu1 %v3647_v13  ;;  %v770_v54 = vshrl.u32 %v3946_v50, 16  ;;  %v772_v55 = vshll.u32 %v3946_v50, 16  ;;  %v3956_v59 = vsel %vm3930_vm5, %v735_v53, 0  ;;  %v820_v60 = vrot.slane %v3941_v48, 1  ;;  %v4054_v47 = vld [vmem:[%s4792_s6 + $0x18] sm:$0xff]  }
  0x1f   : > { %v767_v58 = vrot.slane %v765_v52, 1  ;;  %v821_v61 = vrot.slane %v3946_v50, 1  ;;  %v779_v0 = vshll.u32 %v3956_v59, 16  ;;  %v2878_v8 = vcombine.low %v3941_v48, %v3946_v50  ;;  %v3682_v53 = vld [vmem:[%s3898_s22 + $0x18] ss:$0 sps:$4 sm:$0xff]  }
  0x20   : > { %v774_v62 = vrot.slane %v772_v55, 1  ;;  %v822_v9 = vrot.slane %v3956_v59, 1  ;;  %v777_v10 = vshrl.u32 %v3956_v59, 16  ;;  %v736_v12 = vsel %vm3916_vm4, 0, %v683_v5 }
  0x21   : > { %3081 = vmatpush3.bf16.msra.mxu0 %v3648_v14  ;;  %3393 = vmatpush3.bf16.msra.mxu1 %v3647_v13  ;;  %v3961_v1 = vor.u32 %v767_v58, %v763_v51  ;;  %v2880_v2 = vcombine.low %v820_v60, %v821_v61  ;;  %v781_v13 = vrot.slane %v779_v0, 1  ;;  %v3984_v14 = vsel %vm3930_vm5, %v736_v12, 0  ;;  %v4085_v0 = vld [vmem:[%s4792_s6 + $0x60] sm:$0xff]  }
  0x22   : > { %3082 = vmatprep.subr.bf16.mxu0 %v3649_v15  ;;  %3394 = vmatprep.subr.bf16.mxu1 %v3650_v16  ;;  %v3967_v4 = vor.u32 %v774_v62, %v770_v54  ;;  %v3989_v15 = vld [vmem:[%s4792_s6 + $0x48] sm:$0xff]   ;;  %v732_v41 = vsel %vm3916_vm4, 0, %v655_v23  ;;  %v3683_v54 = vld [vmem:[%s3898_s22 + $0x1c] ss:$0 sps:$4 sm:$0xff]   ;;  %v699_v5 = vshrl.u32 %v3682_v53, 16  ;;  %v702_v7 = vshll.u32 %v3682_v53, 16 }
  0x23   : > { %3400 = vmatprep.mubr.bf16.mxu1 %v2880_v2  ;;  %v4058_v49 = vsel %vm3930_vm5, %v732_v41, 0  ;;  %v4090_v2 = vld [vmem:[%s4792_s6 + $0xa0] sm:$0xff]   ;;  %v4131_v41 = vld [vmem:[%s4792_s6 + $0x28] sm:$0xff]   ;;  %v4151_v53 = vld [vmem:[%s4792_s6 + $0x70] sm:$0xff]  }
  0x24   : > { %v2879_v11 = vcombine.low %v3961_v1, %v3967_v4 }
  0x25   : > { %3083 = vmatpush3.bf16.msra.mxu0 %v3651_v17  ;;  %3395 = vmatpush3.bf16.msra.mxu1 %v3650_v16  ;;  %v823_v16 = vrot.slane %v3984_v14, 1  ;;  %v3995_v17 = vld [vmem:[%s4792_s6 + $0x88] sm:$0xff]  }
  0x26   : > { %3084 = vmatprep.subr.bf16.mxu0 %v3652_v18  ;;  %3396 = vmatprep.subr.bf16.mxu1 %v3653_v19  ;;  %v4000_v18 = vld [vmem:[%s4792_s6 + $0x8] sm:$0xff]  }
  0x27   : > { %1160 = vmatprep.mubr.bf16.mxu0 %v2879_v11  ;;  %v2883_v24 = vcombine.low %v822_v9, %v823_v16 }
  0x29   : > { %3085 = vmatpush3.bf16.msra.mxu0 %v3654_v20  ;;  %3397 = vmatpush3.bf16.msra.mxu1 %v3653_v19  ;;  %v784_v19 = vshrl.u32 %v3984_v14, 16  ;;  %v786_v20 = vshll.u32 %v3984_v14, 16 }
  0x2a   : > { %3086 = vmatprep.subr.bf16.mxu0 %v3655_v21  ;;  %3398 = vmatprep.subr.bf16.mxu1 %v3656_v22  ;;  %v3674_v21 = vld [vmem:[%s3898_s22 + $0x10] ss:$0 sps:$4 sm:$0xff]  }
  0x2b   : > { %v788_v26 = vrot.slane %v786_v20, 1  ;;  %v685_v28 = vshrl.u32 %v3674_v21, 16  ;;  %v688_v29 = vshll.u32 %v3674_v21, 16  ;;  %v701_v21 = vrot.slane %v699_v5, 7 }
  0x2d   : > { %3087 = vmatpush3.bf16.msra.mxu0 %v3657_v25  ;;  %3399 = vmatpush3.bf16.msra.mxu1 %v3656_v22  ;;  %v3675_v22 = vld [vmem:[%s3898_s22 + $0x14] ss:$0 sps:$4 sm:$0xff]   ;;  %v4011_v25 = vor.u32 %v781_v13, %v777_v10  ;;  %v4019_v33 = vor.u32 %v788_v26, %v784_v19  ;;  %v687_v38 = vrot.slane %v685_v28, 7  ;;  %v758_v10 = vshll.u32 %v4058_v49, 16  ;;  %v4102_v13 = vld [vmem:[%s4792_s6 + $0x68] sm:$0xff]  }
  0x2e   : > { %3124 = vmatprep.subr.bf16.mxu0 %v3661_v35  ;;  %3408 = vmatprep.subr.bf16.mxu1 %v3926_v37  ;;  %v692_v30 = vshrl.u32 %v3675_v22, 16  ;;  %v695_v31 = vshll.u32 %v3675_v22, 16  ;;  %v2881_v35 = vcombine.low %v3956_v59, %v3984_v14  ;;  %v709_v19 = vshll.u32 %v3683_v54, 16 }
  0x2f   : > { %v2882_v42 = vcombine.low %v4011_v25, %v4019_v33  ;;  %v690_v44 = vor.u32 %v688_v29, %v687_v38 }
  0x30   : > { %1161 = vmatmul.mubr.bf16.vlgmr.msra.gmra.mrb[0].mxu0 %v2878_v8  ;;  %3401 = vmatmul.mubr.bf16.vlgmr.msra.gmra.mrb[0].mxu1 %v2883_v24  ;;  %v694_v40 = vrot.slane %v692_v30, 7  ;;  %v706_v8 = vshrl.u32 %v3683_v54, 16  ;;  %v756_v24 = vshrl.u32 %v4058_v49, 16  ;;  %v4119_v30 = vld [vmem:[%s4792_s6 + $0xa8] sm:$0xff]   ;;  %v4154_v54 = vrot.slane %v4058_v49, 1 }
  0x31   : > { %3125 = vmatpush3.bf16.msra.mxu0 %v3972_v6  ;;  %3409 = vmatpush3.bf16.msra.mxu1 %v3926_v37  ;;  %v737_v51 = vsel %vm3916_vm4, 0, %v690_v44 }
  0x32   : > { %3126 = vmatprep.subr.bf16.mxu0 %v3989_v15  ;;  %3410 = vmatprep.subr.bf16.mxu1 %v3995_v17  ;;  %v697_v45 = vor.u32 %v695_v31, %v694_v40  ;;  %v4071_v55 = vsel %vm3930_vm5, %v737_v51, 0  ;;  %v708_v22 = vrot.slane %v706_v8, 7  ;;  %v704_v31 = vor.u32 %v702_v7, %v701_v21 }
  0x33   : > { %1168 = vmatprep.mubr.bf16.mxu0 %v2882_v42  ;;  %v791_v57 = vshrl.u32 %v4071_v55, 16  ;;  %v793_v58 = vshll.u32 %v4071_v55, 16  ;;  %v824_v20 = vrot.slane %v4071_v55, 1  ;;  %v760_v42 = vrot.slane %v758_v10, 1 }
  0x34   : > { %v738_v52 = vsel %vm3916_vm4, 0, %v697_v45  ;;  %v739_v44 = vsel %vm3916_vm4, 0, %v704_v31 }
  0x35   : > { %3127 = vmatpush3.bf16.msra.mxu0 %v4000_v18  ;;  %3411 = vmatpush3.bf16.msra.mxu1 %v3995_v17  ;;  %v4075_v56 = vsel %vm3930_vm5, %v738_v52, 0  ;;  %v795_v11 = vrot.slane %v793_v58, 1  ;;  %v4142_v51 = vsel %vm3930_vm5, %v739_v44, 0  ;;  %v4215_v44 = vld [vmem:[%s4792_s6 + $0x1c0] sm:$0xff]  }
  0x36   : > { %3128 = vmatprep.subr.bf16.mxu0 %v4016_v27  ;;  %3412 = vmatprep.subr.bf16.mxu1 %v4024_v34  ;;  %v798_v62 = vshrl.u32 %v4075_v56, 16  ;;  %v800_v63 = vshll.u32 %v4075_v56, 16  ;;  %v825_v23 = vrot.slane %v4075_v56, 1  ;;  %v2884_v29 = vcombine.low %v4071_v55, %v4075_v56 }
  0x37   : > { %v4109_v26 = vor.u32 %v795_v11, %v791_v57  ;;  %v805_v57 = vshrl.u32 %v4142_v51, 16  ;;  %v807_v58 = vshll.u32 %v4142_v51, 16  ;;  %v826_v5 = vrot.slane %v4142_v51, 1  ;;  %v4168_v11 = vld [vmem:[%s4792_s6 + $0xb0] sm:$0xff]  }
  0x38   : > { %1169 = vmatmul.mubr.bf16.gmra.mrb[4].mxu0 %v2881_v35  ;;  %v802_v12 = vrot.slane %v800_v63, 1  ;;  %v711_v35 = vor.u32 %v709_v19, %v708_v22  ;;  %v2886_v38 = vcombine.low %v824_v20, %v825_v23  ;;  %v4175_v19 = vor.u32 %v760_v42, %v756_v24  ;;  %v4209_v42 = vld [vmem:[%s4792_s6 + $0x38] sm:$0xff]  }
  0x39   : > { %3129 = vmatpush3.bf16.msra.mxu0 %v4032_v36  ;;  %3413 = vmatpush3.bf16.msra.mxu1 %v4024_v34  ;;  %v809_v8 = vrot.slane %v807_v58, 1  ;;  %v2916_v22 = vcombine.low %v4154_v54, %v820_v60  ;;  %v4201_v60 = vld [vmem:[%s4792_s6 + $0xb8] sm:$0xff]   ;;  %v4237_v58 = vld [vmem:[%s4792_s6 + $0x180] sm:$0xff]  }
  0x3a   : > { %3130 = vmatprep.subr.bf16.mxu0 %v4044_v43  ;;  %3414 = vmatprep.subr.bf16.mxu1 %v4049_v46  ;;  %v4111_v28 = vor.u32 %v802_v12, %v798_v62  ;;  %v740_v45 = vsel %vm3916_vm4, 0, %v711_v35  ;;  %v4173_v12 = vld [vmem:[%s4792_s6 + $0x30] sm:$0xff]   ;;  %v4190_v35 = vld [vmem:[%s4792_s6 + $0x78] sm:$0xff]  }
  0x3b   : > { %v4146_v52 = vsel %vm3930_vm5, %v740_v45, 0  ;;  %3404 = vmatprep.mubr.bf16.mxu1 %v2886_v38  ;;  %v2919_v45 = vcombine.low %v821_v61, %v822_v9  ;;  %v4248_v61 = vld [vmem:[%s4792_s6 + $0x1c8] sm:$0xff]   ;;  %v4258_v9 = vcombine.low %v823_v16, %v824_v20  ;;  %v4278_v16 = vld [vmem:[%s4792_s6 + $0x1d0] sm:$0xff]   ;;  %v4288_v20 = vcombine.low %v3946_v50, %v3956_v59  ;;  %v4311_v50 = vld [vmem:[%s4792_s6 + $0x1d8] sm:$0xff]  }
  0x3c   : > { %v2885_v40 = vcombine.low %v4109_v26, %v4111_v28  ;;  %v900_v62 = vshrl.u32 %v4146_v52, 16  ;;  %v902_v63 = vshll.u32 %v4146_v52, 16  ;;  %v4794_v7 = vrot.slane %v4146_v52, 1  ;;  %4824 = vst [vmem:[#allocation4_spill] sm:$0xff] %v4311_v50 }
  0x3d   : > { %3131 = vmatpush3.bf16.msra.mxu0 %v4054_v47  ;;  %3415 = vmatpush3.bf16.msra.mxu1 %v4049_v46  ;;  %v2887_v24 = vcombine.low %v4142_v51, %v4146_v52  ;;  %v4315_v59 = vcombine.low %v4019_v33, %v4109_v26  ;;  %v4330_v33 = vld [vmem:[%s4792_s6 + $0x220] sm:$0xff]  }
  0x3e   : > { %3132 = vmatprep.subr.bf16.mxu0 %v4085_v0  ;;  %3416 = vmatprep.subr.bf16.mxu1 %v4090_v2  ;;  %v904_v10 = vrot.slane %v902_v63, 1  ;;  %v2889_v21 = vcombine.low %v826_v5, %v4794_v7  ;;  %v4264_v63 = vld [vmem:[%s4792_s6 + $0x188] sm:$0xff]   ;;  %4826 = vst [vmem:[#allocation6_spill] sm:$0xff] %v4330_v33  ;;  %v4337_v26 = vld [vmem:[%s4792_s6 + $0x1e0] sm:$0xff]   ;;  %v4392_v7 = vcombine.low %v4075_v56, %v4142_v51  ;;  %v4411_v56 = vld [vmem:[%s4792_s6 + $0x1f8] sm:$0xff]  }
  0x3f   : > { %1176 = vmatprep.mubr.bf16.mxu0 %v2885_v40  ;;  %v2915_v40 = vcombine.low %v4175_v19, %v3961_v1  ;;  %v4223_v1 = vld [vmem:[%s4792_s6 + $0x200] sm:$0xff]   ;;  %4827 = vst [vmem:[#allocation7_spill] sm:$0xff] %v4337_v26  ;;  %4836 = vst [vmem:[#allocation16_spill] sm:$0xff] %v4411_v56 }
  0x40   : > { %1177 = vmatmul.mubr.bf16.gmra.mrb[8].mxu0 %v2884_v29  ;;  %v4183_v29 = vor.u32 %v809_v8, %v805_v57  ;;  %v4185_v31 = vor.u32 %v904_v10, %v900_v62  ;;  %3405 = vmatmul.mubr.bf16.gmra.mrb[4].mxu1 %v2889_v21  ;;  %v2914_v57 = vcombine.low %v4058_v49, %v3941_v48  ;;  %v4243_v62 = vld [vmem:[%s4792_s6 + $0x208] sm:$0xff]   ;;  %v4293_v8 = vld [vmem:[%s4792_s6 + $0x190] sm:$0xff]   ;;  %v4349_v21 = vld [vmem:[%s4792_s6 + $0x1a0] sm:$0xff]  }
  0x41   : > { %3133 = vmatpush3.bf16.msra.mxu0 %v4095_v3  ;;  %3417 = vmatpush3.bf16.msra.mxu1 %v4090_v2  ;;  %v4252_v48 = vcombine.low %v3967_v4, %v4011_v25  ;;  %v4271_v4 = vld [vmem:[%s4792_s6 + $0x210] sm:$0xff]   ;;  %v4283_v25 = vcombine.low %v825_v23, %v826_v5  ;;  %4822 = vst [vmem:[#allocation2_spill] sm:$0xff] %v4293_v8  ;;  %v4300_v23 = vld [vmem:[%s4792_s6 + $0x218] sm:$0xff]   ;;  %4828 = vst [vmem:[#allocation8_spill] sm:$0xff] %v4349_v21 }
  0x42   : > { %3134 = vmatprep.subr.bf16.mxu0 %v4102_v13  ;;  %3418 = vmatprep.subr.bf16.mxu1 %v4119_v30  ;;  %v2888_v38 = vcombine.low %v4183_v29, %v4185_v31  ;;  %4823 = vst [vmem:[#allocation3_spill] sm:$0xff] %v4300_v23  ;;  %v4325_v5 = vld [vmem:[%s4792_s6 + $0x198] sm:$0xff]   ;;  %v4342_v10 = vcombine.low %v3984_v14, %v4071_v55  ;;  %v4360_v14 = vld [vmem:[%s4792_s6 + $0x1e8] sm:$0xff]  }
  0x43   : > { %3424 = vmatprep.mubr.bf16.mxu1 %v2916_v22  ;;  %4825 = vst [vmem:[#allocation5_spill] sm:$0xff] %v4325_v5  ;;  %v4354_v22 = vld [vmem:[%s4792_s6 + $0x228] sm:$0xff]   ;;  %4830 = vst [vmem:[#allocation10_spill] sm:$0xff] %v4360_v14  ;;  %v4364_v55 = vcombine.low %v4111_v28, %v4183_v29  ;;  %v4380_v28 = vld [vmem:[%s4792_s6 + $0x230] sm:$0xff]  }
  0x44   : > { %1184 = vmatprep.mubr.bf16.mxu0 %v2888_v38  ;;  %4829 = vst [vmem:[#allocation9_spill] sm:$0xff] %v4354_v22  ;;  %v3715_v38 = vld [vmem:[%s4305_s11 + $0x4] ss:$0 sps:$4 sm:$0xff]   ;;  %4832 = vst [vmem:[#allocation12_spill] sm:$0xff] %v4380_v28  ;;  %v4387_v29 = vld [vmem:[%s4792_s6 + $0x1f0] sm:$0xff]  }
  0x45   : > { %3135 = vmatpush3.bf16.msra.mxu0 %v4131_v41  ;;  %3419 = vmatpush3.bf16.msra.mxu1 %v4119_v30  ;;  %4833 = vst [vmem:[#allocation13_spill] sm:$0xff] %v4387_v29 }
  0x46   : > { %3136 = vmatprep.subr.bf16.mxu0 %v4151_v53  ;;  %3420 = vmatprep.subr.bf16.mxu1 %v4168_v11 }
  0x48   : > { %1185 = vmatmul.mubr.bf16.gmra.mrb[12].mxu0 %v2887_v24  ;;  %v3714_v24 = vld [vmem:[%s4305_s11] ss:$0 sps:$4 sm:$0xff]  }
  0x49   : > { %3137 = vmatpush3.bf16.msra.mxu0 %v4173_v12  ;;  %3421 = vmatpush3.bf16.msra.mxu1 %v4168_v11 }
  0x4a   : > { %3138 = vmatprep.subr.bf16.mxu0 %v4190_v35  ;;  %3422 = vmatprep.subr.bf16.mxu1 %v4201_v60 }
  0x4b   : > { %1458 = vmatprep.mubr.bf16.mxu0 %v2915_v40  ;;  %v4375_v40 = vld [vmem:[%s4792_s6 + $0x1a8] sm:$0xff]  }
  0x4c   : > { %4831 = vst [vmem:[#allocation11_spill] sm:$0xff] %v4375_v40 }
  0x4d   : > { %3139 = vmatpush3.bf16.msra.mxu0 %v4209_v42  ;;  %3423 = vmatpush3.bf16.msra.mxu1 %v4201_v60 }
  0x4e   : > { %3176 = vmatprep.subr.bf16.mxu0 %v4215_v44  ;;  %3432 = vmatprep.subr.bf16.mxu1 %v4223_v1 }
  0x50   : > { %3425 = vmatmul.mubr.bf16.vlgmr.msra.gmra.mrb[0].mxu1 %v2919_v45  ;;  %1459 = vmatmul.mubr.bf16.vlgmr.msra.gmra.mrb[16].mxu0 %v2914_v57  ;;  %v1962_v57 = vshrl.u32 %v3715_v38, 16 }
  0x51   : > { %3433 = vmatpush3.bf16.msra.mxu1 %v4223_v1  ;;  %3177 = vmatpush3.bf16.msra.mxu0 %v4237_v58 }
  0x52   : > { %3434 = vmatprep.subr.bf16.mxu1 %v4243_v62  ;;  %3178 = vmatprep.subr.bf16.mxu0 %v4248_v61 }
  0x53   : > { %1466 = vmatprep.mubr.bf16.mxu0 %v4252_v48  ;;  %3428 = vmatprep.mubr.bf16.mxu1 %v4258_v9 }
  0x55   : > { %3435 = vmatpush3.bf16.msra.mxu1 %v4243_v62  ;;  %3179 = vmatpush3.bf16.msra.mxu0 %v4264_v63 }
  0x56   : > { %3436 = vmatprep.subr.bf16.mxu1 %v4271_v4  ;;  %3180 = vmatprep.subr.bf16.mxu0 %v4278_v16 }
  0x58   : > { %3429 = vmatmul.mubr.bf16.gmra.mrb[4].mxu1 %v4283_v25  ;;  %1467 = vmatmul.mubr.bf16.gmra.mrb[20].mxu0 %v4288_v20 }
  0x59   : > { %3437 = vmatpush3.bf16.msra.mxu1 %v4271_v4  ;;  %3181 = vmatpush3.bf16.msra.mxu0 %v4293_v8 }
  0x5a   : > { %3438 = vmatprep.subr.bf16.mxu1 %v4300_v23  ;;  %3182 = vmatprep.subr.bf16.mxu0 %v4311_v50  ;;  %v3716_v50 = vld [vmem:[%s4305_s11 + $0x8] ss:$0 sps:$4 sm:$0xff]  }
  0x5b   : > { %1474 = vmatprep.mubr.bf16.mxu0 %v4315_v59  ;;  %3448 = vmatprep.mubr.bf16.mxu1 %v2919_v45  ;;  %v1955_v45 = vshrl.u32 %v3714_v24, 16 }
  0x5d   : > { %3439 = vmatpush3.bf16.msra.mxu1 %v4300_v23  ;;  %3183 = vmatpush3.bf16.msra.mxu0 %v4325_v5  ;;  %v1957_v51 = vrot.slane %v1955_v45, 7  ;;  %v3717_v23 = vld [vmem:[%s4305_s11 + $0xc] ss:$0 sps:$4 sm:$0xff]  }
  0x5e   : > { %3440 = vmatprep.subr.bf16.mxu1 %v4330_v33  ;;  %3184 = vmatprep.subr.bf16.mxu0 %v4337_v26  ;;  %v4405_v26 = vld [vmem:[%s4792_s6 + $0x238] sm:$0xff]  }
  0x5f   : > { %4835 = vst [vmem:[#allocation15_spill] sm:$0xff] %v4405_v26 }
  0x60   : > { %1475 = vmatmul.mubr.bf16.gmra.mrb[24].mxu0 %v4342_v10 }
  0x61   : > { %3441 = vmatpush3.bf16.msra.mxu1 %v4330_v33  ;;  %3185 = vmatpush3.bf16.msra.mxu0 %v4349_v21  ;;  %v3721_v21 = vld [vmem:[%s4305_s11 + $0x1c] ss:$0 sps:$4 sm:$0xff]   ;;  %v1965_v33 = vshll.u32 %v3715_v38, 16 }
  0x62   : > { %3442 = vmatprep.subr.bf16.mxu1 %v4354_v22  ;;  %3186 = vmatprep.subr.bf16.mxu0 %v4360_v14  ;;  %v4400_v14 = vld [vmem:[%s4792_s6 + $0x1b0] sm:$0xff]   ;;  %v2004_v5 = vshrl.u32 %v3721_v21, 16  ;;  %v2007_v45 = vshll.u32 %v3721_v21, 16  ;;  %v3723_v21 = vld [vmem:[%s4792_s6 + $0x100] sm:$0xff]  }
  0x63   : > { %1482 = vmatprep.mubr.bf16.mxu0 %v4364_v55  ;;  %4834 = vst [vmem:[#allocation14_spill] sm:$0xff] %v4400_v14 }
  0x65   : > { %3443 = vmatpush3.bf16.msra.mxu1 %v4354_v22  ;;  %3187 = vmatpush3.bf16.msra.mxu0 %v4375_v40  ;;  %v1958_v40 = vshll.u32 %v3714_v24, 16  ;;  %v1964_v22 = vrot.slane %v1962_v57, 7  ;;  %v2006_v24 = vrot.slane %v2004_v5, 7 }
  0x66   : > { %3444 = vmatprep.subr.bf16.mxu1 %v4380_v28  ;;  %3188 = vmatprep.subr.bf16.mxu0 %v4387_v29  ;;  %v4420_v29 = vld [vmem:[%s4792_s6 + $0x1b8] sm:$0xff]  }
  0x67   : > { %4837 = vst [vmem:[#allocation17_spill] sm:$0xff] %v4420_v29  ;;  %v1960_v38 = vor.u32 %v1958_v40, %v1957_v51  ;;  %v1967_v57 = vor.u32 %v1965_v33, %v1964_v22 }
  0x68   : > { %1483 = vmatmul.mubr.bf16.gmra.mrb[28].mxu0 %v4392_v7 }
  0x69   : > { %3445 = vmatpush3.bf16.msra.mxu1 %v4380_v28  ;;  %3189 = vmatpush3.bf16.msra.mxu0 %v4400_v14  ;;  %v2009_v28 = vor.u32 %v2007_v45, %v2006_v24  ;;  %v3722_v14 = vld [vmem:[%s4792_s6 + $0x140] sm:$0xff]   ;;  %v2028_v5 = vsel %vm3916_vm4, 0, %v1960_v38  ;;  %v2029_v33 = vsel %vm3916_vm4, 0, %v1967_v57  ;;  %v1969_v45 = vshrl.u32 %v3716_v50, 16 }
  0x6a   : > { %3446 = vmatprep.subr.bf16.mxu1 %v4405_v26  ;;  %3190 = vmatprep.subr.bf16.mxu0 %v4411_v56  ;;  %v1976_v24 = vshrl.u32 %v3717_v23, 16  ;;  %v4464_v38 = vsel %vm3930_vm5, %v2029_v33, 0  ;;  %v3719_v56 = vld [vmem:[%s4305_s11 + $0x14] ss:$0 sps:$4 sm:$0xff]  }
  0x6b   : > { %1799 = vmatprep.mubr.bf16.mxu0 %v4252_v48  ;;  %v2035_v48 = vsel %vm3916_vm4, 0, %v2009_v28  ;;  %v3725_v28 = vld [vmem:[%s4792_s6 + $0x148] sm:$0xff]   ;;  %v3728_v33 = vld [vmem:[%s4792_s6 + $0x150] sm:$0xff]   ;;  %v1993_v8 = vshll.u32 %v3719_v56, 16 }
  0x6c   : > { %v4443_v22 = vsel %vm3930_vm5, %v2035_v48, 0 }
  0x6d   : > { %3447 = vmatpush3.bf16.msra.mxu1 %v4405_v26  ;;  %3191 = vmatpush3.bf16.msra.mxu0 %v4420_v29  ;;  %v2144_v40 = vshrl.u32 %v4443_v22, 16  ;;  %v2146_v51 = vshll.u32 %v4443_v22, 16  ;;  %v3718_v29 = vld [vmem:[%s4305_s11 + $0x10] ss:$0 sps:$4 sm:$0xff]  }
  0x6e   : > { %3456 = vmatprep.subr.bf16.mxu1 %v3722_v14  ;;  %3228 = vmatprep.subr.bf16.mxu0 %v3723_v21  ;;  %v4838_v21 = vrot.slane %v4146_v52, 1 }
  0x6f   : > { %v2148_v57 = vrot.slane %v2146_v51, 1  ;;  %v1971_v51 = vrot.slane %v1969_v45, 7 }
  0x70   : > { %3449 = vmatmul.mubr.bf16.vlgmr.msra.gmra.mrb[0].mxu1 %v4258_v9  ;;  %1800 = vmatmul.mubr.bf16.vlgmr.msra.gmra.mrb[32].mxu0 %v4288_v20  ;;  %v3724_v9 = vld [vmem:[%s4792_s6 + $0xc0] sm:$0xff]   ;;  %v3726_v20 = vld [vmem:[%s4792_s6 + $0x108] sm:$0xff]   ;;  %v3000_v48 = vcombine.low %v4838_v21, %v4154_v54  ;;  %v1978_v21 = vrot.slane %v1976_v24, 7 }
  0x71   : > { %3457 = vmatpush3.bf16.msra.mxu1 %v3722_v14  ;;  %3229 = vmatpush3.bf16.msra.mxu0 %v3724_v9  ;;  %v4460_v14 = vsel %vm3930_vm5, %v2028_v5, 0  ;;  %v1972_v5 = vshll.u32 %v3716_v50, 16  ;;  %v4475_v26 = vor.u32 %v2148_v57, %v2144_v40  ;;  %v1979_v9 = vshll.u32 %v3717_v23, 16  ;;  %v3729_v40 = vld [vmem:[%s4792_s6 + $0x110] sm:$0xff]  }
  0x72   : > { %3458 = vmatprep.subr.bf16.mxu1 %v3725_v28  ;;  %3230 = vmatprep.subr.bf16.mxu0 %v3726_v20  ;;  %v4815_v20 = vrot.slane %v4464_v38, 1  ;;  %v4840_v45 = vrot.slane %v4460_v14, 1  ;;  %v1983_v23 = vshrl.u32 %v3718_v29, 16  ;;  %v1990_v57 = vshrl.u32 %v3719_v56, 16  ;;  %v3735_v56 = vld [vmem:[%s4792_s6 + $0x120] sm:$0xff]  }
  0x73   : > { %1807 = vmatprep.mubr.bf16.mxu0 %v4315_v59  ;;  %3452 = vmatprep.mubr.bf16.mxu1 %v4283_v25  ;;  %v4816_v59 = vrot.slane %v4443_v22, 1  ;;  %v3727_v25 = vld [vmem:[%s4792_s6 + $0xc8] sm:$0xff]  }
  0x74   : > { %v3037_v24 = vcombine.low %v4840_v45, %v4815_v20  ;;  %v2064_v45 = vshll.u32 %v4464_v38, 16  ;;  %v1985_v20 = vrot.slane %v1983_v23, 7  ;;  %v2062_v23 = vshrl.u32 %v4464_v38, 16 }
  0x75   : > { %3459 = vmatpush3.bf16.msra.mxu1 %v3725_v28  ;;  %3231 = vmatpush3.bf16.msra.mxu0 %v3727_v25  ;;  %v4486_v50 = vcombine.low %v4816_v59, %v4154_v54  ;;  %v3730_v25 = vld [vmem:[%s4792_s6 + $0xd0] sm:$0xff]   ;;  %v1981_v28 = vor.u32 %v1979_v9, %v1978_v21  ;;  %v1986_v59 = vshll.u32 %v3718_v29, 16  ;;  %v3733_v9 = vld [vmem:[%s4792_s6 + $0xd8] sm:$0xff]   ;;  %v2055_v21 = vshrl.u32 %v4460_v14, 16 }
  0x76   : > { %3460 = vmatprep.subr.bf16.mxu1 %v3728_v33  ;;  %3232 = vmatprep.subr.bf16.mxu0 %v3729_v40  ;;  %v1974_v40 = vor.u32 %v1972_v5, %v1971_v51  ;;  %v2999_v5 = vcombine.low %v4185_v31, %v4175_v19 }
  0x77   : > { %4839 = vst [vmem:[#allocation18_spill] sm:$0xff] %v4486_v50  ;;  %v1992_v50 = vrot.slane %v1990_v57, 7  ;;  %v2031_v29 = vsel %vm3916_vm4, 0, %v1981_v28  ;;  %v2066_v57 = vrot.slane %v2064_v45, 1 }
  0x78   : > { %3453 = vmatmul.mubr.bf16.gmra.mrb[4].mxu1 %v3000_v48  ;;  %1808 = vmatmul.mubr.bf16.gmra.mrb[36].mxu0 %v4342_v10  ;;  %v3731_v48 = vld [vmem:[%s4792_s6 + $0x158] sm:$0xff]   ;;  %v2030_v51 = vsel %vm3916_vm4, 0, %v1974_v40  ;;  %v4535_v28 = vsel %vm3930_vm5, %v2031_v29, 0  ;;  %v1988_v40 = vor.u32 %v1986_v59, %v1985_v20 }
  0x79   : > { %3461 = vmatpush3.bf16.msra.mxu1 %v3728_v33  ;;  %3233 = vmatpush3.bf16.msra.mxu0 %v3730_v25  ;;  %v3732_v10 = vld [vmem:[%s4792_s6 + $0x118] sm:$0xff]   ;;  %v2057_v33 = vshll.u32 %v4460_v14, 16  ;;  %v4531_v31 = vsel %vm3930_vm5, %v2030_v51, 0  ;;  %v4550_v20 = vor.u32 %v2066_v57, %v2062_v23  ;;  %v2998_v51 = vcombine.low %v4146_v52, %v4058_v49  ;;  %v3741_v57 = vld [vmem:[%s4792_s6 + $0x130] sm:$0xff]  }
  0x7a   : > { %3462 = vmatprep.subr.bf16.mxu1 %v3731_v48  ;;  %3234 = vmatprep.subr.bf16.mxu0 %v3732_v10  ;;  %v3720_v25 = vld [vmem:[%s4305_s11 + $0x18] ss:$0 sps:$4 sm:$0xff]   ;;  %v1995_v10 = vor.u32 %v1993_v8, %v1992_v50  ;;  %v2071_v45 = vshll.u32 %v4531_v31, 16  ;;  %v2032_v29 = vsel %vm3916_vm4, 0, %v1988_v40  ;;  %v2076_v52 = vshrl.u32 %v4535_v28, 16 }
  0x7b   : > { %1815 = vmatprep.mubr.bf16.mxu0 %v4364_v55  ;;  %3472 = vmatprep.mubr.bf16.mxu1 %v3037_v24  ;;  %v3734_v55 = vld [vmem:[%s4792_s6 + $0x160] sm:$0xff]   ;;  %v2059_v24 = vrot.slane %v2057_v33, 1  ;;  %v2000_v50 = vshll.u32 %v3720_v25, 16  ;;  %v2114_v40 = vrot.slane %v4531_v31, 1 }
  0x7c   : > { %v3736_v33 = vld [vmem:[%s4792_s6 + $0xe0] sm:$0xff]  }
  0x7d   : > { %3463 = vmatpush3.bf16.msra.mxu1 %v3731_v48  ;;  %3235 = vmatpush3.bf16.msra.mxu0 %v3733_v9  ;;  %v1997_v48 = vshrl.u32 %v3720_v25, 16  ;;  %v2078_v9 = vshll.u32 %v4535_v28, 16  ;;  %v4548_v8 = vor.u32 %v2059_v24, %v2055_v21  ;;  %v3740_v21 = vld [vmem:[%s4792_s6 + $0x170] sm:$0xff]   ;;  %v2069_v25 = vshrl.u32 %v4531_v31, 16 }
  0x7e   : > { %3464 = vmatprep.subr.bf16.mxu1 %v3734_v55  ;;  %3236 = vmatprep.subr.bf16.mxu0 %v3735_v56  ;;  %v2033_v56 = vsel %vm3916_vm4, 0, %v1995_v10  ;;  %v2073_v24 = vrot.slane %v2071_v45, 1  ;;  %v2115_v10 = vrot.slane %v4535_v28, 1 }
  0x7f   : > { %v1999_v59 = vrot.slane %v1997_v48, 7  ;;  %v2080_v23 = vrot.slane %v2078_v9, 1  ;;  %v3036_v48 = vcombine.low %v4548_v8, %v4550_v20  ;;  %v3742_v9 = vld [vmem:[%s4792_s6 + $0xf0] sm:$0xff]  }
  0x80   : > { %1816 = vmatmul.mubr.bf16.gmra.mrb[40].mxu0 %v4392_v7  ;;  %v3737_v7 = vld [vmem:[%s4792_s6 + $0x168] sm:$0xff]  }
  0x81   : > { %3465 = vmatpush3.bf16.msra.mxu1 %v3734_v55  ;;  %3237 = vmatpush3.bf16.msra.mxu0 %v3736_v33  ;;  %v3738_v55 = vld [vmem:[%s4792_s6 + $0x128] sm:$0xff]   ;;  %v4575_v33 = vsel %vm3930_vm5, %v2032_v29, 0  ;;  %v2002_v45 = vor.u32 %v2000_v50, %v1999_v59  ;;  %v4589_v29 = vor.u32 %v2080_v23, %v2076_v52  ;;  %v3744_v59 = vld [vmem:[%s4792_s6 + $0x138] sm:$0xff]   ;;  %v3035_v52 = vcombine.low %v4460_v14, %v4464_v38 }
  0x82   : > { %3466 = vmatprep.subr.bf16.mxu1 %v3737_v7  ;;  %3238 = vmatprep.subr.bf16.mxu0 %v3738_v55  ;;  %v3743_v55 = vld [vmem:[%s4792_s6 + $0x178] sm:$0xff]   ;;  %v2085_v50 = vshll.u32 %v4575_v33, 16  ;;  %v2083_v32 = vshrl.u32 %v4575_v33, 16 }
  0x83   : > { %1823 = vmatprep.mubr.bf16.mxu0 %v2999_v5  ;;  %v3739_v5 = vld [vmem:[%s4792_s6 + $0xe8] sm:$0xff]   ;;  %v3745_v23 = vld [vmem:[%s4792_s6 + $0xf8] sm:$0xff]  }
  0x85   : > { %3467 = vmatpush3.bf16.msra.mxu1 %v3737_v7  ;;  %3239 = vmatpush3.bf16.msra.mxu0 %v3739_v5  ;;  %v4579_v7 = vsel %vm3930_vm5, %v2033_v56, 0  ;;  %v4587_v5 = vor.u32 %v2073_v24, %v2069_v25  ;;  %v3040_v56 = vcombine.low %v2114_v40, %v2115_v10  ;;  %v2116_v25 = vrot.slane %v4575_v33, 1 }
  0x86   : > { %3468 = vmatprep.subr.bf16.mxu1 %v3740_v21  ;;  %3240 = vmatprep.subr.bf16.mxu0 %v3741_v57  ;;  %v2117_v24 = vrot.slane %v4579_v7, 1 }
  0x87   : > { %v3039_v57 = vcombine.low %v4587_v5, %v4589_v29 }
  0x88   : > { %1824 = vmatmul.mubr.bf16.gmra.mrb[44].mxu0 %v2998_v51  ;;  %v2092_v51 = vshll.u32 %v4579_v7, 16 }
  0x89   : > { %3469 = vmatpush3.bf16.msra.mxu1 %v3740_v21  ;;  %3241 = vmatpush3.bf16.msra.mxu0 %v3742_v9  ;;  %v2034_v21 = vsel %vm3916_vm4, 0, %v2002_v45  ;;  %v2087_v45 = vrot.slane %v2085_v50, 1  ;;  %v2090_v9 = vshrl.u32 %v4579_v7, 16  ;;  %v3747_v50 = vld [vmem:[%s4792_s6 + $0x80] sm:$0xff]  }
  0x8a   : > { %3470 = vmatprep.subr.bf16.mxu1 %v3743_v55  ;;  %3242 = vmatprep.subr.bf16.mxu0 %v3744_v59  ;;  %v4619_v59 = vsel %vm3930_vm5, %v2034_v21, 0  ;;  %v4841_v21 = vrot.slane %v4443_v22, 1 }
  0x8b   : > { %2211 = vmatprep.mubr.bf16.mxu0 %v3036_v48  ;;  %v3746_v48 = vld [vmem:[%s4792_s6 + $0x40] sm:$0xff]   ;;  %v4632_v39 = vor.u32 %v2087_v45, %v2083_v32 }
  0x8d   : > { %3471 = vmatpush3.bf16.msra.mxu1 %v3743_v55  ;;  %3243 = vmatpush3.bf16.msra.mxu0 %v3745_v23  ;;  %v2094_v55 = vrot.slane %v2092_v51, 1  ;;  %v2118_v23 = vrot.slane %v4619_v59, 1 }
  0x8e   : > { %3480 = vmatprep.subr.bf16.mxu1 %v3926_v37  ;;  %3280 = vmatprep.subr.bf16.mxu0 %v3746_v48  ;;  %v3043_v37 = vcombine.low %v2116_v25, %v2117_v24  ;;  %v4842_v48 = vrot.slane %v4460_v14, 1 }
  0x8f   : > { %v4634_v51 = vor.u32 %v2094_v55, %v2090_v9 }
  0x90   : > { %3473 = vmatmul.mubr.bf16.vlgmr.msra.gmra.mrb[8].mxu1 %v3040_v56  ;;  %2212 = vmatmul.mubr.bf16.vlgmr.msra.gmra.mrb[48].mxu0 %v3035_v52  ;;  %v2099_v56 = vshll.u32 %v4619_v59, 16  ;;  %v3046_v52 = vcombine.low %v2118_v23, %v4841_v21 }
  0x91   : > { %3481 = vmatpush3.bf16.msra.mxu1 %v3747_v50  ;;  %3281 = vmatpush3.bf16.msra.mxu0 %v3972_v6  ;;  %v3038_v6 = vcombine.low %v4531_v31, %v4535_v28 }
  0x92   : > { %3482 = vmatprep.subr.bf16.mxu1 %v3995_v17  ;;  %3282 = vmatprep.subr.bf16.mxu0 %v3989_v15  ;;  %v3042_v15 = vcombine.low %v4632_v39, %v4634_v51  ;;  %v2101_v32 = vrot.slane %v2099_v56, 1 }
  0x93   : > { %2219 = vmatprep.mubr.bf16.mxu0 %v3039_v57  ;;  %3476 = vmatprep.mubr.bf16.mxu1 %v3043_v37  ;;  %v2097_v57 = vshrl.u32 %v4619_v59, 16 }
  0x95   : > { %3483 = vmatpush3.bf16.msra.mxu1 %v3995_v17  ;;  %3283 = vmatpush3.bf16.msra.mxu0 %v4000_v18  ;;  %v3049_v17 = vcombine.low %v4154_v54, %v4842_v48  ;;  %v2102_v18 = vor.u32 %v2101_v32, %v2097_v57  ;;  %v4845_v54 = vld [vmem:[#allocation3_spill] sm:$0xff] }
  0x96   : > { %3484 = vmatprep.subr.bf16.mxu1 %v4024_v34  ;;  %3284 = vmatprep.subr.bf16.mxu0 %v4016_v27  ;;  %v3041_v27 = vcombine.low %v4575_v33, %v4579_v7 }
  0x98   : > { %3477 = vmatmul.mubr.bf16.gmra.mrb[12].mxu1 %v3046_v52  ;;  %2220 = vmatmul.mubr.bf16.gmra.mrb[52].mxu0 %v3038_v6 }
  0x99   : > { %3485 = vmatpush3.bf16.msra.mxu1 %v4024_v34  ;;  %3285 = vmatpush3.bf16.msra.mxu0 %v4032_v36  ;;  %v3045_v34 = vcombine.low %v2102_v18, %v4475_v26  ;;  %v3044_v36 = vcombine.low %v4619_v59, %v4443_v22 }
  0x9a   : > { %3486 = vmatprep.subr.bf16.mxu1 %v4049_v46  ;;  %3286 = vmatprep.subr.bf16.mxu0 %v4044_v43  ;;  %v3048_v43 = vcombine.low %v4175_v19, %v4548_v8  ;;  %v4860_v8 = vld [vmem:[#allocation18_spill] sm:$0xff] }
  0x9b   : > { %2227 = vmatprep.mubr.bf16.mxu0 %v3042_v15  ;;  %3496 = vmatprep.mubr.bf16.mxu1 %v3049_v17 }
  0x9d   : > { %3487 = vmatpush3.bf16.msra.mxu1 %v4049_v46  ;;  %3287 = vmatpush3.bf16.msra.mxu0 %v4054_v47  ;;  %v4843_v46 = vrot.slane %v4464_v38, 1 }
  0x9e   : > { %3488 = vmatprep.subr.bf16.mxu1 %v4090_v2  ;;  %3288 = vmatprep.subr.bf16.mxu0 %v4085_v0  ;;  %v3047_v0 = vcombine.low %v4058_v49, %v4460_v14  ;;  %v4856_v14 = vld [vmem:[#allocation14_spill] sm:$0xff] }
  0x9f   : > { %v3052_v47 = vcombine.low %v4843_v46, %v2114_v40  ;;  %v3059_v40 = vcombine.low %v4443_v22, %v4058_v49 }
  0xa0   : > { %2228 = vmatmul.mubr.bf16.gmra.mrb[56].mxu0 %v3041_v27 }
  0xa1   : > { %3489 = vmatpush3.bf16.msra.mxu1 %v4090_v2  ;;  %3289 = vmatpush3.bf16.msra.mxu0 %v4095_v3  ;;  %v3051_v2 = vcombine.low %v4550_v20, %v4587_v5  ;;  %v3055_v3 = vcombine.low %v2115_v10, %v2116_v25  ;;  %v4861_v20 = vcombine.low %v4475_v26, %v4175_v19 }
  0xa2   : > { %3490 = vmatprep.subr.bf16.mxu1 %v4119_v30  ;;  %3290 = vmatprep.subr.bf16.mxu0 %v4102_v13  ;;  %v3058_v13 = vcombine.low %v2117_v24, %v2118_v23 }
  0xa3   : > { %2235 = vmatprep.mubr.bf16.mxu0 %v3045_v34 }
  0xa5   : > { %3491 = vmatpush3.bf16.msra.mxu1 %v4119_v30  ;;  %3291 = vmatpush3.bf16.msra.mxu0 %v4131_v41  ;;  %v3050_v30 = vcombine.low %v4464_v38, %v4531_v31  ;;  %v3054_v41 = vcombine.low %v4589_v29, %v4632_v39  ;;  %v4857_v38 = vld [vmem:[#allocation15_spill] sm:$0xff]  ;;  %v4858_v31 = vld [vmem:[#allocation16_spill] sm:$0xff] }
  0xa6   : > { %3492 = vmatprep.subr.bf16.mxu1 %v4168_v11  ;;  %3292 = vmatprep.subr.bf16.mxu0 %v4151_v53  ;;  %v4844_v53 = vld [vmem:[#allocation2_spill] sm:$0xff] }
  0xa8   : > { %2236 = vmatmul.mubr.bf16.gmra.mrb[60].mxu0 %v3044_v36 }
  0xa9   : > { %3493 = vmatpush3.bf16.msra.mxu1 %v4168_v11  ;;  %3293 = vmatpush3.bf16.msra.mxu0 %v4173_v12  ;;  %v4846_v11 = vld [vmem:[#allocation4_spill] sm:$0xff]  ;;  %v3053_v12 = vcombine.low %v4535_v28, %v4575_v33  ;;  %v4859_v28 = vld [vmem:[#allocation17_spill] sm:$0xff] }
  0xaa   : > { %3494 = vmatprep.subr.bf16.mxu1 %v4201_v60  ;;  %3294 = vmatprep.subr.bf16.mxu0 %v4190_v35  ;;  %v4847_v35 = vld [vmem:[#allocation5_spill] sm:$0xff] }
  0xab   : > { %2365 = vmatprep.mubr.bf16.mxu0 %v3048_v43 }
  0xad   : > { %3495 = vmatpush3.bf16.msra.mxu1 %v4201_v60  ;;  %3295 = vmatpush3.bf16.msra.mxu0 %v4209_v42  ;;  %v4848_v60 = vld [vmem:[#allocation6_spill] sm:$0xff]  ;;  %v4849_v42 = vld [vmem:[#allocation7_spill] sm:$0xff] }
  0xae   : > { %3504 = vmatprep.subr.bf16.mxu1 %v4223_v1  ;;  %3332 = vmatprep.subr.bf16.mxu0 %v4215_v44  ;;  %v3057_v44 = vcombine.low %v4634_v51, %v2102_v18 }
  0xb0   : > { %3497 = vmatmul.mubr.bf16.vlgmr.msra.gmra.mrb[8].mxu1 %v3052_v47  ;;  %2366 = vmatmul.mubr.bf16.vlgmr.msra.gmra.mrb[64].mxu0 %v3047_v0 }
  0xb1   : > { %3505 = vmatpush3.bf16.msra.mxu1 %v4223_v1  ;;  %3333 = vmatpush3.bf16.msra.mxu0 %v4237_v58  ;;  %v4850_v1 = vld [vmem:[#allocation8_spill] sm:$0xff]  ;;  %v4851_v58 = vld [vmem:[#allocation9_spill] sm:$0xff] }
  0xb2   : > { %3506 = vmatprep.subr.bf16.mxu1 %v4243_v62  ;;  %3334 = vmatprep.subr.bf16.mxu0 %v4248_v61  ;;  %v3056_v61 = vcombine.low %v4579_v7, %v4619_v59 }
  0xb3   : > { %2373 = vmatprep.mubr.bf16.mxu0 %v3051_v2  ;;  %3500 = vmatprep.mubr.bf16.mxu1 %v3055_v3 }
  0xb5   : > { %3507 = vmatpush3.bf16.msra.mxu1 %v4243_v62  ;;  %3335 = vmatpush3.bf16.msra.mxu0 %v4264_v63  ;;  %v4852_v62 = vld [vmem:[#allocation10_spill] sm:$0xff]  ;;  %v4853_v63 = vld [vmem:[#allocation11_spill] sm:$0xff] }
  0xb6   : > { %3508 = vmatprep.subr.bf16.mxu1 %v4271_v4  ;;  %3336 = vmatprep.subr.bf16.mxu0 %v4278_v16  ;;  %v4855_v16 = vld [vmem:[#allocation13_spill] sm:$0xff] }
  0xb8   : > { %3501 = vmatmul.mubr.bf16.gmra.mrb[12].mxu1 %v3058_v13  ;;  %2374 = vmatmul.mubr.bf16.gmra.mrb[68].mxu0 %v3050_v30 }
  0xb9   : > { %3509 = vmatpush3.bf16.msra.mxu1 %v4271_v4  ;;  %3337 = vmatpush3.bf16.msra.mxu0 %v4844_v53  ;;  %v4854_v4 = vld [vmem:[#allocation12_spill] sm:$0xff] }
  0xba   : > { %3510 = vmatprep.subr.bf16.mxu1 %v4845_v54  ;;  %3338 = vmatprep.subr.bf16.mxu0 %v4846_v11 }
  0xbb   : > { %2381 = vmatprep.mubr.bf16.mxu0 %v3054_v41  ;;  %3520 = vmatprep.mubr.bf16.mxu1 %v3052_v47 }
  0xbd   : > { %3511 = vmatpush3.bf16.msra.mxu1 %v4845_v54  ;;  %3339 = vmatpush3.bf16.msra.mxu0 %v4847_v35 }
  0xbe   : > { %3512 = vmatprep.subr.bf16.mxu1 %v4848_v60  ;;  %3340 = vmatprep.subr.bf16.mxu0 %v4849_v42 }
  0xc0   : > { %2382 = vmatmul.mubr.bf16.gmra.mrb[72].mxu0 %v3053_v12 }
  0xc1   : > { %3513 = vmatpush3.bf16.msra.mxu1 %v4848_v60  ;;  %3341 = vmatpush3.bf16.msra.mxu0 %v4850_v1 }
  0xc2   : > { %3514 = vmatprep.subr.bf16.mxu1 %v4851_v58  ;;  %3342 = vmatprep.subr.bf16.mxu0 %v4852_v62 }
  0xc3   : > { %2389 = vmatprep.mubr.bf16.mxu0 %v3057_v44 }
  0xc5   : > { %3515 = vmatpush3.bf16.msra.mxu1 %v4851_v58  ;;  %3343 = vmatpush3.bf16.msra.mxu0 %v4853_v63 }
  0xc6   : > { %3516 = vmatprep.subr.bf16.mxu1 %v4854_v4  ;;  %3344 = vmatprep.subr.bf16.mxu0 %v4855_v16 }
  0xc8   : > { %2390 = vmatmul.mubr.bf16.gmra.mrb[76].mxu0 %v3056_v61 }
  0xc9   : > { %3517 = vmatpush3.bf16.msra.mxu1 %v4854_v4  ;;  %3345 = vmatpush3.bf16.msra.mxu0 %v4856_v14 }
  0xca   : > { %3518 = vmatprep.subr.bf16.mxu1 %v4857_v38  ;;  %3346 = vmatprep.subr.bf16.mxu0 %v4858_v31 }
  0xcb   : > { %2513 = vmatprep.mubr.bf16.mxu0 %v3051_v2 }
  0xcd   : > { %3519 = vmatpush3.bf16.msra.mxu1 %v4857_v38  ;;  %3347 = vmatpush3.bf16.msra.mxu0 %v4859_v28 }
  0xd0   : > { %3521 = vmatmul.mubr.bf16.vlgmr.msra.gmra.mrb[8].mxu1 %v3055_v3  ;;  %2514 = vmatmul.mubr.bf16.vlgmr.msra.gmra.mrb[80].mxu0 %v3050_v30 }
  0xd1   : > { %3524 = vmatprep.mubr.bf16.mxu1 %v3058_v13  ;;  %2521 = vmatprep.mubr.bf16.mxu0 %v3054_v41 }
  0xd8   : > { %3525 = vmatmul.mubr.bf16.gmra.mrb[12].mxu1 %v4860_v8  ;;  %2522 = vmatmul.mubr.bf16.gmra.mrb[84].mxu0 %v3053_v12 }
  0xd9   : > { %2529 = vmatprep.mubr.bf16.mxu0 %v3057_v44 }
  0xe0   : > { %2530 = vmatmul.mubr.bf16.gmra.mrb[88].mxu0 %v3056_v61 }
  0xe1   : > { %2537 = vmatprep.mubr.bf16.mxu0 %v4861_v20 }
  0xe8   : > { %2538 = vmatmul.mubr.bf16.gmra.mrb[92].mxu0 %v3059_v40 }
 0x103   : > { %v3088_v10 = vpop.f32.mrb[0].mxu0 }
 0x104   : > { %v3089_v33 = vpop.f32.mrb[1].mxu0 }
 0x105   : > { %v3090_v7 = vadd.f32 %v3089_v33, %v3088_v10  ;;  %v3091_v5 = vpop.f32.mrb[2].mxu0 }
 0x106   : > { %v3092_v29 = vpop.f32.mrb[3].mxu0 }
 0x107   : > { %v3093_v25 = vadd.f32 %v3092_v29, %v3091_v5 }
 0x10b   : > { %v3094_v24 = vpop.f32.mrb[4].mxu0 }
 0x10c   : > { %v3095_v45 = vpop.f32.mrb[5].mxu0 }
 0x10d   : > { %v3096_v9 = vadd.f32 %v3095_v45, %v3094_v24  ;;  %v3097_v55 = vpop.f32.mrb[6].mxu0 }
 0x10e   : > { %v3098_v59 = vpop.f32.mrb[7].mxu0 }
 0x10f   : > { %v3099_v37 = vadd.f32 %v3098_v59, %v3097_v55 }
 0x113   : > { %v3100_v23 = vpop.f32.mrb[8].mxu0 }
 0x114   : > { %v3101_v50 = vpop.f32.mrb[9].mxu0 }
 0x115   : > { %v3102_v19 = vadd.f32 %v3101_v50, %v3100_v23  ;;  %v3103_v26 = vpop.f32.mrb[10].mxu0 }
 0x116   : > { %v3104_v39 = vpop.f32.mrb[11].mxu0 }
 0x117   : > { %v3105_v51 = vadd.f32 %v3104_v39, %v3103_v26 }
 0x11b   : > { %v3106_v49 = vpop.f32.mrb[12].mxu0 }
 0x11c   : > { %v3107_v22 = vpop.f32.mrb[13].mxu0 }
 0x11d   : > { %v3108_v56 = vadd.f32 %v3107_v22, %v3106_v49  ;;  %v3109_v21 = vpop.f32.mrb[14].mxu0 }
 0x11e   : > { %v3110_v52 = vpop.f32.mrb[15].mxu0 }
 0x11f   : > { %v3111_v6 = vadd.f32 %v3110_v52, %v3109_v21 }
 0x123   : > { %v3140_v15 = vpop.f32.mrb[16].mxu0 }
 0x124   : > { %v3141_v57 = vpop.f32.mrb[17].mxu0 }
 0x125   : > { %v3142_v32 = vadd.f32 %v3141_v57, %v3140_v15  ;;  %v3143_v48 = vpop.f32.mrb[18].mxu0 }
 0x126   : > { %v3144_v17 = vpop.f32.mrb[19].mxu0 }
 0x127   : > { %v3531_v18 = vadd.f32 %v3142_v32, %v3090_v7  ;;  %v3145_v27 = vadd.f32 %v3144_v17, %v3143_v48 }
 0x129   : > { %v3537_v34 = vadd.f32 %v3145_v27, %v3093_v25 }
 0x12b   : > { %v3146_v36 = vpop.f32.mrb[20].mxu0 }
 0x12c   : > { %v3147_v43 = vpop.f32.mrb[21].mxu0 }
 0x12d   : > { %v3148_v46 = vadd.f32 %v3147_v43, %v3146_v36  ;;  %v3149_v47 = vpop.f32.mrb[22].mxu0 }
 0x12e   : > { %v3150_v0 = vpop.f32.mrb[23].mxu0 }
 0x12f   : > { %v3528_v2 = vadd.f32 %v3148_v46, %v3096_v9  ;;  %v3151_v3 = vadd.f32 %v3150_v0, %v3149_v47 }
 0x131   : > { %v3534_v13 = vadd.f32 %v3151_v3, %v3099_v37 }
 0x133   : > { %v3152_v30 = vpop.f32.mrb[24].mxu0 }
 0x134   : > { %v3153_v41 = vpop.f32.mrb[25].mxu0 }
 0x135   : > { %v3154_v53 = vadd.f32 %v3153_v41, %v3152_v30  ;;  %v3155_v54 = vpop.f32.mrb[26].mxu0 }
 0x136   : > { %v3156_v11 = vpop.f32.mrb[27].mxu0 }
 0x137   : > { %v3543_v12 = vadd.f32 %v3154_v53, %v3102_v19  ;;  %v3157_v35 = vadd.f32 %v3156_v11, %v3155_v54 }
 0x139   : > { %v3549_v60 = vadd.f32 %v3157_v35, %v3105_v51 }
 0x13b   : > { %v3158_v42 = vpop.f32.mrb[28].mxu0 }
 0x13c   : > { %v3159_v44 = vpop.f32.mrb[29].mxu0 }
 0x13d   : > { %v3160_v1 = vadd.f32 %v3159_v44, %v3158_v42  ;;  %v3161_v58 = vpop.f32.mrb[30].mxu0 }
 0x13e   : > { %v3162_v62 = vpop.f32.mrb[31].mxu0 }
 0x13f   : > { %v3540_v61 = vadd.f32 %v3160_v1, %v3108_v56  ;;  %v3163_v63 = vadd.f32 %v3162_v62, %v3161_v58 }
 0x141   : > { %v3546_v4 = vadd.f32 %v3163_v63, %v3111_v6 }
 0x143   : > { %v3450_v16 = vpop.f32.mrb[0].mxu1  ;;  %v3192_v14 = vpop.f32.mrb[32].mxu0 }
 0x144   : > { %v1866_v38 = vpop.f32.mrb[1].mxu1  ;;  %v3193_v31 = vpop.f32.mrb[33].mxu0 }
 0x145   : > { %v3451_v28 = vpop.f32.mrb[2].mxu1  ;;  %v3194_v8 = vadd.f32 %v3193_v31, %v3192_v14  ;;  %v3195_v20 = vpop.f32.mrb[34].mxu0 }
 0x146   : > { %v1869_v40 = vpop.f32.mrb[3].mxu1  ;;  %v3196_v10 = vpop.f32.mrb[35].mxu0 }
 0x147   : > { %v3532_v33 = vadd.f32 %v3531_v18, %v3194_v8  ;;  %v3197_v7 = vadd.f32 %v3196_v10, %v3195_v20 }
 0x149   : > { %v4745_v5 = vadd.f32 %v3532_v33, %v1866_v38  ;;  %v3538_v29 = vadd.f32 %v3537_v34, %v3197_v7 }
 0x14b   : > { %v3454_v25 = vpop.f32.mrb[4].mxu1  ;;  %v4747_v24 = vadd.f32 %v3538_v29, %v1869_v40  ;;  %v3198_v45 = vpop.f32.mrb[36].mxu0 }
 0x14c   : > { %v1882_v9 = vpop.f32.mrb[5].mxu1  ;;  %v3199_v55 = vpop.f32.mrb[37].mxu0 }
 0x14d   : > { %v3455_v59 = vpop.f32.mrb[6].mxu1  ;;  %v3200_v37 = vadd.f32 %v3199_v55, %v3198_v45  ;;  %v3201_v23 = vpop.f32.mrb[38].mxu0 }
 0x14e   : > { %v1885_v50 = vpop.f32.mrb[7].mxu1  ;;  %v3202_v19 = vpop.f32.mrb[39].mxu0 }
 0x14f   : > { %v3529_v26 = vadd.f32 %v3528_v2, %v3200_v37  ;;  %v3203_v39 = vadd.f32 %v3202_v19, %v3201_v23 }
 0x151   : > { %v4749_v51 = vadd.f32 %v3529_v26, %v3450_v16  ;;  %v3535_v49 = vadd.f32 %v3534_v13, %v3203_v39 }
 0x153   : > { %v4751_v22 = vadd.f32 %v3535_v49, %v3451_v28  ;;  %v3204_v56 = vpop.f32.mrb[40].mxu0 }
 0x154   : > { %v3205_v21 = vpop.f32.mrb[41].mxu0 }
 0x155   : > { %v3206_v52 = vadd.f32 %v3205_v21, %v3204_v56  ;;  %v3207_v6 = vpop.f32.mrb[42].mxu0 }
 0x156   : > { %v3208_v15 = vpop.f32.mrb[43].mxu0 }
 0x157   : > { %v3544_v57 = vadd.f32 %v3543_v12, %v3206_v52  ;;  %v3209_v32 = vadd.f32 %v3208_v15, %v3207_v6 }
 0x159   : > { %v4753_v48 = vadd.f32 %v3544_v57, %v1882_v9  ;;  %v3550_v17 = vadd.f32 %v3549_v60, %v3209_v32 }
 0x15b   : > { %v4755_v18 = vadd.f32 %v3550_v17, %v1885_v50  ;;  %v3210_v27 = vpop.f32.mrb[44].mxu0 }
 0x15c   : > { %v3211_v34 = vpop.f32.mrb[45].mxu0 }
 0x15d   : > { %v3212_v36 = vadd.f32 %v3211_v34, %v3210_v27  ;;  %v3213_v43 = vpop.f32.mrb[46].mxu0 }
 0x15e   : > { %v3214_v46 = vpop.f32.mrb[47].mxu0 }
 0x15f   : > { %v3541_v47 = vadd.f32 %v3540_v61, %v3212_v36  ;;  %v3215_v0 = vadd.f32 %v3214_v46, %v3213_v43 }
 0x161   : > { %v4757_v2 = vadd.f32 %v3541_v47, %v3454_v25  ;;  %v3547_v3 = vadd.f32 %v3546_v4, %v3215_v0 }
 0x163   : > { %v4759_v13 = vadd.f32 %v3547_v3, %v3455_v59  ;;  %v3244_v30 = vpop.f32.mrb[48].mxu0 }
 0x164   : > { %v3245_v41 = vpop.f32.mrb[49].mxu0 }
 0x165   : > { %v3246_v53 = vadd.f32 %v3245_v41, %v3244_v30  ;;  %v3247_v54 = vpop.f32.mrb[50].mxu0 }
 0x166   : > { %v3248_v11 = vpop.f32.mrb[51].mxu0 }
 0x167   : > { %v3249_v12 = vadd.f32 %v3248_v11, %v3247_v54 }
 0x16b   : > { %v3250_v35 = vpop.f32.mrb[52].mxu0 }
 0x16c   : > { %v3251_v60 = vpop.f32.mrb[53].mxu0 }
 0x16d   : > { %v3252_v42 = vadd.f32 %v3251_v60, %v3250_v35  ;;  %v3253_v44 = vpop.f32.mrb[54].mxu0 }
 0x16e   : > { %v3254_v1 = vpop.f32.mrb[55].mxu0 }
 0x16f   : > { %v3255_v58 = vadd.f32 %v3254_v1, %v3253_v44 }
 0x173   : > { %v3256_v62 = vpop.f32.mrb[56].mxu0 }
 0x174   : > { %v3257_v61 = vpop.f32.mrb[57].mxu0 }
 0x175   : > { %v3258_v63 = vadd.f32 %v3257_v61, %v3256_v62  ;;  %v3259_v16 = vpop.f32.mrb[58].mxu0 }
 0x176   : > { %v3260_v14 = vpop.f32.mrb[59].mxu0 }
 0x177   : > { %v3261_v4 = vadd.f32 %v3260_v14, %v3259_v16 }
 0x17b   : > { %v3262_v38 = vpop.f32.mrb[60].mxu0 }
 0x17c   : > { %v3263_v31 = vpop.f32.mrb[61].mxu0 }
 0x17d   : > { %v3264_v28 = vadd.f32 %v3263_v31, %v3262_v38  ;;  %v3265_v8 = vpop.f32.mrb[62].mxu0 }
 0x17e   : > { %v3266_v20 = vpop.f32.mrb[63].mxu0 }
 0x17f   : > { %v3267_v40 = vadd.f32 %v3266_v20, %v3265_v8 }
 0x183   : > { %v3296_v10 = vpop.f32.mrb[64].mxu0 }
 0x184   : > { %v3297_v33 = vpop.f32.mrb[65].mxu0 }
 0x185   : > { %v3298_v7 = vadd.f32 %v3297_v33, %v3296_v10  ;;  %v3299_v29 = vpop.f32.mrb[66].mxu0 }
 0x186   : > { %v3300_v25 = vpop.f32.mrb[67].mxu0 }
 0x187   : > { %v3555_v45 = vadd.f32 %v3298_v7, %v3246_v53  ;;  %v3301_v9 = vadd.f32 %v3300_v25, %v3299_v29 }
 0x189   : > { %v3561_v55 = vadd.f32 %v3301_v9, %v3249_v12 }
 0x18b   : > { %v3302_v59 = vpop.f32.mrb[68].mxu0 }
 0x18c   : > { %v3303_v37 = vpop.f32.mrb[69].mxu0 }
 0x18d   : > { %v3304_v23 = vadd.f32 %v3303_v37, %v3302_v59  ;;  %v3305_v50 = vpop.f32.mrb[70].mxu0 }
 0x18e   : > { %v3306_v19 = vpop.f32.mrb[71].mxu0 }
 0x18f   : > { %v3552_v26 = vadd.f32 %v3304_v23, %v3252_v42  ;;  %v3307_v39 = vadd.f32 %v3306_v19, %v3305_v50 }
 0x191   : > { %v3558_v49 = vadd.f32 %v3307_v39, %v3255_v58 }
 0x193   : > { %v3308_v56 = vpop.f32.mrb[72].mxu0 }
 0x194   : > { %v3309_v21 = vpop.f32.mrb[73].mxu0 }
 0x195   : > { %v3310_v52 = vadd.f32 %v3309_v21, %v3308_v56  ;;  %v3311_v6 = vpop.f32.mrb[74].mxu0 }
 0x196   : > { %v3312_v15 = vpop.f32.mrb[75].mxu0 }
 0x197   : > { %v3567_v57 = vadd.f32 %v3310_v52, %v3258_v63  ;;  %v3313_v32 = vadd.f32 %v3312_v15, %v3311_v6 }
 0x199   : > { %v3573_v17 = vadd.f32 %v3313_v32, %v3261_v4 }
 0x19b   : > { %v3314_v27 = vpop.f32.mrb[76].mxu0 }
 0x19c   : > { %v3315_v34 = vpop.f32.mrb[77].mxu0 }
 0x19d   : > { %v3316_v36 = vadd.f32 %v3315_v34, %v3314_v27  ;;  %v3317_v43 = vpop.f32.mrb[78].mxu0 }
 0x19e   : > { %v3318_v46 = vpop.f32.mrb[79].mxu0 }
 0x19f   : > { %v3564_v47 = vadd.f32 %v3316_v36, %v3264_v28  ;;  %v3319_v0 = vadd.f32 %v3318_v46, %v3317_v43 }
 0x1a1   : > { %v4761_v3 = vadd.f32 %v3319_v0, %v3267_v40 }
 0x1a3   : > { %v3522_v30 = vpop.f32.mrb[8].mxu1  ;;  %v3348_v41 = vpop.f32.mrb[80].mxu0 }
 0x1a4   : > { %v2580_v53 = vpop.f32.mrb[9].mxu1  ;;  %v3349_v54 = vpop.f32.mrb[81].mxu0 }
 0x1a5   : > { %v3523_v11 = vpop.f32.mrb[10].mxu1  ;;  %v3350_v12 = vadd.f32 %v3349_v54, %v3348_v41  ;;  %v3351_v35 = vpop.f32.mrb[82].mxu0 }
 0x1a6   : > { %v2583_v60 = vpop.f32.mrb[11].mxu1  ;;  %v3352_v42 = vpop.f32.mrb[83].mxu0 }
 0x1a7   : > { %v3556_v44 = vadd.f32 %v3555_v45, %v3350_v12  ;;  %v3353_v1 = vadd.f32 %v3352_v42, %v3351_v35 }
 0x1a9   : > { %v3557_v58 = vadd.f32 %v3556_v44, %v2580_v53  ;;  %v3562_v62 = vadd.f32 %v3561_v55, %v3353_v1 }
 0x1ab   : > { %v3526_v61 = vpop.f32.mrb[12].mxu1  ;;  %v2619_v63 = vsub.f32 %v4745_v5, %v3557_v58  ;;  %v3563_v16 = vadd.f32 %v3562_v62, %v2583_v60  ;;  %v3354_v14 = vpop.f32.mrb[84].mxu0 }
 0x1ac   : > { %v2596_v4 = vpop.f32.mrb[13].mxu1  ;;  %v3355_v38 = vpop.f32.mrb[85].mxu0 }
 0x1ad   : > { %v3527_v31 = vpop.f32.mrb[14].mxu1  ;;  %v2620_v28 = vsub.f32 %v4747_v24, %v3563_v16  ;;  %v3356_v8 = vadd.f32 %v3355_v38, %v3354_v14  ;;  %v3357_v20 = vpop.f32.mrb[86].mxu0  ;;  %v2628_v33 = vmul.f32 %v2619_v63, %v2619_v63 }
 0x1ae   : > { %v2599_v40 = vpop.f32.mrb[15].mxu1  ;;  %v3358_v10 = vpop.f32.mrb[87].mxu0 }
 0x1af   : > { %v2629_v7 = vmul.f32 %v2620_v28, %v2620_v28  ;;  %v3553_v29 = vadd.f32 %v3552_v26, %v3356_v8  ;;  %v3359_v25 = vadd.f32 %v3358_v10, %v3357_v20 }
 0x1b1   : > { %v2636_v45 = vadd.f32 %v2629_v7, %v2628_v33  ;;  %v3554_v9 = vadd.f32 %v3553_v29, %v3522_v30  ;;  %v3559_v55 = vadd.f32 %v3558_v49, %v3359_v25 }
 0x1b3   : > { %v2621_v5 = vsub.f32 %v4749_v51, %v3554_v9  ;;  %v3560_v59 = vadd.f32 %v3559_v55, %v3523_v11  ;;  %v3360_v37 = vpop.f32.mrb[88].mxu0 }
 0x1b4   : > { %v3361_v23 = vpop.f32.mrb[89].mxu0 }
 0x1b5   : > { %v2630_v50 = vmul.f32 %v2621_v5, %v2621_v5  ;;  %v2622_v19 = vsub.f32 %v4751_v22, %v3560_v59  ;;  %v3362_v24 = vadd.f32 %v3361_v23, %v3360_v37  ;;  %v3363_v39 = vpop.f32.mrb[90].mxu0 }
 0x1b6   : > { %v3364_v56 = vpop.f32.mrb[91].mxu0 }
 0x1b7   : > { %v2637_v21 = vadd.f32 %v2636_v45, %v2630_v50  ;;  %v2631_v52 = vmul.f32 %v2622_v19, %v2622_v19  ;;  %v3568_v6 = vadd.f32 %v3567_v57, %v3362_v24  ;;  %v3365_v15 = vadd.f32 %v3364_v56, %v3363_v39 }
 0x1b9   : > { %v2638_v26 = vadd.f32 %v2637_v21, %v2631_v52  ;;  %v3569_v32 = vadd.f32 %v3568_v6, %v2596_v4  ;;  %v3574_v27 = vadd.f32 %v3573_v17, %v3365_v15 }
 0x1bb   : > { %v2623_v49 = vsub.f32 %v4753_v48, %v3569_v32  ;;  %v3575_v51 = vadd.f32 %v3574_v27, %v2599_v40  ;;  %v3366_v34 = vpop.f32.mrb[92].mxu0 }
 0x1bc   : > { %v3367_v36 = vpop.f32.mrb[93].mxu0 }
 0x1bd   : > { %v2632_v43 = vmul.f32 %v2623_v49, %v2623_v49  ;;  %v2624_v22 = vsub.f32 %v4755_v18, %v3575_v51  ;;  %v3368_v46 = vadd.f32 %v3367_v36, %v3366_v34  ;;  %v3369_v0 = vpop.f32.mrb[94].mxu0 }
 0x1be   : > { %v3370_v30 = vpop.f32.mrb[95].mxu0 }
 0x1bf   : > { %v2639_v41 = vadd.f32 %v2638_v26, %v2632_v43  ;;  %v2633_v53 = vmul.f32 %v2624_v22, %v2624_v22  ;;  %v3565_v57 = vadd.f32 %v3564_v47, %v3368_v46  ;;  %v3371_v54 = vadd.f32 %v3370_v30, %v3369_v0 }
 0x1c1   : > { %v2640_v11 = vadd.f32 %v2639_v41, %v2633_v53  ;;  %v3566_v12 = vadd.f32 %v3565_v57, %v3526_v61  ;;  %v3571_v17 = vadd.f32 %v4761_v3, %v3371_v54 }
 0x1c3   : > { %v2625_v48 = vsub.f32 %v4757_v2, %v3566_v12  ;;  %v3572_v35 = vadd.f32 %v3571_v17, %v3527_v31 }
 0x1c5   : > { %v2634_v60 = vmul.f32 %v2625_v48, %v2625_v48  ;;  %v2626_v42 = vsub.f32 %v4759_v13, %v3572_v35 }
 0x1c7   : > { %v2641_v18 = vadd.f32 %v2640_v11, %v2634_v60  ;;  %v2635_v44 = vmul.f32 %v2626_v42, %v2626_v42 }
 0x1c9   : > { %v2642_v1 = vadd.f32 %v2641_v18, %v2635_v44 }
 0x1cb   : > { %2644 = vst [vmem:[%s597_s28] sm:$0xff] %v2642_v1 }
 0x1cc PF: > { %s17_s2 = sadd.s32 1, %s3770_s2   ;;  %s4862_s23 = smov %s3766_s24 }
 0x1cd   : > { %p14_p7 = scmp.ge.s32.totalorder %s17_s2, 4   ;;  %s4863_s24 = smov %s4865_s3 }
 0x1cf   :  { %16 = sbr.rel (!%p14_p7) target bundleno = 2 (0x2), region = 99 }

</bundles_post_ra>
